<compile_context>
chip_gen: v7x
topology: tpu7x:2x2x1
jax: 0.10.0
libtpu: 0.0.40
codegen_flags: <defaults>
</compile_context>

<pallas_src>
import math
import numpy as np

import jax
import jax.numpy as jnp
from jax.experimental import pallas as pl
from jax.experimental.pallas import tpu as pltpu


# ----------------------------- in-kernel math helpers -----------------------------

def _erf(x):
    # Abramowitz & Stegun 7.1.26 polynomial erf (max abs err ~1.5e-7), for torch's
    # default (erf-based) nn.GELU.
    p = 0.3275911
    a1, a2, a3, a4, a5 = (0.254829592, -0.284496736, 1.421413741,
                          -1.453152027, 1.061405429)
    sign = jnp.where(x >= 0.0, 1.0, -1.0)
    ax = jnp.abs(x)
    t = 1.0 / (1.0 + p * ax)
    poly = ((((a5 * t + a4) * t + a3) * t + a2) * t + a1) * t
    return sign * (1.0 - poly * jnp.exp(-ax * ax))


def _gelu_exact(x):
    return 0.5 * x * (1.0 + _erf(x * np.float32(1.0 / math.sqrt(2.0))))


# ----------------------------------- kernel ---------------------------------------

def _make_kernel(num_heads, head_size, hidden_dim, output_dim, batch_tile, seq_len,
                 compute_dtype, eps=1e-5):
    half = head_size // 2
    H = hidden_dim
    S = seq_len
    BT = batch_tile
    # RetNet per-head decay rates.
    gammas = 1.0 - np.exp(np.linspace(math.log(1.0 / 32.0),
                                      math.log(1.0 / 512.0), num_heads))
    log_gammas = [float(np.log(g)) for g in gammas]
    center = np.float32(0.5 * (S - 1))   # centers the rank-1 decay exponents

    def kernel(z_ref, w_in_ref, b_in_ref,
               ln1_w_ref, ln1_b_ref, wqkvg_ref,
               cosq_ref, sinq_ref, cosk_ref, sink_ref,
               gnw_ref, gnb_ref, wo_ref,
               ln2_w_ref, ln2_b_ref, w1_ref, b1_ref, w2_ref, b2_ref,
               wout_ref, bout_ref,
               out_ref, x_ref, y_ref):
        f32 = jnp.float32
        layer = pl.program_id(1)
        n_layers = pl.num_programs(1)

        def dot(a, b):
            # bf16 (or f32) MXU operands, f32 accumulation.
            return jnp.dot(a.astype(compute_dtype), b.astype(compute_dtype),
                           preferred_element_type=f32)

        def layernorm(x, w, b):
            m = jnp.mean(x, axis=-1, keepdims=True)
            v = jnp.mean((x - m) ** 2, axis=-1, keepdims=True)
            return (x - m) * jax.lax.rsqrt(v + eps) * w + b

        # -------- layer 0: residual stream <- input_proj(z) --------
        @pl.when(layer == 0)
        def _():
            x_ref[...] = dot(z_ref[...], w_in_ref[...]) + b_in_ref[...]

        x = x_ref[...]                                             # (BT*S, H) f32

        # Shared per-step constants (O(S)/O(S^2) VPU work, no dense exp mask).
        n_idx = jax.lax.broadcasted_iota(jnp.int32, (S, S), 0)
        m_idx = jax.lax.broadcasted_iota(jnp.int32, (S, S), 1)
        causal = n_idx >= m_idx                                    # (S, S) bool
        pos = (jax.lax.broadcasted_iota(jnp.int32, (S, 1), 0).astype(f32)
               - center)                                           # (S, 1)

        cos_q, sin_q = cosq_ref[...], sinq_ref[...]                # (S, hs)
        cos_k, sin_k = cosk_ref[...], sink_ref[...]

        # -------- MultiScaleRetention block: Y = retention(LN1(x)) + x --------
        xn = layernorm(x, ln1_w_ref[...], ln1_b_ref[...])
        qkvg = dot(xn, wqkvg_ref[...])                             # (BT*S, 4H) one wide matmul
        g = qkvg[:, 3 * H:4 * H]
        g = g * jax.nn.sigmoid(g)                                  # swish gate

        for h in range(num_heads):
            lg = np.float32(log_gammas[h])
            # Rank-1 decay folded into the XPOS scale vectors (2*S EUP exps per head):
            #   decay[n, m] = gamma^(n-m) = exp(lg*(n-c)) * exp(lg*(c-m))
            dq = jnp.exp(lg * pos)                                 # (S, 1)
            dk = jnp.exp(-lg * pos)                                # (S, 1)
            cq, sq = cos_q * dq, sin_q * dq                        # (S, hs)
            ck, sk = cos_k * dk, sin_k * dk
            c0 = h * head_size
            for b in range(BT):
                r0 = b * S
                qh = qkvg[r0:r0 + S, c0:c0 + head_size]
                kh = qkvg[r0:r0 + S, H + c0:H + c0 + head_size]
                vh = qkvg[r0:r0 + S, 2 * H + c0:2 * H + c0 + head_size]
                # XPOS rotate_every_two == lane roll in the de-interleaved channel
                # layout; the rotation sign is folded into the host sin tables.
                qr = qh * cq + pltpu.roll(qh, shift=half, axis=1) * sq
                kr = kh * ck + pltpu.roll(kh, shift=half, axis=1) * sk
                att = jax.lax.dot_general(
                    qr.astype(compute_dtype), kr.astype(compute_dtype),
                    (((1,), (1,)), ((), ())),
                    preferred_element_type=f32)                    # (S, S), decay baked in
                att = jnp.where(causal, att, 0.0)
                # NOTE: att is cast to compute_dtype for the AV matmul; use
                # compute_dtype=jnp.float32 if reconstruction precision is critical.
                yh = dot(att, vh)                                  # (S, hs)
                # GroupNorm(num_groups=heads): per-token stats over this head's channels,
                # slice-stored into the lane-aligned head-output slab (no concatenate).
                mu_h = jnp.mean(yh, axis=-1, keepdims=True)
                var_h = jnp.mean((yh - mu_h) ** 2, axis=-1, keepdims=True)
                y_ref[r0:r0 + S, c0:c0 + head_size] = (
                    (yh - mu_h) * jax.lax.rsqrt(var_h + eps))

        y = y_ref[...] * gnw_ref[...] + gnb_ref[...]
        ret = dot(g * y, wo_ref[...])                              # single full-width W_O
        y1 = ret + x                                               # residual 1

        # -------- FFN block: x <- FFN(LN2(y1)) + y1 --------
        yn = layernorm(y1, ln2_w_ref[...], ln2_b_ref[...])
        h1 = _gelu_exact(dot(yn, w1_ref[...]) + b1_ref[...])
        x_new = dot(h1, w2_ref[...]) + b2_ref[...] + y1            # residual 2
        x_ref[...] = x_new

        # -------- final layer: output heads (mu | std packed) --------
        @pl.when(layer == n_layers - 1)
        def _():
            o = dot(x_new, wout_ref[...]) + bout_ref[...]          # (BT*S, 2*Dout)
            out_ref[:, :output_dim] = o[:, :output_dim]
            out_ref[:, output_dim:] = (jax.nn.softplus(0.5 * o[:, output_dim:])
                                       + 0.001)

    return kernel


# ------------------------------ host-side constants --------------------------------

def _xpos_tables(seq_len, head_size, scale_base=512):
    """XPOS cos/sin tables in the de-interleaved (evens-then-odds) channel layout.
    The rotation sign is folded into the sin tables so the in-kernel rotation is a
    single pltpu.roll."""
    half = head_size // 2
    scale_vec = (np.arange(0, head_size, 2) + 0.4 * head_size) / (1.4 * head_size)
    pos = np.arange(seq_len, dtype=np.float64)
    scale = scale_vec[None, :] ** (pos[:, None] / scale_base)       # (S, half)
    inv_freq = 1.0 / (10000.0 ** (np.arange(half) / half))
    sinusoid = pos[:, None] * inv_freq[None, :]
    sin, cos = np.sin(sinusoid), np.cos(sinusoid)

    def dup(m):         # de-interleaved layout: [m | m]
        return np.concatenate([m, m], axis=1)

    def dup_signed(m):  # sign folded for the roll-based rotation: [-m | m]
        return np.concatenate([-m, m], axis=1)

    cos_q = dup(cos * scale)
    sin_q = dup_signed(sin * scale)
    inv_scale = 1.0 / scale
    cos_k = dup(cos * inv_scale)
    sin_k = dup_signed(sin * inv_scale)
    return tuple(a.astype(np.float32) for a in (cos_q, sin_q, cos_k, sin_k))


# --------------------------------- parameters --------------------------------------

def init_params(key, latent_dim, output_dim, hidden_dim, layers, ffn_size, heads):
    H = hidden_dim
    keys = iter(jax.random.split(key, 12))

    def nrm(shape, scale):
        return jax.random.normal(next(keys), shape, jnp.float32) * scale

    return dict(
        w_in=nrm((latent_dim, H), 1.0 / math.sqrt(latent_dim)),
        b_in=jnp.zeros((1, H), jnp.float32),
        ln1_w=jnp.ones((layers, 1, H), jnp.float32),
        ln1_b=jnp.zeros((layers, 1, H), jnp.float32),
        wq=nrm((layers, H, H), 1.0 / H),
        wk=nrm((layers, H, H), 1.0 / H),
        wv=nrm((layers, H, H), 1.0 / H),
        gn_w=jnp.ones((layers, 1, H), jnp.float32),
        gn_b=jnp.zeros((layers, 1, H), jnp.float32),
        wg=nrm((layers, H, H), 1.0 / H),
        wo=nrm((layers, H, H), 1.0 / H),
        ln2_w=jnp.ones((layers, 1, H), jnp.float32),
        ln2_b=jnp.zeros((layers, 1, H), jnp.float32),
        w1=nrm((layers, H, ffn_size), 1.0 / math.sqrt(H)),
        b1=jnp.zeros((layers, 1, ffn_size), jnp.float32),
        w2=nrm((layers, ffn_size, H), 1.0 / math.sqrt(ffn_size)),
        b2=jnp.zeros((layers, 1, H), jnp.float32),
        w_mu=nrm((H, output_dim), 1.0 / math.sqrt(H)),
        b_mu=jnp.zeros((1, output_dim), jnp.float32),
        w_lv=nrm((H, output_dim), 1.0 / math.sqrt(H)),
        b_lv=jnp.zeros((1, output_dim), jnp.float32),
    )


# ------------------------------- VMEM budgeting -------------------------------------

def _vmem_bytes_estimate(rows, S, latent, H, ffn, dout2, hs, wbytes):
    f32 = 4
    # Streamed per-layer weights, double buffered by the BlockSpec pipeline.
    w = 2 * wbytes * (H * 4 * H + H * H + H * ffn + ffn * H)
    # Per-layer vectors (double buffered) + replicated constants (tables, out head).
    small = (2 * f32 * (7 * H + ffn)
             + wbytes * (latent * H + H * dout2)
             + f32 * (H + dout2 + 4 * S * hs))
    # Residual + head-output f32 scratch slabs.
    scratch = 2 * f32 * rows * H
    # Double-buffered I/O blocks.
    io = 2 * f32 * rows * (latent + dout2)
    # Large live f32 intermediates: qkvg, ffn hidden, one (S,S) score + causal mask,
    # plus roughly one extra (rows, H) temporary.
    interm = f32 * (rows * 4 * H + rows * ffn + 2 * S * S + rows * H)
    return w + small + scratch + io + interm


def _pick_batch_tile(B, S, latent, H, ffn, dout2, hs, wbytes,
                     budget=48 * 1024 * 1024):
    """Largest divisor of B whose working-set estimate stays under `budget`
    (48 MiB keeps headroom on v7x's 64 MiB VMEM)."""
    best = 1
    for bt in range(1, B + 1):
        if B % bt:
            continue
        if _vmem_bytes_estimate(bt * S, S, latent, H, ffn, dout2, hs,
                                wbytes) <= budget:
            best = bt
    return best


# ---------------------------------- wrapper -----------------------------------------

def retnet_decoder(z, params, *, hidden_dim, layers, heads,
                   compute_dtype=jnp.bfloat16, batch_tile=None,
                   vmem_limit_bytes=None):
    """Returns (mu, std) of the reconstruction Normal distribution.
    # TODO(synk): torch.distributions.Independent(Normal(mu, std), 1) has no Pallas
    # equivalent; the kernel returns its parameter tensors (mu, std) instead."""
    B, S, latent_dim = z.shape
    H = hidden_dim
    output_dim = params["w_mu"].shape[1]
    ffn_size = params["w1"].shape[-1]
    assert H % heads == 0
    hs = H // heads
    assert hs % 2 == 0
    assert S % 8 == 0, "sequence length must be a multiple of the 8-row sublane tile"
    dout2 = 2 * output_dim

    wdt = compute_dtype
    wbytes = jnp.dtype(wdt).itemsize

    # Batch tile: fold several batch elements into the matmul row dimension so the
    # streamed layer weights are amortized and the MXU M dimension is filled.
    if batch_tile is None:
        batch_tile = _pick_batch_tile(B, S, latent_dim, H, ffn_size, dout2, hs, wbytes)
    assert B % batch_tile == 0
    nb = B // batch_tile
    rows = batch_tile * S

    est = _vmem_bytes_estimate(rows, S, latent_dim, H, ffn_size, dout2, hs, wbytes)
    if vmem_limit_bytes is None:
        vmem_limit_bytes = int(min(128 * 1024 * 1024,
                                   max(32 * 1024 * 1024, 1.4 * est)))

    # XPOS tables (de-interleaved layout, rotation sign folded into sin).
    cos_q, sin_q, cos_k, sin_k = _xpos_tables(S, hs)

    # Permute W_Q / W_K output channels per head to evens-then-odds so the in-kernel
    # rotation is a lane roll.  Q.K^T is invariant under this shared permutation.
    perm_head = np.concatenate([np.arange(0, hs, 2), np.arange(1, hs, 2)])
    perm = jnp.asarray(np.concatenate([h * hs + perm_head for h in range(heads)]),
                       jnp.int32)
    wq_p = jnp.take(params["wq"], perm, axis=-1)
    wk_p = jnp.take(params["wk"], perm, axis=-1)

    # Fused projections: [Q | K | V | G] -> one (H, 4H) matmul per layer.
    wqkvg = jnp.concatenate([wq_p, wk_p, params["wv"], params["wg"]],
                            axis=-1).astype(wdt)                    # (L, H, 4H)
    # Fused output heads: [mu | logvar] -> one (H, 2*Dout) matmul.
    w_out = jnp.concatenate([params["w_mu"], params["w_lv"]], axis=-1).astype(wdt)
    b_out = jnp.concatenate([params["b_mu"], params["b_lv"]], axis=-1)

    # Host-side reshape so each grid step sees a flat (B_tile*S, .) row slab.
    z_slab = z.reshape(nb, rows, latent_dim)

    def rep(shape):
        nd = len(shape)
        return pl.BlockSpec(shape, lambda b, l, nd=nd: (0,) * nd)

    def per_layer(trailing):
        nd = len(trailing)
        return pl.BlockSpec((None,) + tuple(trailing),
                            lambda b, l, nd=nd: (l,) + (0,) * nd)

    inputs = [
        z_slab,
        params["w_in"].astype(wdt), params["b_in"],
        params["ln1_w"], params["ln1_b"],
        wqkvg,
        jnp.asarray(cos_q), jnp.asarray(sin_q), jnp.asarray(cos_k), jnp.asarray(sin_k),
        params["gn_w"], params["gn_b"],
        params["wo"].astype(wdt),
        params["ln2_w"], params["ln2_b"],
        params["w1"].astype(wdt), params["b1"],
        params["w2"].astype(wdt), params["b2"],
        w_out, b_out,
    ]

    in_specs = [
        pl.BlockSpec((None, rows, latent_dim), lambda b, l: (b, 0, 0)),
        rep((latent_dim, H)), rep((1, H)),
        per_layer((1, H)), per_layer((1, H)),
        per_layer((H, 4 * H)),
        rep((S, hs)), rep((S, hs)), rep((S, hs)), rep((S, hs)),
        per_layer((1, H)), per_layer((1, H)),
        per_layer((H, H)),
        per_layer((1, H)), per_layer((1, H)),
        per_layer((H, ffn_size)), per_layer((1, ffn_size)),
        per_layer((ffn_size, H)), per_layer((1, H)),
        rep((H, dout2)), rep((1, dout2)),
    ]

    out_specs = pl.BlockSpec((None, rows, dout2), lambda b, l: (b, 0, 0))
    out_shape = jax.ShapeDtypeStruct((nb, rows, dout2), jnp.float32)

    kernel = _make_kernel(heads, hs, H, output_dim, batch_tile, S, compute_dtype)
    # NOTE: correctness of the residual VMEM carry and the write-once output requires the
    # layer axis to stay innermost ("arbitrary") with batch blocks outermost.
    packed = pl.pallas_call(
        kernel,
        grid=(nb, layers),
        in_specs=in_specs,
        out_specs=out_specs,
        out_shape=out_shape,
        scratch_shapes=[pltpu.VMEM((rows, H), jnp.float32),   # residual stream across layers
                        pltpu.VMEM((rows, H), jnp.float32)],  # per-head output slab
        compiler_params=pltpu.CompilerParams(
            dimension_semantics=("parallel", "arbitrary"),
            vmem_limit_bytes=vmem_limit_bytes),
    )(*inputs)

    packed = packed.reshape(B, S, dout2)
    mu = packed[..., :output_dim]
    std = packed[..., output_dim:]
    return mu, std


# ------------------------------------ main -------------------------------------------

if __name__ == "__main__":
    # Small shapes; hidden_dim/heads chosen so head_size == 128 (lane-aligned slices).
    B, S = 2, 8
    latent_dim, output_dim = 16, 16
    hidden_dim, ffn_size, heads, layers = 256, 512, 2, 2

    key = jax.random.PRNGKey(0)
    pkey, zkey = jax.random.split(key)
    params = init_params(pkey, latent_dim, output_dim, hidden_dim, layers,
                         ffn_size, heads)
    z = jax.random.normal(zkey, (B, S, latent_dim), jnp.float32)

    mu, std = retnet_decoder(z, params, hidden_dim=hidden_dim, layers=layers,
                             heads=heads)
    jax.block_until_ready((mu, std))

    assert mu.shape == (B, S, output_dim) and std.shape == (B, S, output_dim)
    assert bool(jnp.all(jnp.isfinite(mu))) and bool(jnp.all(std > 0.0))
    print("KERNEL_OK")
</pallas_src>

<mosaic_0001>
module attributes {stable_mosaic.version = 11 : i64} {
  func.func @kernel(%arg0: i32, %arg1: i32, %arg2: memref<1x16x16xf32, #tpu.memory_space<vmem>>, %arg3: memref<16x256xbf16, #tpu.memory_space<vmem>>, %arg4: memref<1x256xf32, #tpu.memory_space<vmem>>, %arg5: memref<1x1x256xf32, #tpu.memory_space<vmem>>, %arg6: memref<1x1x256xf32, #tpu.memory_space<vmem>>, %arg7: memref<1x256x1024xbf16, #tpu.memory_space<vmem>>, %arg8: memref<8x128xf32, #tpu.memory_space<vmem>>, %arg9: memref<8x128xf32, #tpu.memory_space<vmem>>, %arg10: memref<8x128xf32, #tpu.memory_space<vmem>>, %arg11: memref<8x128xf32, #tpu.memory_space<vmem>>, %arg12: memref<1x1x256xf32, #tpu.memory_space<vmem>>, %arg13: memref<1x1x256xf32, #tpu.memory_space<vmem>>, %arg14: memref<1x256x256xbf16, #tpu.memory_space<vmem>>, %arg15: memref<1x1x256xf32, #tpu.memory_space<vmem>>, %arg16: memref<1x1x256xf32, #tpu.memory_space<vmem>>, %arg17: memref<1x256x512xbf16, #tpu.memory_space<vmem>>, %arg18: memref<1x1x512xf32, #tpu.memory_space<vmem>>, %arg19: memref<1x512x256xbf16, #tpu.memory_space<vmem>>, %arg20: memref<1x1x256xf32, #tpu.memory_space<vmem>>, %arg21: memref<256x32xbf16, #tpu.memory_space<vmem>>, %arg22: memref<1x32xf32, #tpu.memory_space<vmem>>, %arg23: memref<1x16x32xf32, #tpu.memory_space<vmem>>, %arg24: memref<16x256xf32, #tpu.memory_space<vmem>>, %arg25: memref<16x256xf32, #tpu.memory_space<vmem>>) attributes {dimension_semantics = [#tpu.dimension_semantics<parallel>, #tpu.dimension_semantics<arbitrary>], iteration_bounds = array<i64: 1, 2>, scalar_prefetch = 0 : i64, scratch_operands = 2 : i64, tpu.core_type = #tpu.core_type<tc>, window_params = [{transform_indices = @transform_0, window_bounds = array<i64: 1, 16, 16>}, {pipeline_mode = #tpu.pipeline_mode<synchronous>, transform_indices = @transform_1, window_bounds = array<i64: 16, 256>}, {pipeline_mode = #tpu.pipeline_mode<synchronous>, transform_indices = @transform_2, window_bounds = array<i64: 1, 256>}, {transform_indices = @transform_3, window_bounds = array<i64: 1, 1, 256>}, {transform_indices = @transform_4, window_bounds = array<i64: 1, 1, 256>}, {transform_indices = @transform_5, window_bounds = array<i64: 1, 256, 1024>}, {pipeline_mode = #tpu.pipeline_mode<synchronous>, transform_indices = @transform_6, window_bounds = array<i64: 8, 128>}, {pipeline_mode = #tpu.pipeline_mode<synchronous>, transform_indices = @transform_7, window_bounds = array<i64: 8, 128>}, {pipeline_mode = #tpu.pipeline_mode<synchronous>, transform_indices = @transform_8, window_bounds = array<i64: 8, 128>}, {pipeline_mode = #tpu.pipeline_mode<synchronous>, transform_indices = @transform_9, window_bounds = array<i64: 8, 128>}, {transform_indices = @transform_10, window_bounds = array<i64: 1, 1, 256>}, {transform_indices = @transform_11, window_bounds = array<i64: 1, 1, 256>}, {transform_indices = @transform_12, window_bounds = array<i64: 1, 256, 256>}, {transform_indices = @transform_13, window_bounds = array<i64: 1, 1, 256>}, {transform_indices = @transform_14, window_bounds = array<i64: 1, 1, 256>}, {transform_indices = @transform_15, window_bounds = array<i64: 1, 256, 512>}, {transform_indices = @transform_16, window_bounds = array<i64: 1, 1, 512>}, {transform_indices = @transform_17, window_bounds = array<i64: 1, 512, 256>}, {transform_indices = @transform_18, window_bounds = array<i64: 1, 1, 256>}, {pipeline_mode = #tpu.pipeline_mode<synchronous>, transform_indices = @transform_19, window_bounds = array<i64: 256, 32>}, {pipeline_mode = #tpu.pipeline_mode<synchronous>, transform_indices = @transform_20, window_bounds = array<i64: 1, 32>}, {transform_indices = @transform_21, window_bounds = array<i64: 1, 16, 32>}]} {
    %c0_i32 = arith.constant 0 : i32
    %0 = arith.cmpi eq, %arg1, %c0_i32 : i32
    %1 = arith.extui %0 : i1 to i32
    %c0_i32_0 = arith.constant 0 : i32
    %2 = arith.cmpi ne, %1, %c0_i32_0 : i32
    scf.if %2 {
      %c0_131 = arith.constant 0 : index
      %c0_132 = arith.constant 0 : index
      %c0_133 = arith.constant 0 : index
      %335 = vector.load %arg2[%c0_131, %c0_132, %c0_133] : memref<1x16x16xf32, #tpu.memory_space<vmem>>, vector<1x16x16xf32>
      %336 = vector.shape_cast %335 : vector<1x16x16xf32> to vector<16x16xf32>
      %c0_134 = arith.constant 0 : index
      %c0_135 = arith.constant 0 : index
      %337 = vector.load %arg3[%c0_134, %c0_135] : memref<16x256xbf16, #tpu.memory_space<vmem>>, vector<16x256xbf16>
      %338 = arith.truncf %336 : vector<16x16xf32> to vector<16x16xbf16>
      %cst_136 = arith.constant dense<0.000000e+00> : vector<16x256xf32>
      %339 = tpu.matmul %338, %337, %cst_136 {dimension_numbers = #tpu.dot_dimension_numbers<[1], [0], [0], [1], [0, 0, 1, 1], [], []>} : vector<16x16xbf16>, vector<16x256xbf16>, vector<16x256xf32> -> vector<16x256xf32>
      %c0_137 = arith.constant 0 : index
      %c0_138 = arith.constant 0 : index
      %340 = vector.load %arg4[%c0_137, %c0_138] : memref<1x256xf32, #tpu.memory_space<vmem>>, vector<1x256xf32>
      %341 = vector.broadcast %340 : vector<1x256xf32> to vector<16x256xf32>
      %342 = arith.addf %339, %341 : vector<16x256xf32>
      %c0_139 = arith.constant 0 : index
      %c0_140 = arith.constant 0 : index
      %343 = vector.load %arg24[%c0_139, %c0_140] : memref<16x256xf32, #tpu.memory_space<vmem>>, vector<16x256xf32>
      tpu.vector_store %arg24[%c0_139, %c0_140], %342 {strides = array<i32>} : memref<16x256xf32, #tpu.memory_space<vmem>>, vector<16x256xf32>,
    } else {
    }
    %c0 = arith.constant 0 : index
    %c0_1 = arith.constant 0 : index
    %3 = vector.load %arg24[%c0, %c0_1] : memref<16x256xf32, #tpu.memory_space<vmem>>, vector<16x256xf32>
    %4 = tpu.iota {dimensions = array<i32: 0>} : vector<8x8xi32>
    %5 = tpu.iota {dimensions = array<i32: 1>} : vector<8x8xi32>
    %6 = arith.cmpi sge, %4, %5 : vector<8x8xi32>
    %7 = tpu.iota {dimensions = array<i32: 0>} : vector<8x1xi32>
    %8 = arith.sitofp %7 : vector<8x1xi32> to vector<8x1xf32>
    %cst = arith.constant 3.500000e+00 : f32
    %9 = vector.broadcast %cst : f32 to vector<8x1xf32>
    %10 = arith.subf %8, %9 : vector<8x1xf32>
    %c0_2 = arith.constant 0 : index
    %c0_3 = arith.constant 0 : index
    %11 = vector.load %arg8[%c0_2, %c0_3] : memref<8x128xf32, #tpu.memory_space<vmem>>, vector<8x128xf32>
    %c0_4 = arith.constant 0 : index
    %c0_5 = arith.constant 0 : index
    %12 = vector.load %arg9[%c0_4, %c0_5] : memref<8x128xf32, #tpu.memory_space<vmem>>, vector<8x128xf32>
    %c0_6 = arith.constant 0 : index
    %c0_7 = arith.constant 0 : index
    %13 = vector.load %arg10[%c0_6, %c0_7] : memref<8x128xf32, #tpu.memory_space<vmem>>, vector<8x128xf32>
    %c0_8 = arith.constant 0 : index
    %c0_9 = arith.constant 0 : index
    %14 = vector.load %arg11[%c0_8, %c0_9] : memref<8x128xf32, #tpu.memory_space<vmem>>, vector<8x128xf32>
    %c0_10 = arith.constant 0 : index
    %c0_11 = arith.constant 0 : index
    %c0_12 = arith.constant 0 : index
    %15 = vector.load %arg5[%c0_10, %c0_11, %c0_12] : memref<1x1x256xf32, #tpu.memory_space<vmem>>, vector<1x1x256xf32>
    %16 = vector.shape_cast %15 : vector<1x1x256xf32> to vector<1x256xf32>
    %c0_13 = arith.constant 0 : index
    %c0_14 = arith.constant 0 : index
    %c0_15 = arith.constant 0 : index
    %17 = vector.load %arg6[%c0_13, %c0_14, %c0_15] : memref<1x1x256xf32, #tpu.memory_space<vmem>>, vector<1x1x256xf32>
    %18 = vector.shape_cast %17 : vector<1x1x256xf32> to vector<1x256xf32>
    %cst_16 = arith.constant dense<0.000000e+00> : vector<16xf32>
    %19 = vector.multi_reduction <add>, %3, %cst_16 [1] : vector<16x256xf32> to vector<16xf32>
    %20 = vector.shape_cast %19 : vector<16xf32> to vector<16x1xf32>
    %cst_17 = arith.constant 2.560000e+02 : f32
    %21 = vector.broadcast %cst_17 : f32 to vector<16x1xf32>
    %22 = arith.divf %20, %21 : vector<16x1xf32>
    %23 = vector.broadcast %22 : vector<16x1xf32> to vector<16x256xf32>
    %24 = arith.subf %3, %23 : vector<16x256xf32>
    %25 = arith.mulf %24, %24 : vector<16x256xf32>
    %cst_18 = arith.constant dense<0.000000e+00> : vector<16xf32>
    %26 = vector.multi_reduction <add>, %25, %cst_18 [1] : vector<16x256xf32> to vector<16xf32>
    %27 = vector.shape_cast %26 : vector<16xf32> to vector<16x1xf32>
    %cst_19 = arith.constant 2.560000e+02 : f32
    %28 = vector.broadcast %cst_19 : f32 to vector<16x1xf32>
    %29 = arith.divf %27, %28 : vector<16x1xf32>
    %30 = vector.broadcast %22 : vector<16x1xf32> to vector<16x256xf32>
    %31 = arith.subf %3, %30 : vector<16x256xf32>
    %cst_20 = arith.constant 9.99999974E-6 : f32
    %32 = vector.broadcast %cst_20 : f32 to vector<16x1xf32>
    %33 = arith.addf %29, %32 : vector<16x1xf32>
    %34 = math.rsqrt %33 : vector<16x1xf32>
    %35 = vector.broadcast %34 : vector<16x1xf32> to vector<16x256xf32>
    %36 = arith.mulf %31, %35 : vector<16x256xf32>
    %37 = vector.broadcast %16 : vector<1x256xf32> to vector<16x256xf32>
    %38 = arith.mulf %36, %37 : vector<16x256xf32>
    %39 = vector.broadcast %18 : vector<1x256xf32> to vector<16x256xf32>
    %40 = arith.addf %38, %39 : vector<16x256xf32>
    %c0_21 = arith.constant 0 : index
    %c0_22 = arith.constant 0 : index
    %c0_23 = arith.constant 0 : index
    %41 = vector.load %arg7[%c0_21, %c0_22, %c0_23] : memref<1x256x1024xbf16, #tpu.memory_space<vmem>>, vector<1x256x1024xbf16>
    %42 = vector.shape_cast %41 : vector<1x256x1024xbf16> to vector<256x1024xbf16>
    %43 = arith.truncf %40 : vector<16x256xf32> to vector<16x256xbf16>
    %cst_24 = arith.constant dense<0.000000e+00> : vector<16x1024xf32>
    %44 = tpu.matmul %43, %42, %cst_24 {dimension_numbers = #tpu.dot_dimension_numbers<[1], [0], [0], [1], [0, 0, 1, 1], [], []>} : vector<16x256xbf16>, vector<256x1024xbf16>, vector<16x1024xf32> -> vector<16x1024xf32>
    %45 = vector.extract_strided_slice %44 {offsets = [0, 768], sizes = [16, 256], strides = [1, 1]} : vector<16x1024xf32> to vector<16x256xf32>
    %46 = arith.negf %45 : vector<16x256xf32>
    %47 = math.exp %46 : vector<16x256xf32>
    %cst_25 = arith.constant 1.000000e+00 : f32
    %48 = vector.broadcast %cst_25 : f32 to vector<16x256xf32>
    %49 = arith.addf %48, %47 : vector<16x256xf32>
    %50 = arith.divf %48, %49 : vector<16x256xf32>
    %51 = arith.mulf %45, %50 : vector<16x256xf32>
    %cst_26 = arith.constant -0.0317486972 : f32
    %52 = vector.broadcast %cst_26 : f32 to vector<8x1xf32>
    %53 = arith.mulf %52, %10 : vector<8x1xf32>
    %54 = math.exp %53 : vector<8x1xf32>
    %cst_27 = arith.constant 0.0317486972 : f32
    %55 = vector.broadcast %cst_27 : f32 to vector<8x1xf32>
    %56 = arith.mulf %55, %10 : vector<8x1xf32>
    %57 = math.exp %56 : vector<8x1xf32>
    %58 = vector.broadcast %54 : vector<8x1xf32> to vector<8x128xf32>
    %59 = arith.mulf %11, %58 : vector<8x128xf32>
    %60 = vector.broadcast %54 : vector<8x1xf32> to vector<8x128xf32>
    %61 = arith.mulf %12, %60 : vector<8x128xf32>
    %62 = vector.broadcast %57 : vector<8x1xf32> to vector<8x128xf32>
    %63 = arith.mulf %13, %62 : vector<8x128xf32>
    %64 = vector.broadcast %57 : vector<8x1xf32> to vector<8x128xf32>
    %65 = arith.mulf %14, %64 : vector<8x128xf32>
    %66 = vector.extract_strided_slice %44 {offsets = [0, 0], sizes = [8, 128], strides = [1, 1]} : vector<16x1024xf32> to vector<8x128xf32>
    %67 = vector.extract_strided_slice %44 {offsets = [0, 256], sizes = [8, 128], strides = [1, 1]} : vector<16x1024xf32> to vector<8x128xf32>
    %68 = vector.extract_strided_slice %44 {offsets = [0, 512], sizes = [8, 128], strides = [1, 1]} : vector<16x1024xf32> to vector<8x128xf32>
    %69 = arith.mulf %66, %59 : vector<8x128xf32>
    %c64_i32 = arith.constant 64 : i32
    %70 = tpu.dynamic_rotate %66 by %c64_i32 dim 1 : vector<8x128xf32>, i32 -> vector<8x128xf32>
    %71 = arith.mulf %70, %61 : vector<8x128xf32>
    %72 = arith.addf %69, %71 : vector<8x128xf32>
    %73 = arith.mulf %67, %63 : vector<8x128xf32>
    %c64_i32_28 = arith.constant 64 : i32
    %74 = tpu.dynamic_rotate %67 by %c64_i32_28 dim 1 : vector<8x128xf32>, i32 -> vector<8x128xf32>
    %75 = arith.mulf %74, %65 : vector<8x128xf32>
    %76 = arith.addf %73, %75 : vector<8x128xf32>
    %77 = arith.truncf %72 : vector<8x128xf32> to vector<8x128xbf16>
    %78 = arith.truncf %76 : vector<8x128xf32> to vector<8x128xbf16>
    %cst_29 = arith.constant dense<0.000000e+00> : vector<8x8xf32>
    %79 = tpu.matmul %77, %78, %cst_29 {dimension_numbers = #tpu.dot_dimension_numbers<[1], [1], [0], [0], [0, 0, 1, 0], [], []>} : vector<8x128xbf16>, vector<8x128xbf16>, vector<8x8xf32> -> vector<8x8xf32>
    %cst_30 = arith.constant 0.000000e+00 : f32
    %80 = vector.broadcast %cst_30 : f32 to vector<8x8xf32>
    %81 = arith.select %6, %79, %80 : vector<8x8xi1>, vector<8x8xf32>
    %82 = arith.truncf %81 : vector<8x8xf32> to vector<8x8xbf16>
    %83 = arith.truncf %68 : vector<8x128xf32> to vector<8x128xbf16>
    %cst_31 = arith.constant dense<0.000000e+00> : vector<8x128xf32>
    %84 = tpu.matmul %82, %83, %cst_31 {dimension_numbers = #tpu.dot_dimension_numbers<[1], [0], [0], [1], [0, 0, 1, 1], [], []>} : vector<8x8xbf16>, vector<8x128xbf16>, vector<8x128xf32> -> vector<8x128xf32>
    %cst_32 = arith.constant dense<0.000000e+00> : vector<8xf32>
    %85 = vector.multi_reduction <add>, %84, %cst_32 [1] : vector<8x128xf32> to vector<8xf32>
    %86 = vector.shape_cast %85 : vector<8xf32> to vector<8x1xf32>
    %cst_33 = arith.constant 1.280000e+02 : f32
    %87 = vector.broadcast %cst_33 : f32 to vector<8x1xf32>
    %88 = arith.divf %86, %87 : vector<8x1xf32>
    %89 = vector.broadcast %88 : vector<8x1xf32> to vector<8x128xf32>
    %90 = arith.subf %84, %89 : vector<8x128xf32>
    %91 = arith.mulf %90, %90 : vector<8x128xf32>
    %cst_34 = arith.constant dense<0.000000e+00> : vector<8xf32>
    %92 = vector.multi_reduction <add>, %91, %cst_34 [1] : vector<8x128xf32> to vector<8xf32>
    %93 = vector.shape_cast %92 : vector<8xf32> to vector<8x1xf32>
    %cst_35 = arith.constant 1.280000e+02 : f32
    %94 = vector.broadcast %cst_35 : f32 to vector<8x1xf32>
    %95 = arith.divf %93, %94 : vector<8x1xf32>
    %96 = vector.broadcast %88 : vector<8x1xf32> to vector<8x128xf32>
    %97 = arith.subf %84, %96 : vector<8x128xf32>
    %cst_36 = arith.constant 9.99999974E-6 : f32
    %98 = vector.broadcast %cst_36 : f32 to vector<8x1xf32>
    %99 = arith.addf %95, %98 : vector<8x1xf32>
    %100 = math.rsqrt %99 : vector<8x1xf32>
    %101 = vector.broadcast %100 : vector<8x1xf32> to vector<8x128xf32>
    %102 = arith.mulf %97, %101 : vector<8x128xf32>
    %c0_37 = arith.constant 0 : index
    %c0_38 = arith.constant 0 : index
    %103 = vector.load %arg25[%c0_37, %c0_38] : memref<16x256xf32, #tpu.memory_space<vmem>>, vector<8x128xf32>
    tpu.vector_store %arg25[%c0_37, %c0_38], %102 {strides = array<i32>} : memref<16x256xf32, #tpu.memory_space<vmem>>, vector<8x128xf32>,
    %104 = vector.extract_strided_slice %44 {offsets = [8, 0], sizes = [8, 128], strides = [1, 1]} : vector<16x1024xf32> to vector<8x128xf32>
    %105 = vector.extract_strided_slice %44 {offsets = [8, 256], sizes = [8, 128], strides = [1, 1]} : vector<16x1024xf32> to vector<8x128xf32>
    %106 = vector.extract_strided_slice %44 {offsets = [8, 512], sizes = [8, 128], strides = [1, 1]} : vector<16x1024xf32> to vector<8x128xf32>
    %107 = arith.mulf %104, %59 : vector<8x128xf32>
    %c64_i32_39 = arith.constant 64 : i32
    %108 = tpu.dynamic_rotate %104 by %c64_i32_39 dim 1 : vector<8x128xf32>, i32 -> vector<8x128xf32>
    %109 = arith.mulf %108, %61 : vector<8x128xf32>
    %110 = arith.addf %107, %109 : vector<8x128xf32>
    %111 = arith.mulf %105, %63 : vector<8x128xf32>
    %c64_i32_40 = arith.constant 64 : i32
    %112 = tpu.dynamic_rotate %105 by %c64_i32_40 dim 1 : vector<8x128xf32>, i32 -> vector<8x128xf32>
    %113 = arith.mulf %112, %65 : vector<8x128xf32>
    %114 = arith.addf %111, %113 : vector<8x128xf32>
    %115 = arith.truncf %110 : vector<8x128xf32> to vector<8x128xbf16>
    %116 = arith.truncf %114 : vector<8x128xf32> to vector<8x128xbf16>
    %cst_41 = arith.constant dense<0.000000e+00> : vector<8x8xf32>
    %117 = tpu.matmul %115, %116, %cst_41 {dimension_numbers = #tpu.dot_dimension_numbers<[1], [1], [0], [0], [0, 0, 1, 0], [], []>} : vector<8x128xbf16>, vector<8x128xbf16>, vector<8x8xf32> -> vector<8x8xf32>
    %cst_42 = arith.constant 0.000000e+00 : f32
    %118 = vector.broadcast %cst_42 : f32 to vector<8x8xf32>
    %119 = arith.select %6, %117, %118 : vector<8x8xi1>, vector<8x8xf32>
    %120 = arith.truncf %119 : vector<8x8xf32> to vector<8x8xbf16>
    %121 = arith.truncf %106 : vector<8x128xf32> to vector<8x128xbf16>
    %cst_43 = arith.constant dense<0.000000e+00> : vector<8x128xf32>
    %122 = tpu.matmul %120, %121, %cst_43 {dimension_numbers = #tpu.dot_dimension_numbers<[1], [0], [0], [1], [0, 0, 1, 1], [], []>} : vector<8x8xbf16>, vector<8x128xbf16>, vector<8x128xf32> -> vector<8x128xf32>
    %cst_44 = arith.constant dense<0.000000e+00> : vector<8xf32>
    %123 = vector.multi_reduction <add>, %122, %cst_44 [1] : vector<8x128xf32> to vector<8xf32>
    %124 = vector.shape_cast %123 : vector<8xf32> to vector<8x1xf32>
    %cst_45 = arith.constant 1.280000e+02 : f32
    %125 = vector.broadcast %cst_45 : f32 to vector<8x1xf32>
    %126 = arith.divf %124, %125 : vector<8x1xf32>
    %127 = vector.broadcast %126 : vector<8x1xf32> to vector<8x128xf32>
    %128 = arith.subf %122, %127 : vector<8x128xf32>
    %129 = arith.mulf %128, %128 : vector<8x128xf32>
    %cst_46 = arith.constant dense<0.000000e+00> : vector<8xf32>
    %130 = vector.multi_reduction <add>, %129, %cst_46 [1] : vector<8x128xf32> to vector<8xf32>
    %131 = vector.shape_cast %130 : vector<8xf32> to vector<8x1xf32>
    %cst_47 = arith.constant 1.280000e+02 : f32
    %132 = vector.broadcast %cst_47 : f32 to vector<8x1xf32>
    %133 = arith.divf %131, %132 : vector<8x1xf32>
    %134 = vector.broadcast %126 : vector<8x1xf32> to vector<8x128xf32>
    %135 = arith.subf %122, %134 : vector<8x128xf32>
    %cst_48 = arith.constant 9.99999974E-6 : f32
    %136 = vector.broadcast %cst_48 : f32 to vector<8x1xf32>
    %137 = arith.addf %133, %136 : vector<8x1xf32>
    %138 = math.rsqrt %137 : vector<8x1xf32>
    %139 = vector.broadcast %138 : vector<8x1xf32> to vector<8x128xf32>
    %140 = arith.mulf %135, %139 : vector<8x128xf32>
    %c8 = arith.constant 8 : index
    %c0_49 = arith.constant 0 : index
    %141 = vector.load %arg25[%c8, %c0_49] : memref<16x256xf32, #tpu.memory_space<vmem>>, vector<8x128xf32>
    tpu.vector_store %arg25[%c8, %c0_49], %140 {strides = array<i32>} : memref<16x256xf32, #tpu.memory_space<vmem>>, vector<8x128xf32>,
    %cst_50 = arith.constant -0.00195503491 : f32
    %142 = vector.broadcast %cst_50 : f32 to vector<8x1xf32>
    %143 = arith.mulf %142, %10 : vector<8x1xf32>
    %144 = math.exp %143 : vector<8x1xf32>
    %cst_51 = arith.constant 0.00195503491 : f32
    %145 = vector.broadcast %cst_51 : f32 to vector<8x1xf32>
    %146 = arith.mulf %145, %10 : vector<8x1xf32>
    %147 = math.exp %146 : vector<8x1xf32>
    %148 = vector.broadcast %144 : vector<8x1xf32> to vector<8x128xf32>
    %149 = arith.mulf %11, %148 : vector<8x128xf32>
    %150 = vector.broadcast %144 : vector<8x1xf32> to vector<8x128xf32>
    %151 = arith.mulf %12, %150 : vector<8x128xf32>
    %152 = vector.broadcast %147 : vector<8x1xf32> to vector<8x128xf32>
    %153 = arith.mulf %13, %152 : vector<8x128xf32>
    %154 = vector.broadcast %147 : vector<8x1xf32> to vector<8x128xf32>
    %155 = arith.mulf %14, %154 : vector<8x128xf32>
    %156 = vector.extract_strided_slice %44 {offsets = [0, 128], sizes = [8, 128], strides = [1, 1]} : vector<16x1024xf32> to vector<8x128xf32>
    %157 = vector.extract_strided_slice %44 {offsets = [0, 384], sizes = [8, 128], strides = [1, 1]} : vector<16x1024xf32> to vector<8x128xf32>
    %158 = vector.extract_strided_slice %44 {offsets = [0, 640], sizes = [8, 128], strides = [1, 1]} : vector<16x1024xf32> to vector<8x128xf32>
    %159 = arith.mulf %156, %149 : vector<8x128xf32>
    %c64_i32_52 = arith.constant 64 : i32
    %160 = tpu.dynamic_rotate %156 by %c64_i32_52 dim 1 : vector<8x128xf32>, i32 -> vector<8x128xf32>
    %161 = arith.mulf %160, %151 : vector<8x128xf32>
    %162 = arith.addf %159, %161 : vector<8x128xf32>
    %163 = arith.mulf %157, %153 : vector<8x128xf32>
    %c64_i32_53 = arith.constant 64 : i32
    %164 = tpu.dynamic_rotate %157 by %c64_i32_53 dim 1 : vector<8x128xf32>, i32 -> vector<8x128xf32>
    %165 = arith.mulf %164, %155 : vector<8x128xf32>
    %166 = arith.addf %163, %165 : vector<8x128xf32>
    %167 = arith.truncf %162 : vector<8x128xf32> to vector<8x128xbf16>
    %168 = arith.truncf %166 : vector<8x128xf32> to vector<8x128xbf16>
    %cst_54 = arith.constant dense<0.000000e+00> : vector<8x8xf32>
    %169 = tpu.matmul %167, %168, %cst_54 {dimension_numbers = #tpu.dot_dimension_numbers<[1], [1], [0], [0], [0, 0, 1, 0], [], []>} : vector<8x128xbf16>, vector<8x128xbf16>, vector<8x8xf32> -> vector<8x8xf32>
    %cst_55 = arith.constant 0.000000e+00 : f32
    %170 = vector.broadcast %cst_55 : f32 to vector<8x8xf32>
    %171 = arith.select %6, %169, %170 : vector<8x8xi1>, vector<8x8xf32>
    %172 = arith.truncf %171 : vector<8x8xf32> to vector<8x8xbf16>
    %173 = arith.truncf %158 : vector<8x128xf32> to vector<8x128xbf16>
    %cst_56 = arith.constant dense<0.000000e+00> : vector<8x128xf32>
    %174 = tpu.matmul %172, %173, %cst_56 {dimension_numbers = #tpu.dot_dimension_numbers<[1], [0], [0], [1], [0, 0, 1, 1], [], []>} : vector<8x8xbf16>, vector<8x128xbf16>, vector<8x128xf32> -> vector<8x128xf32>
    %cst_57 = arith.constant dense<0.000000e+00> : vector<8xf32>
    %175 = vector.multi_reduction <add>, %174, %cst_57 [1] : vector<8x128xf32> to vector<8xf32>
    %176 = vector.shape_cast %175 : vector<8xf32> to vector<8x1xf32>
    %cst_58 = arith.constant 1.280000e+02 : f32
    %177 = vector.broadcast %cst_58 : f32 to vector<8x1xf32>
    %178 = arith.divf %176, %177 : vector<8x1xf32>
    %179 = vector.broadcast %178 : vector<8x1xf32> to vector<8x128xf32>
    %180 = arith.subf %174, %179 : vector<8x128xf32>
    %181 = arith.mulf %180, %180 : vector<8x128xf32>
    %cst_59 = arith.constant dense<0.000000e+00> : vector<8xf32>
    %182 = vector.multi_reduction <add>, %181, %cst_59 [1] : vector<8x128xf32> to vector<8xf32>
    %183 = vector.shape_cast %182 : vector<8xf32> to vector<8x1xf32>
    %cst_60 = arith.constant 1.280000e+02 : f32
    %184 = vector.broadcast %cst_60 : f32 to vector<8x1xf32>
    %185 = arith.divf %183, %184 : vector<8x1xf32>
    %186 = vector.broadcast %178 : vector<8x1xf32> to vector<8x128xf32>
    %187 = arith.subf %174, %186 : vector<8x128xf32>
    %cst_61 = arith.constant 9.99999974E-6 : f32
    %188 = vector.broadcast %cst_61 : f32 to vector<8x1xf32>
    %189 = arith.addf %185, %188 : vector<8x1xf32>
    %190 = math.rsqrt %189 : vector<8x1xf32>
    %191 = vector.broadcast %190 : vector<8x1xf32> to vector<8x128xf32>
    %192 = arith.mulf %187, %191 : vector<8x128xf32>
    %c0_62 = arith.constant 0 : index
    %c128 = arith.constant 128 : index
    %193 = vector.load %arg25[%c0_62, %c128] : memref<16x256xf32, #tpu.memory_space<vmem>>, vector<8x128xf32>
    tpu.vector_store %arg25[%c0_62, %c128], %192 {strides = array<i32>} : memref<16x256xf32, #tpu.memory_space<vmem>>, vector<8x128xf32>,
    %194 = vector.extract_strided_slice %44 {offsets = [8, 128], sizes = [8, 128], strides = [1, 1]} : vector<16x1024xf32> to vector<8x128xf32>
    %195 = vector.extract_strided_slice %44 {offsets = [8, 384], sizes = [8, 128], strides = [1, 1]} : vector<16x1024xf32> to vector<8x128xf32>
    %196 = vector.extract_strided_slice %44 {offsets = [8, 640], sizes = [8, 128], strides = [1, 1]} : vector<16x1024xf32> to vector<8x128xf32>
    %197 = arith.mulf %194, %149 : vector<8x128xf32>
    %c64_i32_63 = arith.constant 64 : i32
    %198 = tpu.dynamic_rotate %194 by %c64_i32_63 dim 1 : vector<8x128xf32>, i32 -> vector<8x128xf32>
    %199 = arith.mulf %198, %151 : vector<8x128xf32>
    %200 = arith.addf %197, %199 : vector<8x128xf32>
    %201 = arith.mulf %195, %153 : vector<8x128xf32>
    %c64_i32_64 = arith.constant 64 : i32
    %202 = tpu.dynamic_rotate %195 by %c64_i32_64 dim 1 : vector<8x128xf32>, i32 -> vector<8x128xf32>
    %203 = arith.mulf %202, %155 : vector<8x128xf32>
    %204 = arith.addf %201, %203 : vector<8x128xf32>
    %205 = arith.truncf %200 : vector<8x128xf32> to vector<8x128xbf16>
    %206 = arith.truncf %204 : vector<8x128xf32> to vector<8x128xbf16>
    %cst_65 = arith.constant dense<0.000000e+00> : vector<8x8xf32>
    %207 = tpu.matmul %205, %206, %cst_65 {dimension_numbers = #tpu.dot_dimension_numbers<[1], [1], [0], [0], [0, 0, 1, 0], [], []>} : vector<8x128xbf16>, vector<8x128xbf16>, vector<8x8xf32> -> vector<8x8xf32>
    %cst_66 = arith.constant 0.000000e+00 : f32
    %208 = vector.broadcast %cst_66 : f32 to vector<8x8xf32>
    %209 = arith.select %6, %207, %208 : vector<8x8xi1>, vector<8x8xf32>
    %210 = arith.truncf %209 : vector<8x8xf32> to vector<8x8xbf16>
    %211 = arith.truncf %196 : vector<8x128xf32> to vector<8x128xbf16>
    %cst_67 = arith.constant dense<0.000000e+00> : vector<8x128xf32>
    %212 = tpu.matmul %210, %211, %cst_67 {dimension_numbers = #tpu.dot_dimension_numbers<[1], [0], [0], [1], [0, 0, 1, 1], [], []>} : vector<8x8xbf16>, vector<8x128xbf16>, vector<8x128xf32> -> vector<8x128xf32>
    %cst_68 = arith.constant dense<0.000000e+00> : vector<8xf32>
    %213 = vector.multi_reduction <add>, %212, %cst_68 [1] : vector<8x128xf32> to vector<8xf32>
    %214 = vector.shape_cast %213 : vector<8xf32> to vector<8x1xf32>
    %cst_69 = arith.constant 1.280000e+02 : f32
    %215 = vector.broadcast %cst_69 : f32 to vector<8x1xf32>
    %216 = arith.divf %214, %215 : vector<8x1xf32>
    %217 = vector.broadcast %216 : vector<8x1xf32> to vector<8x128xf32>
    %218 = arith.subf %212, %217 : vector<8x128xf32>
    %219 = arith.mulf %218, %218 : vector<8x128xf32>
    %cst_70 = arith.constant dense<0.000000e+00> : vector<8xf32>
    %220 = vector.multi_reduction <add>, %219, %cst_70 [1] : vector<8x128xf32> to vector<8xf32>
    %221 = vector.shape_cast %220 : vector<8xf32> to vector<8x1xf32>
    %cst_71 = arith.constant 1.280000e+02 : f32
    %222 = vector.broadcast %cst_71 : f32 to vector<8x1xf32>
    %223 = arith.divf %221, %222 : vector<8x1xf32>
    %224 = vector.broadcast %216 : vector<8x1xf32> to vector<8x128xf32>
    %225 = arith.subf %212, %224 : vector<8x128xf32>
    %cst_72 = arith.constant 9.99999974E-6 : f32
    %226 = vector.broadcast %cst_72 : f32 to vector<8x1xf32>
    %227 = arith.addf %223, %226 : vector<8x1xf32>
    %228 = math.rsqrt %227 : vector<8x1xf32>
    %229 = vector.broadcast %228 : vector<8x1xf32> to vector<8x128xf32>
    %230 = arith.mulf %225, %229 : vector<8x128xf32>
    %c8_73 = arith.constant 8 : index
    %c128_74 = arith.constant 128 : index
    %231 = vector.load %arg25[%c8_73, %c128_74] : memref<16x256xf32, #tpu.memory_space<vmem>>, vector<8x128xf32>
    tpu.vector_store %arg25[%c8_73, %c128_74], %230 {strides = array<i32>} : memref<16x256xf32, #tpu.memory_space<vmem>>, vector<8x128xf32>,
    %c0_75 = arith.constant 0 : index
    %c0_76 = arith.constant 0 : index
    %232 = vector.load %arg25[%c0_75, %c0_76] : memref<16x256xf32, #tpu.memory_space<vmem>>, vector<16x256xf32>
    %c0_77 = arith.constant 0 : index
    %c0_78 = arith.constant 0 : index
    %c0_79 = arith.constant 0 : index
    %233 = vector.load %arg12[%c0_77, %c0_78, %c0_79] : memref<1x1x256xf32, #tpu.memory_space<vmem>>, vector<1x1x256xf32>
    %234 = vector.shape_cast %233 : vector<1x1x256xf32> to vector<1x256xf32>
    %235 = vector.broadcast %234 : vector<1x256xf32> to vector<16x256xf32>
    %236 = arith.mulf %232, %235 : vector<16x256xf32>
    %c0_80 = arith.constant 0 : index
    %c0_81 = arith.constant 0 : index
    %c0_82 = arith.constant 0 : index
    %237 = vector.load %arg13[%c0_80, %c0_81, %c0_82] : memref<1x1x256xf32, #tpu.memory_space<vmem>>, vector<1x1x256xf32>
    %238 = vector.shape_cast %237 : vector<1x1x256xf32> to vector<1x256xf32>
    %239 = vector.broadcast %238 : vector<1x256xf32> to vector<16x256xf32>
    %240 = arith.addf %236, %239 : vector<16x256xf32>
    %241 = arith.mulf %51, %240 : vector<16x256xf32>
    %c0_83 = arith.constant 0 : index
    %c0_84 = arith.constant 0 : index
    %c0_85 = arith.constant 0 : index
    %242 = vector.load %arg14[%c0_83, %c0_84, %c0_85] : memref<1x256x256xbf16, #tpu.memory_space<vmem>>, vector<1x256x256xbf16>
    %243 = vector.shape_cast %242 : vector<1x256x256xbf16> to vector<256x256xbf16>
    %244 = arith.truncf %241 : vector<16x256xf32> to vector<16x256xbf16>
    %cst_86 = arith.constant dense<0.000000e+00> : vector<16x256xf32>
    %245 = tpu.matmul %244, %243, %cst_86 {dimension_numbers = #tpu.dot_dimension_numbers<[1], [0], [0], [1], [0, 0, 1, 1], [], []>} : vector<16x256xbf16>, vector<256x256xbf16>, vector<16x256xf32> -> vector<16x256xf32>
    %246 = arith.addf %245, %3 : vector<16x256xf32>
    %c0_87 = arith.constant 0 : index
    %c0_88 = arith.constant 0 : index
    %c0_89 = arith.constant 0 : index
    %247 = vector.load %arg15[%c0_87, %c0_88, %c0_89] : memref<1x1x256xf32, #tpu.memory_space<vmem>>, vector<1x1x256xf32>
    %248 = vector.shape_cast %247 : vector<1x1x256xf32> to vector<1x256xf32>
    %c0_90 = arith.constant 0 : index
    %c0_91 = arith.constant 0 : index
    %c0_92 = arith.constant 0 : index
    %249 = vector.load %arg16[%c0_90, %c0_91, %c0_92] : memref<1x1x256xf32, #tpu.memory_space<vmem>>, vector<1x1x256xf32>
    %250 = vector.shape_cast %249 : vector<1x1x256xf32> to vector<1x256xf32>
    %cst_93 = arith.constant dense<0.000000e+00> : vector<16xf32>
    %251 = vector.multi_reduction <add>, %246, %cst_93 [1] : vector<16x256xf32> to vector<16xf32>
    %252 = vector.shape_cast %251 : vector<16xf32> to vector<16x1xf32>
    %cst_94 = arith.constant 2.560000e+02 : f32
    %253 = vector.broadcast %cst_94 : f32 to vector<16x1xf32>
    %254 = arith.divf %252, %253 : vector<16x1xf32>
    %255 = vector.broadcast %254 : vector<16x1xf32> to vector<16x256xf32>
    %256 = arith.subf %246, %255 : vector<16x256xf32>
    %257 = arith.mulf %256, %256 : vector<16x256xf32>
    %cst_95 = arith.constant dense<0.000000e+00> : vector<16xf32>
    %258 = vector.multi_reduction <add>, %257, %cst_95 [1] : vector<16x256xf32> to vector<16xf32>
    %259 = vector.shape_cast %258 : vector<16xf32> to vector<16x1xf32>
    %cst_96 = arith.constant 2.560000e+02 : f32
    %260 = vector.broadcast %cst_96 : f32 to vector<16x1xf32>
    %261 = arith.divf %259, %260 : vector<16x1xf32>
    %262 = vector.broadcast %254 : vector<16x1xf32> to vector<16x256xf32>
    %263 = arith.subf %246, %262 : vector<16x256xf32>
    %cst_97 = arith.constant 9.99999974E-6 : f32
    %264 = vector.broadcast %cst_97 : f32 to vector<16x1xf32>
    %265 = arith.addf %261, %264 : vector<16x1xf32>
    %266 = math.rsqrt %265 : vector<16x1xf32>
    %267 = vector.broadcast %266 : vector<16x1xf32> to vector<16x256xf32>
    %268 = arith.mulf %263, %267 : vector<16x256xf32>
    %269 = vector.broadcast %248 : vector<1x256xf32> to vector<16x256xf32>
    %270 = arith.mulf %268, %269 : vector<16x256xf32>
    %271 = vector.broadcast %250 : vector<1x256xf32> to vector<16x256xf32>
    %272 = arith.addf %270, %271 : vector<16x256xf32>
    %c0_98 = arith.constant 0 : index
    %c0_99 = arith.constant 0 : index
    %c0_100 = arith.constant 0 : index
    %273 = vector.load %arg17[%c0_98, %c0_99, %c0_100] : memref<1x256x512xbf16, #tpu.memory_space<vmem>>, vector<1x256x512xbf16>
    %274 = vector.shape_cast %273 : vector<1x256x512xbf16> to vector<256x512xbf16>
    %275 = arith.truncf %272 : vector<16x256xf32> to vector<16x256xbf16>
    %cst_101 = arith.constant dense<0.000000e+00> : vector<16x512xf32>
    %276 = tpu.matmul %275, %274, %cst_101 {dimension_numbers = #tpu.dot_dimension_numbers<[1], [0], [0], [1], [0, 0, 1, 1], [], []>} : vector<16x256xbf16>, vector<256x512xbf16>, vector<16x512xf32> -> vector<16x512xf32>
    %c0_102 = arith.constant 0 : index
    %c0_103 = arith.constant 0 : index
    %c0_104 = arith.constant 0 : index
    %277 = vector.load %arg18[%c0_102, %c0_103, %c0_104] : memref<1x1x512xf32, #tpu.memory_space<vmem>>, vector<1x1x512xf32>
    %278 = vector.shape_cast %277 : vector<1x1x512xf32> to vector<1x512xf32>
    %279 = vector.broadcast %278 : vector<1x512xf32> to vector<16x512xf32>
    %280 = arith.addf %276, %279 : vector<16x512xf32>
    %cst_105 = arith.constant 5.000000e-01 : f32
    %281 = vector.broadcast %cst_105 : f32 to vector<16x512xf32>
    %282 = arith.mulf %281, %280 : vector<16x512xf32>
    %cst_106 = arith.constant 0.707106769 : f32
    %283 = vector.broadcast %cst_106 : f32 to vector<16x512xf32>
    %284 = arith.mulf %280, %283 : vector<16x512xf32>
    %cst_107 = arith.constant 0.000000e+00 : f32
    %285 = vector.broadcast %cst_107 : f32 to vector<16x512xf32>
    %286 = arith.cmpf oge, %284, %285 : vector<16x512xf32>
    %cst_108 = arith.constant 1.000000e+00 : f32
    %cst_109 = arith.constant -1.000000e+00 : f32
    %287 = vector.broadcast %cst_108 : f32 to vector<16x512xf32>
    %288 = vector.broadcast %cst_109 : f32 to vector<16x512xf32>
    %289 = arith.select %286, %287, %288 : vector<16x512xi1>, vector<16x512xf32>
    %290 = math.absf %284 : vector<16x512xf32>
    %cst_110 = arith.constant 0.327591091 : f32
    %291 = vector.broadcast %cst_110 : f32 to vector<16x512xf32>
    %292 = arith.mulf %291, %290 : vector<16x512xf32>
    %cst_111 = arith.constant 1.000000e+00 : f32
    %293 = vector.broadcast %cst_111 : f32 to vector<16x512xf32>
    %294 = arith.addf %293, %292 : vector<16x512xf32>
    %cst_112 = arith.constant 1.000000e+00 : f32
    %295 = vector.broadcast %cst_112 : f32 to vector<16x512xf32>
    %296 = arith.divf %295, %294 : vector<16x512xf32>
    %cst_113 = arith.constant 1.06140542 : f32
    %297 = vector.broadcast %cst_113 : f32 to vector<16x512xf32>
    %298 = arith.mulf %297, %296 : vector<16x512xf32>
    %cst_114 = arith.constant -1.45315206 : f32
    %299 = vector.broadcast %cst_114 : f32 to vector<16x512xf32>
    %300 = arith.addf %298, %299 : vector<16x512xf32>
    %301 = arith.mulf %300, %296 : vector<16x512xf32>
    %cst_115 = arith.constant 1.42141378 : f32
    %302 = vector.broadcast %cst_115 : f32 to vector<16x512xf32>
    %303 = arith.addf %301, %302 : vector<16x512xf32>
    %304 = arith.mulf %303, %296 : vector<16x512xf32>
    %cst_116 = arith.constant -0.284496725 : f32
    %305 = vector.broadcast %cst_116 : f32 to vector<16x512xf32>
    %306 = arith.addf %304, %305 : vector<16x512xf32>
    %307 = arith.mulf %306, %296 : vector<16x512xf32>
    %cst_117 = arith.constant 0.254829586 : f32
    %308 = vector.broadcast %cst_117 : f32 to vector<16x512xf32>
    %309 = arith.addf %307, %308 : vector<16x512xf32>
    %310 = arith.mulf %309, %296 : vector<16x512xf32>
    %cst_118 = arith.constant 0.000000e+00 : f32
    %311 = vector.broadcast %cst_118 : f32 to vector<16x512xf32>
    %312 = arith.subf %311, %290 : vector<16x512xf32>
    %313 = arith.mulf %312, %290 : vector<16x512xf32>
    %314 = math.exp %313 : vector<16x512xf32>
    %315 = arith.mulf %310, %314 : vector<16x512xf32>
    %cst_119 = arith.constant 1.000000e+00 : f32
    %316 = vector.broadcast %cst_119 : f32 to vector<16x512xf32>
    %317 = arith.subf %316, %315 : vector<16x512xf32>
    %318 = arith.mulf %289, %317 : vector<16x512xf32>
    %cst_120 = arith.constant 1.000000e+00 : f32
    %319 = vector.broadcast %cst_120 : f32 to vector<16x512xf32>
    %320 = arith.addf %319, %318 : vector<16x512xf32>
    %321 = arith.mulf %282, %320 : vector<16x512xf32>
    %c0_121 = arith.constant 0 : index
    %c0_122 = arith.constant 0 : index
    %c0_123 = arith.constant 0 : index
    %322 = vector.load %arg19[%c0_121, %c0_122, %c0_123] : memref<1x512x256xbf16, #tpu.memory_space<vmem>>, vector<1x512x256xbf16>
    %323 = vector.shape_cast %322 : vector<1x512x256xbf16> to vector<512x256xbf16>
    %324 = arith.truncf %321 : vector<16x512xf32> to vector<16x512xbf16>
    %cst_124 = arith.constant dense<0.000000e+00> : vector<16x256xf32>
    %325 = tpu.matmul %324, %323, %cst_124 {dimension_numbers = #tpu.dot_dimension_numbers<[1], [0], [0], [1], [0, 0, 1, 1], [], []>} : vector<16x512xbf16>, vector<512x256xbf16>, vector<16x256xf32> -> vector<16x256xf32>
    %c0_125 = arith.constant 0 : index
    %c0_126 = arith.constant 0 : index
    %c0_127 = arith.constant 0 : index
    %326 = vector.load %arg20[%c0_125, %c0_126, %c0_127] : memref<1x1x256xf32, #tpu.memory_space<vmem>>, vector<1x1x256xf32>
    %327 = vector.shape_cast %326 : vector<1x1x256xf32> to vector<1x256xf32>
    %328 = vector.broadcast %327 : vector<1x256xf32> to vector<16x256xf32>
    %329 = arith.addf %325, %328 : vector<16x256xf32>
    %330 = arith.addf %329, %246 : vector<16x256xf32>
    %c0_128 = arith.constant 0 : index
    %c0_129 = arith.constant 0 : index
    %331 = vector.load %arg24[%c0_128, %c0_129] : memref<16x256xf32, #tpu.memory_space<vmem>>, vector<16x256xf32>
    tpu.vector_store %arg24[%c0_128, %c0_129], %330 {strides = array<i32>} : memref<16x256xf32, #tpu.memory_space<vmem>>, vector<16x256xf32>,
    %c1_i32 = arith.constant 1 : i32
    %332 = arith.cmpi eq, %arg1, %c1_i32 : i32
    %333 = arith.extui %332 : i1 to i32
    %c0_i32_130 = arith.constant 0 : i32
    %334 = arith.cmpi ne, %333, %c0_i32_130 : i32
    scf.if %334 {
      %c0_131 = arith.constant 0 : index
      %c0_132 = arith.constant 0 : index
      %335 = vector.load %arg21[%c0_131, %c0_132] : memref<256x32xbf16, #tpu.memory_space<vmem>>, vector<256x32xbf16>
      %336 = arith.truncf %330 : vector<16x256xf32> to vector<16x256xbf16>
      %cst_133 = arith.constant dense<0.000000e+00> : vector<16x32xf32>
      %337 = tpu.matmul %336, %335, %cst_133 {dimension_numbers = #tpu.dot_dimension_numbers<[1], [0], [0], [1], [0, 0, 1, 1], [], []>} : vector<16x256xbf16>, vector<256x32xbf16>, vector<16x32xf32> -> vector<16x32xf32>
      %c0_134 = arith.constant 0 : index
      %c0_135 = arith.constant 0 : index
      %338 = vector.load %arg22[%c0_134, %c0_135] : memref<1x32xf32, #tpu.memory_space<vmem>>, vector<1x32xf32>
      %339 = vector.broadcast %338 : vector<1x32xf32> to vector<16x32xf32>
      %340 = arith.addf %337, %339 : vector<16x32xf32>
      %341 = vector.extract_strided_slice %340 {offsets = [0, 0], sizes = [16, 16], strides = [1, 1]} : vector<16x32xf32> to vector<16x16xf32>
      %c0_136 = arith.constant 0 : index
      %c0_137 = arith.constant 0 : index
      %c0_138 = arith.constant 0 : index
      %342 = vector.load %arg23[%c0_136, %c0_137, %c0_138] : memref<1x16x32xf32, #tpu.memory_space<vmem>>, vector<1x16x16xf32>
      %343 = vector.shape_cast %342 : vector<1x16x16xf32> to vector<16x16xf32>
      %344 = vector.shape_cast %341 : vector<16x16xf32> to vector<1x16x16xf32>
      tpu.vector_store %arg23[%c0_136, %c0_137, %c0_138], %344 {strides = array<i32>} : memref<1x16x32xf32, #tpu.memory_space<vmem>>, vector<1x16x16xf32>,
      %345 = vector.extract_strided_slice %340 {offsets = [0, 16], sizes = [16, 16], strides = [1, 1]} : vector<16x32xf32> to vector<16x16xf32>
      %cst_139 = arith.constant 5.000000e-01 : f32
      %346 = vector.broadcast %cst_139 : f32 to vector<16x16xf32>
      %347 = arith.mulf %346, %345 : vector<16x16xf32>
      %cst_140 = arith.constant 0.000000e+00 : f32
      %348 = vector.broadcast %cst_140 : f32 to vector<16x16xf32>
      %349 = arith.maximumf %347, %348 : vector<16x16xf32>
      %350 = vector.broadcast %cst_140 : f32 to vector<16x16xf32>
      %351 = arith.subf %347, %350 : vector<16x16xf32>
      %352 = arith.cmpf one, %351, %351 : vector<16x16xf32>
      %353 = vector.broadcast %cst_140 : f32 to vector<16x16xf32>
      %354 = arith.addf %347, %353 : vector<16x16xf32>
      %355 = math.absf %351 : vector<16x16xf32>
      %cst_141 = arith.constant 0.000000e+00 : f32
      %356 = vector.broadcast %cst_141 : f32 to vector<16x16xf32>
      %357 = arith.subf %356, %355 : vector<16x16xf32>
      %358 = math.exp %357 : vector<16x16xf32>
      %359 = math.log1p %358 : vector<16x16xf32>
      %360 = arith.addf %349, %359 : vector<16x16xf32>
      %361 = arith.select %352, %354, %360 : vector<16x16xi1>, vector<16x16xf32>
      %cst_142 = arith.constant 1.000000e-03 : f32
      %362 = vector.broadcast %cst_142 : f32 to vector<16x16xf32>
      %363 = arith.addf %361, %362 : vector<16x16xf32>
      %c0_143 = arith.constant 0 : index
      %c0_144 = arith.constant 0 : index
      %c16 = arith.constant 16 : index
      %364 = vector.load %arg23[%c0_143, %c0_144, %c16] : memref<1x16x32xf32, #tpu.memory_space<vmem>>, vector<1x16x16xf32>
      %365 = vector.shape_cast %364 : vector<1x16x16xf32> to vector<16x16xf32>
      %366 = vector.shape_cast %363 : vector<16x16xf32> to vector<1x16x16xf32>
      tpu.vector_store %arg23[%c0_143, %c0_144, %c16], %366 {strides = array<i32>} : memref<1x16x32xf32, #tpu.memory_space<vmem>>, vector<1x16x16xf32>,
    } else {
    }
    return
  }
  func.func @transform_0(%arg0: i32, %arg1: i32) -> (i32, i32, i32) {
    %c0_i32 = arith.constant 0 : i32
    %c0_i32_0 = arith.constant 0 : i32
    %c0_i32_1 = arith.constant 0 : i32
    return %arg0, %c0_i32, %c0_i32_0 : i32, i32, i32
  }
  func.func @transform_1(%arg0: i32, %arg1: i32) -> (i32, i32) {
    %c0_i32 = arith.constant 0 : i32
    %c0_i32_0 = arith.constant 0 : i32
    %c0_i32_1 = arith.constant 0 : i32
    return %c0_i32, %c0_i32_0 : i32, i32
  }
  func.func @transform_2(%arg0: i32, %arg1: i32) -> (i32, i32) {
    %c0_i32 = arith.constant 0 : i32
    %c0_i32_0 = arith.constant 0 : i32
    %c0_i32_1 = arith.constant 0 : i32
    return %c0_i32, %c0_i32_0 : i32, i32
  }
  func.func @transform_3(%arg0: i32, %arg1: i32) -> (i32, i32, i32) {
    %c0_i32 = arith.constant 0 : i32
    %c0_i32_0 = arith.constant 0 : i32
    %c0_i32_1 = arith.constant 0 : i32
    return %arg1, %c0_i32, %c0_i32_0 : i32, i32, i32
  }
  func.func @transform_4(%arg0: i32, %arg1: i32) -> (i32, i32, i32) {
    %c0_i32 = arith.constant 0 : i32
    %c0_i32_0 = arith.constant 0 : i32
    %c0_i32_1 = arith.constant 0 : i32
    return %arg1, %c0_i32, %c0_i32_0 : i32, i32, i32
  }
  func.func @transform_5(%arg0: i32, %arg1: i32) -> (i32, i32, i32) {
    %c0_i32 = arith.constant 0 : i32
    %c0_i32_0 = arith.constant 0 : i32
    %c0_i32_1 = arith.constant 0 : i32
    return %arg1, %c0_i32, %c0_i32_0 : i32, i32, i32
  }
  func.func @transform_6(%arg0: i32, %arg1: i32) -> (i32, i32) {
    %c0_i32 = arith.constant 0 : i32
    %c0_i32_0 = arith.constant 0 : i32
    %c0_i32_1 = arith.constant 0 : i32
    return %c0_i32, %c0_i32_0 : i32, i32
  }
  func.func @transform_7(%arg0: i32, %arg1: i32) -> (i32, i32) {
    %c0_i32 = arith.constant 0 : i32
    %c0_i32_0 = arith.constant 0 : i32
    %c0_i32_1 = arith.constant 0 : i32
    return %c0_i32, %c0_i32_0 : i32, i32
  }
  func.func @transform_8(%arg0: i32, %arg1: i32) -> (i32, i32) {
    %c0_i32 = arith.constant 0 : i32
    %c0_i32_0 = arith.constant 0 : i32
    %c0_i32_1 = arith.constant 0 : i32
    return %c0_i32, %c0_i32_0 : i32, i32
  }
  func.func @transform_9(%arg0: i32, %arg1: i32) -> (i32, i32) {
    %c0_i32 = arith.constant 0 : i32
    %c0_i32_0 = arith.constant 0 : i32
    %c0_i32_1 = arith.constant 0 : i32
    return %c0_i32, %c0_i32_0 : i32, i32
  }
  func.func @transform_10(%arg0: i32, %arg1: i32) -> (i32, i32, i32) {
    %c0_i32 = arith.constant 0 : i32
    %c0_i32_0 = arith.constant 0 : i32
    %c0_i32_1 = arith.constant 0 : i32
    return %arg1, %c0_i32, %c0_i32_0 : i32, i32, i32
  }
  func.func @transform_11(%arg0: i32, %arg1: i32) -> (i32, i32, i32) {
    %c0_i32 = arith.constant 0 : i32
    %c0_i32_0 = arith.constant 0 : i32
    %c0_i32_1 = arith.constant 0 : i32
    return %arg1, %c0_i32, %c0_i32_0 : i32, i32, i32
  }
  func.func @transform_12(%arg0: i32, %arg1: i32) -> (i32, i32, i32) {
    %c0_i32 = arith.constant 0 : i32
    %c0_i32_0 = arith.constant 0 : i32
    %c0_i32_1 = arith.constant 0 : i32
    return %arg1, %c0_i32, %c0_i32_0 : i32, i32, i32
  }
  func.func @transform_13(%arg0: i32, %arg1: i32) -> (i32, i32, i32) {
    %c0_i32 = arith.constant 0 : i32
    %c0_i32_0 = arith.constant 0 : i32
    %c0_i32_1 = arith.constant 0 : i32
    return %arg1, %c0_i32, %c0_i32_0 : i32, i32, i32
  }
  func.func @transform_14(%arg0: i32, %arg1: i32) -> (i32, i32, i32) {
    %c0_i32 = arith.constant 0 : i32
    %c0_i32_0 = arith.constant 0 : i32
    %c0_i32_1 = arith.constant 0 : i32
    return %arg1, %c0_i32, %c0_i32_0 : i32, i32, i32
  }
  func.func @transform_15(%arg0: i32, %arg1: i32) -> (i32, i32, i32) {
    %c0_i32 = arith.constant 0 : i32
    %c0_i32_0 = arith.constant 0 : i32
    %c0_i32_1 = arith.constant 0 : i32
    return %arg1, %c0_i32, %c0_i32_0 : i32, i32, i32
  }
  func.func @transform_16(%arg0: i32, %arg1: i32) -> (i32, i32, i32) {
    %c0_i32 = arith.constant 0 : i32
    %c0_i32_0 = arith.constant 0 : i32
    %c0_i32_1 = arith.constant 0 : i32
    return %arg1, %c0_i32, %c0_i32_0 : i32, i32, i32
  }
  func.func @transform_17(%arg0: i32, %arg1: i32) -> (i32, i32, i32) {
    %c0_i32 = arith.constant 0 : i32
    %c0_i32_0 = arith.constant 0 : i32
    %c0_i32_1 = arith.constant 0 : i32
    return %arg1, %c0_i32, %c0_i32_0 : i32, i32, i32
  }
  func.func @transform_18(%arg0: i32, %arg1: i32) -> (i32, i32, i32) {
    %c0_i32 = arith.constant 0 : i32
    %c0_i32_0 = arith.constant 0 : i32
    %c0_i32_1 = arith.constant 0 : i32
    return %arg1, %c0_i32, %c0_i32_0 : i32, i32, i32
  }
  func.func @transform_19(%arg0: i32, %arg1: i32) -> (i32, i32) {
    %c0_i32 = arith.constant 0 : i32
    %c0_i32_0 = arith.constant 0 : i32
    %c0_i32_1 = arith.constant 0 : i32
    return %c0_i32, %c0_i32_0 : i32, i32
  }
  func.func @transform_20(%arg0: i32, %arg1: i32) -> (i32, i32) {
    %c0_i32 = arith.constant 0 : i32
    %c0_i32_0 = arith.constant 0 : i32
    %c0_i32_1 = arith.constant 0 : i32
    return %c0_i32, %c0_i32_0 : i32, i32
  }
  func.func @transform_21(%arg0: i32, %arg1: i32) -> (i32, i32, i32) {
    %c0_i32 = arith.constant 0 : i32
    %c0_i32_0 = arith.constant 0 : i32
    %c0_i32_1 = arith.constant 0 : i32
    return %arg0, %c0_i32, %c0_i32_0 : i32, i32, i32
  }
}

</mosaic_0001>

<bundles_post_ra>
// kernel: tpu_custom_call.1
= control target key start
LH: loop header
LB: loop body
LE: loop exit
PB: predicated region body
PF: predicated region fallthrough
CT: control target
= control target key end

     0   :  { %s6897_s0 = inlined_call_operand.vmem [shape: f32[1,16,16], index: 0, kind: input, shape index: {}]   ;;  %s6898_s1 = inlined_call_operand.vmem [shape: bf16[16,256], index: 1, kind: input, shape index: {}]   ;;  %s6899_s2 = inlined_call_operand.vmem [shape: f32[1,256], index: 2, kind: input, shape index: {}]   ;;  %s6900_s3 = inlined_call_operand.vmem [shape: f32[2,1,256], index: 3, kind: input, shape index: {}]   ;;  %s6901_s4 = inlined_call_operand.vmem [shape: f32[2,1,256], index: 4, kind: input, shape index: {}]   ;;  %s6902_s5 = inlined_call_operand.hbm [shape: bf16[2,256,1024], index: 5, kind: input, shape index: {}]   ;;  %s6903_s6 = inlined_call_operand.vmem [shape: f32[8,128], index: 6, kind: input, shape index: {}]   ;;  %s6904_s7 = inlined_call_operand.vmem [shape: f32[8,128], index: 7, kind: input, shape index: {}]   ;;  %s6905_s8 = inlined_call_operand.vmem [shape: f32[8,128], index: 8, kind: input, shape index: {}]   ;;  %s6906_s9 = inlined_call_operand.vmem [shape: f32[8,128], index: 9, kind: input, shape index: {}]   ;;  %s6907_s10 = inlined_call_operand.vmem [shape: f32[2,1,256], index: 10, kind: input, shape index: {}]   ;;  %s6908_s11 = inlined_call_operand.vmem [shape: f32[2,1,256], index: 11, kind: input, shape index: {}]   ;;  %s6909_s12 = inlined_call_operand.hbm [shape: bf16[2,256,256], index: 12, kind: input, shape index: {}]   ;;  %s6910_s13 = inlined_call_operand.vmem [shape: f32[2,1,256], index: 13, kind: input, shape index: {}]   ;;  %s6911_s14 = inlined_call_operand.vmem [shape: f32[2,1,256], index: 14, kind: input, shape index: {}]   ;;  %s6912_s15 = inlined_call_operand.hbm [shape: bf16[2,256,512], index: 15, kind: input, shape index: {}]   ;;  %s6913_s16 = inlined_call_operand.vmem [shape: f32[2,1,512], index: 16, kind: input, shape index: {}]   ;;  %s6914_s17 = inlined_call_operand.hbm [shape: bf16[2,512,256], index: 17, kind: input, shape index: {}]   ;;  %s6915_s18 = inlined_call_operand.vmem [shape: f32[2,1,256], index: 18, kind: input, shape index: {}]   ;;  %s6916_s19 = inlined_call_operand.vmem [shape: bf16[256,32], index: 19, kind: input, shape index: {}]   ;;  %s6917_s20 = inlined_call_operand.vmem [shape: f32[1,32], index: 20, kind: input, shape index: {}]   ;;  %s6918_s21 = inlined_call_operand.hbm [shape: f32[1,16,32], index: 21, kind: output, shape index: {}]  }
   0x1   :  { %6936 = sst [smem:[#allocation25_spill]] %s6897_s0 }
   0x2   :  { %6937 = sst [smem:[#allocation26_spill]] %s6898_s1 }
   0x3   :  { %6938 = sst [smem:[#allocation27_spill]] %s6899_s2 }
   0x4   :  { %6939 = sst [smem:[#allocation28_spill]] %s6900_s3 }
   0x5   :  { %6940 = sst [smem:[#allocation29_spill]] %s6901_s4 }
   0x6   :  { %6941 = sst [smem:[#allocation30_spill]] %s6902_s5 }
   0x7   :  { %6942 = sst [smem:[#allocation31_spill]] %s6903_s6 }
   0x8   :  { %6943 = sst [smem:[#allocation32_spill]] %s6904_s7 }
   0x9   :  { %6944 = sst [smem:[#allocation33_spill]] %s6905_s8 }
   0xa   :  { %6945 = sst [smem:[#allocation34_spill]] %s6906_s9 }
   0xb   :  { %6946 = sst [smem:[#allocation35_spill]] %s6909_s12 }
   0xc   :  { %6947 = sst [smem:[#allocation36_spill]] %s6912_s15 }
   0xd   :  { %6948 = sst [smem:[#allocation37_spill]] %s6914_s17 }
   0xe   :  { %6949 = sst [smem:[#allocation38_spill]] %s6916_s19 }
   0xf   :  { %6950 = sst [smem:[#allocation39_spill]] %s6917_s20 }
  0x10   :  { %6951 = sst [smem:[#allocation40_spill]] %s6918_s21 }
  0x11   :  { %26 = vsyncpa [#allocation5], 0 }
  0x12   :  { %28 = vsyncpa [#allocation5 + $0x1], 0 }
  0x13   :  { %29 = vsyncpa [#allocation8], 0 }
  0x14   :  { %31 = vsyncpa [#allocation8 + $0x1], 0 }
  0x15   :  { %32 = vsyncpa [#allocation11], 0 }
  0x16   :  { %34 = vsyncpa [#allocation11 + $0x1], 0 }
  0x17   :  { %35 = vsyncpa [#allocation6], 0  ;;  %s5805_s2 = smov 0   ;;  %s5807_s25 = smov 0  }
  0x18   :  { %s5809_s26 = smov 0   ;;  %s5811_s27 = smov 0  }
  0x19   :  { %s5813_s3 = smov 0   ;;  %s5815_s28 = smov 0  }
  0x1a LB: > { %6952 = sst [smem:[#allocation17_spill]] %s5659_s25  ;;  %s5834_s29 = sadd.s32 4294967295, %s5675_s28   ;;  %s5675_s28 = sphi %s5815_s28, %s41_s28   ;;  %s5671_s3 = sphi %s5813_s3, %s6997_s3   ;;  %s5667_s27 = sphi %s5811_s27, %s6996_s27   ;;  %s5663_s26 = sphi %s5809_s26, %s6995_s26   ;;  %s5659_s25 = sphi %s5807_s25, %s6994_s25   ;;  %s5655_s2 = sphi %s5805_s2, %s6993_s2  }
  0x1b   : > { %6953 = sst [smem:[#allocation18_spill]] %s5663_s26  ;;  %s50_s0 = sadd.s32 1, %s5671_s3 }
  0x1c   : > { %6954 = sst [smem:[#allocation19_spill]] %s5671_s3  ;;  %p51_p0 = scmp.ge.s32.totalorder %s50_s0, 2 }
  0x1d   : > { %6955 = sst [smem:[#allocation20_spill]] %s5675_s28  ;;  %s180_s4 = sadd.s32 1, %s5663_s26 }
  0x1e   : > { %6956 = sst [smem:[#allocation21_spill]] %s5834_s29  ;;  %p187_p1 = scmp.ne.s32.totalorder %s5663_s26, %s5659_s25 }
  0x1f   : > { %p188_p2 = scmp.eq.s32.totalorder %s5675_s28, 0  ;;  %s6999_s0 = smov (%p51_p0, %s50_s0), 0 }
  0x20   : > { %6957 = sst [smem:[#allocation22_spill]] %s6999_s0  ;;  %p193_p4 = scmp.ne.s32.totalorder %s5659_s25, %s5655_s2 }
  0x21   : > { %p189_p3 = por %p188_p2, %p187_p1  ;;  %s177_s30 = ssub.s32 %s5671_s3, %s6999_s0 }
  0x22   : > { %p194_p5 = scmp.eq.s32.totalorder %s5834_s29, 0  ;;  %p178_p6 = scmp.eq.s32.totalorder %s177_s30, 0 }
  0x23   : > { %p5059_p8 = scmp.lt.s32.totalorder %s5675_s28, 2  ;;  %s5856_s23 = sand.u32 1, %s5663_s26  }
  0x24   : > { %p5847_p7 = por %p194_p5, %p193_p4  ;;  %s684_s24 = sand.u32 1, %s5675_s28  }
  0x25   : > { %s5853_s22 = scalar_select %p178_p6, %s5663_s26, %s180_s4  }
  0x26   : > { %s6958_s5 = scalar_select %p5847_p7, 1, 0 }
  0x27   : > { %6959 = sst [smem:[#allocation23_spill]] %s5853_s22  ;;  %p5858_p9 = pnand %p5059_p8, %p189_p3 }
  0x28   : > { %s4591_s2 = sshll.u32 %s5856_s23, 8  ;;  %s4937_s0 = sshll.u32 %s5671_s3, 12 }
  0x29   : > { %s6961_s12 = sld [smem:[#allocation35_spill]]  ;;  %s688_s4 = scalar_lea.vmem [#allocation7], %s4591_s2 }
  0x2a   : > { %s695_s22 = sshll.u32 %s688_s4, 4  ;;  %s5873_s26 = scalar_lea.sflag [#allocation8], %s684_s24  ;;  %s5870_s22 = int_to_ptr.vmem [resolvable:$true] %s695_s22 }
  0x2b   : > { %p5879_p12 = pneg %p5858_p9 }
  0x2f   : > { %s5868_s20 = scalar_lea.hbm %s6961_s12, %s4937_s0  ;;  %s5472_s2 = scalar_lea.hbm %s6961_s12, 8192 }
  0x30   : > { %s5467_s19 = scalar_lea.hbm %s5868_s20, 4096  ;;  %p5473_p1 = scmp.lt.u32.totalorder %s5868_s20, %s6961_s12 }
  0x31   : > { %p5468_p11 = scmp.ne.s32.totalorder %s5868_s20, %s5467_s19  ;;  %p5474_p2 = scmp.lt.u32.totalorder %s5472_s2, %s5467_s19 }
  0x32   : > { %p5476_p4 = scmp.lt.u32.totalorder %s5467_s19, %s5868_s20 }
  0x33   : > { %p5470_p13 = pnand %p5879_p12, %p5468_p11  ;;  %p5475_p3 = por %p5474_p2, %p5473_p1 }
  0x35   : > { %p5471_p0 = pneg %p5470_p13  ;;  %p5477_p5 = por %p5476_p4, %p5475_p3 }
  0x37   : > { %p5478_p6 = pnand %p5477_p5, %p5471_p0 }
  0x39   : > { %5481 = shalt.err (!%p5478_p6)
}
  0x3a   : > { %s5482_s24 = scalar_lea.vmem %s5870_s22, 4096  ;;  %s5677_s21 = smov [#allocation7]  }
  0x3b   : > { %p5483_p8 = scmp.ne.s32.totalorder %s5870_s22, %s5482_s24  ;;  %s5487_s0 = sshll.u32 %s5677_s21, 4  ;;  %s5488_s0 = int_to_ptr.vmem [resolvable:$false] %s5487_s0 }
  0x3c   : > { %s5489_s30 = scalar_lea.vmem %s5488_s0, 8192  ;;  %p5490_p10 = scmp.lt.s32.totalorder %s5870_s22, %s5488_s0 }
  0x3d   : > { %p5485_p11 = pnand %p5483_p8, %p5879_p12  ;;  %p5491_p7 = scmp.lt.s32.totalorder %s5489_s30, %s5482_s24 }
  0x3f   : > { %p5486_p13 = pneg %p5485_p11  ;;  %p5492_p1 = por %p5491_p7, %p5490_p10 }
  0x41   : > { %p5493_p2 = pnand %p5492_p1, %p5486_p13 }
  0x43   : > { %5496 = shalt.err (!%p5493_p2)
}
  0x44   : > { %s6927_s19 = smov 128   ;;  %s6928_s2 = smov 8  }
  0x45   : > { %5052 = dma.hbm_to_vmem [thread:$0]  (!%p5858_p9), %s5868_s20, 4096, %s5870_s22, %s5873_s26, %s6927_s19, %s6927_s19, %s6928_s2  }
  0x46   : > { %p773_p7 = scmp.lt.s32.totalorder %s5675_s28, 3  ;;  %p6963_p10 = scmp.ge.s32.totalorder %s5675_s28, 1 }
  0x47   : > { %s4588_s24 = sshll.u32 %s5856_s23, 10  ;;  %s4936_s21 = sshll.u32 %s5671_s3, 14 }
  0x48   : > { %p5909_p0 = pnand %p6963_p10, %p773_p7  ;;  %s6965_s12 = sld [smem:[#allocation30_spill]] }
  0x49   : > { %s653_s6 = scalar_lea.vmem [#allocation4], %s4588_s24  ;;  %s4594_s20 = sshll.u32 %s5856_s23, 9 }
  0x4a   : > { %s6964_s4 = scalar_select %p5909_p0, 1, 0 }
  0x4b   : > { %s660_s8 = sshll.u32 %s653_s6, 4  ;;  %s650_s22 = scalar_lea.sflag [#allocation5], %s5856_s23  ;;  %s5920_s8 = int_to_ptr.vmem [resolvable:$true] %s660_s8 }
  0x4e   : > { %s5918_s9 = scalar_lea.hbm %s6965_s12, %s4936_s21  ;;  %s5502_s21 = scalar_lea.hbm %s6965_s12, 32768 }
  0x4f   : > { %s5497_s19 = scalar_lea.hbm %s5918_s9, 16384  ;;  %p5503_p6 = scmp.lt.u32.totalorder %s5918_s9, %s6965_s12 }
  0x50   : > { %p5498_p3 = scmp.ne.s32.totalorder %s5918_s9, %s5497_s19  ;;  %p5504_p8 = scmp.lt.u32.totalorder %s5502_s21, %s5497_s19 }
  0x51   : > { %p5506_p13 = scmp.lt.u32.totalorder %s5497_s19, %s5918_s9 }
  0x52   : > { %p5500_p4 = pnand %p5498_p3, %p5879_p12  ;;  %p5505_p11 = por %p5504_p8, %p5503_p6 }
  0x54   : > { %p5501_p5 = pneg %p5500_p4  ;;  %p5507_p1 = por %p5506_p13, %p5505_p11 }
  0x56   : > { %p5508_p2 = pnand %p5507_p1, %p5501_p5 }
  0x58   : > { %5511 = shalt.err (!%p5508_p2)
}
  0x59   : > { %s5512_s6 = scalar_lea.vmem %s5920_s8, 16384  ;;  %s5680_s28 = smov [#allocation4]  }
  0x5a   : > { %p5513_p7 = scmp.ne.s32.totalorder %s5920_s8, %s5512_s6  ;;  %s5517_s2 = sshll.u32 %s5680_s28, 4  ;;  %s5518_s2 = int_to_ptr.vmem [resolvable:$false] %s5517_s2 }
  0x5b   : > { %s5519_s24 = scalar_lea.vmem %s5518_s2, 32768  ;;  %p5520_p4 = scmp.lt.s32.totalorder %s5920_s8, %s5518_s2 }
  0x5c   : > { %p5515_p10 = pnand %p5513_p7, %p5879_p12  ;;  %p5521_p0 = scmp.lt.s32.totalorder %s5519_s24, %s5512_s6 }
  0x5e   : > { %p5516_p3 = pneg %p5515_p10  ;;  %p5522_p6 = por %p5521_p0, %p5520_p4 }
  0x60   : > { %p5523_p8 = pnand %p5522_p6, %p5516_p3 }
  0x62   : > { %5526 = shalt.err (!%p5523_p8)
}
  0x63   : > { %s5681_s19 = smov 512   ;;  %s5682_s21 = smov 32  }
  0x64   : > { %5049 = dma.hbm_to_vmem [thread:$0]  (!%p5858_p9), %s5918_s9, 16384, %s5920_s8, %s650_s22, %s5681_s19, %s5681_s19, %s5682_s21  }
  0x65   : > { %s4938_s0 = sshll.u32 %s5671_s3, 13  ;;  %s6966_s15 = sld [smem:[#allocation36_spill]] }
  0x66   : > { %s723_s2 = scalar_lea.vmem [#allocation9], %s4594_s20 }
  0x67   : > { %s730_s24 = sshll.u32 %s723_s2, 4  ;;  %s5957_s24 = int_to_ptr.vmem [resolvable:$true] %s730_s24 }
  0x6b   : > { %s5953_s28 = scalar_lea.hbm %s6966_s15, %s4938_s0  ;;  %s5532_s22 = scalar_lea.hbm %s6966_s15, 16384 }
  0x6c   : > { %s5527_s12 = scalar_lea.hbm %s5953_s28, 8192  ;;  %p5533_p13 = scmp.lt.u32.totalorder %s5953_s28, %s6966_s15 }
  0x6d   : > { %p5528_p0 = scmp.ne.s32.totalorder %s5953_s28, %s5527_s12  ;;  %p5534_p1 = scmp.lt.u32.totalorder %s5532_s22, %s5527_s12 }
  0x6e   : > { %p5536_p7 = scmp.lt.u32.totalorder %s5527_s12, %s5953_s28 }
  0x6f   : > { %p5530_p5 = pnand %p5528_p0, %p5879_p12  ;;  %p5535_p2 = por %p5534_p1, %p5533_p13 }
  0x71   : > { %p5531_p11 = pneg %p5530_p5  ;;  %p5537_p10 = por %p5536_p7, %p5535_p2 }
  0x73   : > { %p5538_p3 = pnand %p5537_p10, %p5531_p11 }
  0x75   : > { %5541 = shalt.err (!%p5538_p3)
}
  0x76   : > { %s5542_s30 = scalar_lea.vmem %s5957_s24, 8192  ;;  %s5683_s6 = smov [#allocation9]  }
  0x77   : > { %p5543_p4 = scmp.ne.s32.totalorder %s5957_s24, %s5542_s30  ;;  %s5547_s2 = sshll.u32 %s5683_s6, 4  ;;  %s5548_s2 = int_to_ptr.vmem [resolvable:$false] %s5547_s2 }
  0x78   : > { %s5549_s8 = scalar_lea.vmem %s5548_s2, 16384  ;;  %p5550_p0 = scmp.lt.s32.totalorder %s5957_s24, %s5548_s2 }
  0x79   : > { %p5545_p6 = pnand %p5543_p4, %p5879_p12  ;;  %p5551_p5 = scmp.lt.s32.totalorder %s5549_s8, %s5542_s30 }
  0x7b   : > { %p5546_p8 = pneg %p5545_p6  ;;  %p5552_p13 = por %p5551_p5, %p5550_p0 }
  0x7d   : > { %p5553_p1 = pnand %p5552_p13, %p5546_p8 }
  0x7f   : > { %5556 = shalt.err (!%p5553_p1)
}
  0x80   : > { %s5684_s12 = smov 256   ;;  %s5685_s9 = smov 16  }
  0x81   : > { %5055 = dma.hbm_to_vmem [thread:$0]  (!%p5858_p9), %s5953_s28, 8192, %s5957_s24, %s5873_s26, %s5684_s12, %s5684_s12, %s5685_s9  }
  0x82   : > { %s6967_s17 = sld [smem:[#allocation37_spill]]  ;;  %s751_s30 = scalar_lea.vmem [#allocation10], %s4594_s20 }
  0x83   : > { %s758_s6 = sshll.u32 %s751_s30, 4  ;;  %s748_s2 = scalar_lea.sflag [#allocation11], %s5856_s23  ;;  %s5990_s6 = int_to_ptr.vmem [resolvable:$true] %s758_s6 }
  0x88   : > { %s5986_s21 = scalar_lea.hbm %s6967_s17, %s4938_s0  ;;  %s5562_s0 = scalar_lea.hbm %s6967_s17, 16384 }
  0x89   : > { %s5557_s8 = scalar_lea.hbm %s5986_s21, 8192  ;;  %p5563_p10 = scmp.lt.u32.totalorder %s5986_s21, %s6967_s17 }
  0x8a   : > { %p5558_p11 = scmp.ne.s32.totalorder %s5986_s21, %s5557_s8  ;;  %p5564_p3 = scmp.lt.u32.totalorder %s5562_s0, %s5557_s8 }
  0x8b   : > { %p5566_p6 = scmp.lt.u32.totalorder %s5557_s8, %s5986_s21 }
  0x8c   : > { %p5560_p2 = pnand %p5558_p11, %p5879_p12  ;;  %p5565_p4 = por %p5564_p3, %p5563_p10 }
  0x8e   : > { %p5561_p7 = pneg %p5560_p2  ;;  %p5567_p8 = por %p5566_p6, %p5565_p4 }
  0x90   : > { %p5568_p0 = pnand %p5567_p8, %p5561_p7 }
  0x92   : > { %5571 = shalt.err (!%p5568_p0)
}
  0x93   : > { %s5572_s20 = scalar_lea.vmem %s5990_s6, 8192  ;;  %s5686_s9 = smov [#allocation10]  }
  0x94   : > { %p5573_p5 = scmp.ne.s32.totalorder %s5990_s6, %s5572_s20  ;;  %s5577_s22 = sshll.u32 %s5686_s9, 4  ;;  %s5578_s22 = int_to_ptr.vmem [resolvable:$false] %s5577_s22 }
  0x95   : > { %s5579_s19 = scalar_lea.vmem %s5578_s22, 16384  ;;  %p5580_p11 = scmp.lt.s32.totalorder %s5990_s6, %s5578_s22 }
  0x96   : > { %p5575_p13 = pnand %p5573_p5, %p5879_p12  ;;  %p5581_p2 = scmp.lt.s32.totalorder %s5579_s19, %s5572_s20 }
  0x98   : > { %p5576_p1 = pneg %p5575_p13  ;;  %p5582_p10 = por %p5581_p2, %p5580_p11 }
  0x9a   : > { %p5583_p3 = pnand %p5582_p10, %p5576_p1 }
  0x9c   : > { %5586 = shalt.err (!%p5583_p3)
}
  0x9d   : > { %s6968_s30 = smov 8   ;;  %s6969_s8 = smov 128  }
  0x9e   : > { %5058 = dma.hbm_to_vmem [thread:$0]  (!%p5858_p9), %s5986_s21, 8192, %s5990_s6, %s748_s2, %s6969_s8, %s6969_s8, %s6968_s30  }
  0x9f   : > { %p6970_p12 = scmp.ne.s32.totalorder %s6964_s4, 0 }
  0xa1   : > { %777 = sbr.rel (%p6970_p12) target bundleno = 3913 (0xf49), region = 104 }
  0xa8   : > { %s779_s7 = sand.u32 1, %s5659_s25   ;;  %p6971_p7 = scmp.ne.s32.totalorder %s6958_s5, 0 }
  0xa9   : > { %s4601_s26 = sshll.u32 %s779_s7, 10  ;;  %s780_s28 = scalar_lea.sflag [#allocation5], %s779_s7 }
  0xaa   : > { %s6022_s0 = scalar_lea.vmem [#allocation4], %s4601_s26 }
  0xab   : > { %5638 = dma.done.wait (%p6971_p7), %s780_s28, 16384  }
  0xac   : > { %5640 = vsyncadd (%p6971_p7), %s780_s28, 4294950912  ;;  %s788_s23 = sand.u32 1, %s5834_s29   ;;  %s4602_s1 = sshll.u32 %s779_s7, 8 }
  0xad   : > { %s789_s21 = scalar_lea.sflag [#allocation8], %s788_s23  ;;  %s6029_s6 = scalar_lea.vmem [#allocation7], %s4602_s1 }
  0xae   : > { %5642 = dma.done.wait (%p6971_p7), %s789_s21, 12288  }
  0xaf   : > { %5644 = vsyncadd (%p6971_p7), %s789_s21, 4294955008  ;;  %s4603_s4 = sshll.u32 %s779_s7, 9  ;;  %s807_s24 = scalar_lea.sflag [#allocation11], %s779_s7 }
  0xb0   : > { %s6035_s2 = scalar_lea.vmem [#allocation9], %s4603_s4  ;;  %s6037_s12 = scalar_lea.vmem [#allocation10], %s4603_s4 }
  0xb1   : > { %6972 = sst [smem:[#allocation24_spill]] %s6037_s12 }
  0xb2   : > { %5646 = dma.done.wait (%p6971_p7), %s807_s24, 8192  }
  0xb3   : > { %5648 = vsyncadd (%p6971_p7), %s807_s24, 4294959104  ;;  %p921_p9 = scmp.lt.s32.totalorder %s5667_s27, 1  ;;  %s6973_s8 = sld [smem:[#allocation28_spill]] }
  0xb4   : > { %s6974_s28 = sld [smem:[#allocation29_spill]]  ;;  %p4613_p4 = scmp.ne.s32.totalorder %s5667_s27, 0 }
  0xb5   : > { %s922_s20 = scalar_select %p921_p9, %s5667_s27, 1 }
  0xb6   : > { %957 = sbr.rel (%p4613_p4) target bundleno = 414 (0x19e), region = 124  ;;  %s6975_s25 = sld [smem:[#allocation26_spill]] (!%p4613_p4)  ;;  %v5687_v2 = vmov (!%p4613_p4), 0   ;;  %vm985_vm0 = vcmask (!%p4613_p4), 130048   ;;  %v965_v6 = vlaneseq (!%p4613_p4) }
  0xb7   : > { %s6045_s9 = sshll.u32 %s922_s20, 1  ;;  %s4611_s22 = sshll.u32 %s922_s20, 2  ;;  %1021 = vmatprep.mubr.bf16.mxu0 (!%p4613_p4), %v5687_v2 }
  0xb8   : > { %s932_s4 = scalar_lea.vmem %s6907_s10, %s6045_s9  ;;  %s936_s17 = scalar_lea.vmem %s6908_s11, %s6045_s9  ;;  %v966_v7 = vshrl.u32 (!%p4613_p4), %v965_v6, 7 }
  0xb9   : > { %s924_s7 = scalar_lea.vmem %s6973_s8, %s6045_s9  ;;  %s944_s19 = scalar_lea.vmem %s6911_s14, %s6045_s9 }
  0xba   : > { %s928_s23 = scalar_lea.vmem %s6974_s28, %s6045_s9  ;;  %s6074_s5 = scalar_lea.vmem %s6913_s16, %s4611_s22  ;;  %v967_v8 = vsub.s32 (!%p4613_p4), 0, %v966_v7  ;;  %v971_v10 = vsub.s32 (!%p4613_p4), 1, %v966_v7 }
  0xbb   : > { %s952_s1 = scalar_lea.vmem %s6915_s18, %s6045_s9  ;;  %s6977_s22 = sld [smem:[#allocation25_spill]] (!%p4613_p4) }
  0xbc   : > { %s6976_s24 = smov (!%p4613_p4), %s6975_s25  ;;  %v5124_v0 = vld [vmem:[%s6975_s25 + $0x4] ss:$8 sps:$4 sm:$0xff] (!%p4613_p4)   ;;  %s6978_s28 = sld [smem:[#allocation27_spill]] (!%p4613_p4) }
  0xbd   : > { %v5126_v1 = vld [vmem:[%s6976_s24] ss:$8 sps:$4 sm:$0xff]   ;;  %989 = vmatprep.subr.bf16.mxu0 %v5124_v0 }
  0xbe   : > { %990 = vmatpush1.bf16.msra.mxu0 %v5126_v1 }
  0xc1   : > { %v958_v3 = vld [vmem:[%s6977_s22] sm:$0xff]  ;;  %v959_v4 = vld [vmem:[%s6977_s22 + $0x8] sm:$0xff] }
  0xc2   : > { %v962_v5 = vpack.c.bf16 %v959_v4, %v958_v3  ;;  %v963_v9 = vld [vmem:[%s6978_s28] sm:$0x3] }
  0xc3   : > { %v968_v11 = vrot.slane %v963_v9, %v967_v8  ;;  %v972_v12 = vrot.slane %v963_v9, %v971_v10 }
  0xc4   : > { %4616 = vmatmul.mubr.msk.bf16.vlgmr.msra.gmra.mrb[0].mxu0 %vm985_vm0, %v962_v5 }
 0x197   : > { %v1023_v13 = vpop.f32.mrb[0].mxu0 }
 0x198   : > { %v1024_v14 = vadd.f32 %v1023_v13, %v968_v11  ;;  %v1025_v15 = vpop.f32.mrb[1].mxu0 }
 0x199   : > { %v1026_v16 = vadd.f32 %v1025_v15, %v972_v12  ;;  %v1027_v17 = vpop.f32.mrb[2].mxu0 }
 0x19a   : > { %1032 = vst [vmem:[#allocation2] sm:$0xff] %v1024_v14  ;;  %v1028_v18 = vadd.f32 %v1027_v17, %v968_v11  ;;  %v1029_v19 = vpop.f32.mrb[3].mxu0 }
 0x19b   : > { %1033 = vst [vmem:[#allocation2 + $0x8] sm:$0xff] %v1026_v16  ;;  %v1030_v20 = vadd.f32 %v1029_v19, %v972_v12 }
 0x19c   : > { %1034 = vst [vmem:[#allocation2 + $0x10] sm:$0xff] %v1028_v18 }
 0x19d   : > { %1035 = vst [vmem:[#allocation2 + $0x18] sm:$0xff] %v1030_v20 }
 0x19e PF: > { %v1116_v27 = vld [vmem:[%s6022_s0] sm:$0xff]  ;;  %v1117_v29 = vld [vmem:[%s6022_s0 + $0x8] sm:$0xff]  ;;  %s6982_s20 = sld [smem:[#allocation31_spill]]  ;;  %s6983_s15 = sld [smem:[#allocation34_spill]]  ;;  %vm5690_vm1 = vmmov 0   ;;  %vm2155_vm2 = vcmask 1043456  }
 0x19f   : > { %v1120_v28 = vld [vmem:[%s6022_s0 + $0x20] sm:$0xff]  ;;  %v1121_v31 = vld [vmem:[%s6022_s0 + $0x28] sm:$0xff]  ;;  %s6984_s3 = sld [smem:[#allocation32_spill]]  ;;  %s5689_s29 = smov 64   ;;  %vm2151_vm4 = vcmask 64512  }
 0x1a0   : > { %v4619_v30 = vcombine.high %v1116_v27, %v1120_v28  ;;  %v4618_v32 = vcombine.low %v1116_v27, %v1120_v28  ;;  %v1124_v33 = vld [vmem:[%s6022_s0 + $0x40] sm:$0xff]  ;;  %v4621_v35 = vcombine.high %v1117_v29, %v1121_v31  ;;  %v4620_v36 = vcombine.low %v1117_v29, %v1121_v31  ;;  %v1125_v38 = vld [vmem:[%s6022_s0 + $0x48] sm:$0xff]  ;;  %s6986_s30 = scalar_lea.vmem %s6910_s13, %s6045_s9  ;;  %p4914_p6 = scmp.ne.s32.totalorder %s5667_s27, 1 }
 0x1a1   : > { %v6096_v21 = vld [vmem:[#allocation2] sm:$0xff]  ;;  %v1129_v39 = vld [vmem:[%s6022_s0 + $0x68] sm:$0xff]  ;;  %vm4288_vm13 = vcmask (!%p4914_p6), 130048  }
 0x1a2   : > { %v6098_v22 = vld [vmem:[#allocation2 + $0x8] sm:$0xff]  ;;  %v1128_v34 = vld [vmem:[%s6022_s0 + $0x60] sm:$0xff]  ;;  %1886 = vmatprep.subr.bf16.mxu0 %v4619_v30  ;;  %v4629_v41 = vcombine.high %v1125_v38, %v1129_v39  ;;  %1929 = vmatprep.subr.bf16.mxu1 %v4621_v35  ;;  %v4628_v46 = vcombine.low %v1125_v38, %v1129_v39 }
 0x1a3   : > { %v6100_v23 = vld [vmem:[#allocation2 + $0x10] sm:$0xff]  ;;  %v1053_v24 = vadd.f32 %v6098_v22, %v6096_v21  ;;  %v4627_v37 = vcombine.high %v1124_v33, %v1128_v34  ;;  %v1132_v40 = vld [vmem:[%s6022_s0 + $0x80] sm:$0xff]  ;;  %v1133_v43 = vld [vmem:[%s6022_s0 + $0x88] sm:$0xff]  ;;  %1887 = vmatpush1.bf16.msra.mxu0 %v4618_v32  ;;  %v4626_v45 = vcombine.low %v1124_v33, %v1128_v34  ;;  %1930 = vmatpush1.bf16.msra.mxu1 %v4620_v36 }
 0x1a4   : > { %v6104_v25 = vld [vmem:[#allocation2 + $0x18] sm:$0xff]  ;;  %v1136_v42 = vld [vmem:[%s6022_s0 + $0xa0] sm:$0xff]  ;;  %v1137_v44 = vld [vmem:[%s6022_s0 + $0xa8] sm:$0xff]  ;;  %1931 = vmatprep.subr.bf16.mxu1 %v4629_v41 }
 0x1a5   : > { %1054 = vadd.xlane.f32.xlu0 %v1053_v24  ;;  %v1056_v26 = vadd.f32 %v6104_v25, %v6100_v23  ;;  %1888 = vmatprep.subr.bf16.mxu0 %v4627_v37  ;;  %v4635_v47 = vcombine.high %v1132_v40, %v1136_v42  ;;  %v4637_v48 = vcombine.high %v1133_v43, %v1137_v44  ;;  %v1140_v49 = vld [vmem:[%s6022_s0 + $0xc0] sm:$0xff]  ;;  %v1141_v51 = vld [vmem:[%s6022_s0 + $0xc8] sm:$0xff] }
 0x1a6   : > { %v1144_v50 = vld [vmem:[%s6022_s0 + $0xe0] sm:$0xff]  ;;  %v1145_v52 = vld [vmem:[%s6022_s0 + $0xe8] sm:$0xff]  ;;  %v4634_v53 = vcombine.low %v1132_v40, %v1136_v42  ;;  %v4636_v54 = vcombine.low %v1133_v43, %v1137_v44 }
 0x1a7   : > { %1889 = vmatpush1.bf16.msra.mxu0 %v4626_v45  ;;  %1932 = vmatpush1.bf16.msra.mxu1 %v4628_v46  ;;  %v4643_v55 = vcombine.high %v1140_v49, %v1144_v50  ;;  %v4645_v56 = vcombine.high %v1141_v51, %v1145_v52  ;;  %v1148_v57 = vld [vmem:[%s6022_s0 + $0x100] sm:$0xff]  ;;  %v1149_v59 = vld [vmem:[%s6022_s0 + $0x108] sm:$0xff]  ;;  %v4642_v61 = vcombine.low %v1140_v49, %v1144_v50 }
 0x1a8   : > { %1890 = vmatprep.subr.bf16.mxu0 %v4635_v47  ;;  %1933 = vmatprep.subr.bf16.mxu1 %v4637_v48  ;;  %v1152_v58 = vld [vmem:[%s6022_s0 + $0x120] sm:$0xff]  ;;  %v1153_v60 = vld [vmem:[%s6022_s0 + $0x128] sm:$0xff]  ;;  %v4644_v0 = vcombine.low %v1141_v51, %v1145_v52 }
 0x1a9   : > { %1057 = vadd.xlane.f32.xlu0 %v1056_v26  ;;  %v1156_v62 = vld [vmem:[%s6022_s0 + $0x140] sm:$0xff]  ;;  %v4651_v1 = vcombine.high %v1148_v57, %v1152_v58  ;;  %v1157_v2 = vld [vmem:[%s6022_s0 + $0x148] sm:$0xff]  ;;  %v4653_v4 = vcombine.high %v1149_v59, %v1153_v60  ;;  %v4650_v5 = vcombine.low %v1148_v57, %v1152_v58  ;;  %v4652_v8 = vcombine.low %v1149_v59, %v1153_v60 }
 0x1aa   : > { %v1160_v63 = vld [vmem:[%s6022_s0 + $0x160] sm:$0xff]  ;;  %v1161_v3 = vld [vmem:[%s6022_s0 + $0x168] sm:$0xff] }
 0x1ab   : > { %1891 = vmatpush1.bf16.msra.mxu0 %v4634_v53  ;;  %1934 = vmatpush1.bf16.msra.mxu1 %v4636_v54  ;;  %v1164_v6 = vld [vmem:[%s6022_s0 + $0x180] sm:$0xff]  ;;  %v4659_v9 = vcombine.high %v1156_v62, %v1160_v63  ;;  %v1165_v10 = vld [vmem:[%s6022_s0 + $0x188] sm:$0xff]  ;;  %v4661_v12 = vcombine.high %v1157_v2, %v1161_v3  ;;  %v4658_v13 = vcombine.low %v1156_v62, %v1160_v63 }
 0x1ac   : > { %1892 = vmatprep.subr.bf16.mxu0 %v4643_v55  ;;  %1935 = vmatprep.subr.bf16.mxu1 %v4645_v56  ;;  %v1168_v7 = vld [vmem:[%s6022_s0 + $0x1a0] sm:$0xff]  ;;  %v1169_v11 = vld [vmem:[%s6022_s0 + $0x1a8] sm:$0xff]  ;;  %v4660_v16 = vcombine.low %v1157_v2, %v1161_v3 }
 0x1ad   : > { %v1172_v14 = vld [vmem:[%s6022_s0 + $0x1c0] sm:$0xff]  ;;  %v4667_v17 = vcombine.high %v1164_v6, %v1168_v7  ;;  %v1173_v18 = vld [vmem:[%s6022_s0 + $0x1c8] sm:$0xff]  ;;  %v4669_v20 = vcombine.high %v1165_v10, %v1169_v11  ;;  %v4666_v24 = vcombine.low %v1164_v6, %v1168_v7  ;;  %v4668_v28 = vcombine.low %v1165_v10, %v1169_v11 }
 0x1ae   : > { %v1176_v15 = vld [vmem:[%s6022_s0 + $0x1e0] sm:$0xff]  ;;  %v1177_v19 = vld [vmem:[%s6022_s0 + $0x1e8] sm:$0xff] }
 0x1af   : > { %1893 = vmatpush1.bf16.msra.mxu0 %v4642_v61  ;;  %1936 = vmatpush1.bf16.msra.mxu1 %v4644_v0  ;;  %v1180_v26 = vld [vmem:[%s6022_s0 + $0x200] sm:$0xff]  ;;  %v4675_v29 = vcombine.high %v1172_v14, %v1176_v15  ;;  %v1181_v30 = vld [vmem:[%s6022_s0 + $0x208] sm:$0xff]  ;;  %v4677_v32 = vcombine.high %v1173_v18, %v1177_v19  ;;  %v4674_v33 = vcombine.low %v1172_v14, %v1176_v15 }
 0x1b0   : > { %1894 = vmatprep.subr.bf16.mxu0 %v4651_v1  ;;  %1937 = vmatprep.subr.bf16.mxu1 %v4653_v4  ;;  %v1184_v27 = vld [vmem:[%s6022_s0 + $0x220] sm:$0xff]  ;;  %v1185_v31 = vld [vmem:[%s6022_s0 + $0x228] sm:$0xff]  ;;  %v4676_v36 = vcombine.low %v1173_v18, %v1177_v19 }
 0x1b1   : > { %v1188_v34 = vld [vmem:[%s6022_s0 + $0x240] sm:$0xff]  ;;  %v4683_v37 = vcombine.high %v1180_v26, %v1184_v27  ;;  %v1189_v38 = vld [vmem:[%s6022_s0 + $0x248] sm:$0xff]  ;;  %v4685_v40 = vcombine.high %v1181_v30, %v1185_v31  ;;  %v4682_v41 = vcombine.low %v1180_v26, %v1184_v27  ;;  %v4684_v42 = vcombine.low %v1181_v30, %v1185_v31 }
 0x1b2   : > { %v1192_v35 = vld [vmem:[%s6022_s0 + $0x260] sm:$0xff]  ;;  %v1193_v39 = vld [vmem:[%s6022_s0 + $0x268] sm:$0xff] }
 0x1b3   : > { %1895 = vmatpush1.bf16.msra.mxu0 %v4650_v5  ;;  %1938 = vmatpush1.bf16.msra.mxu1 %v4652_v8  ;;  %v4691_v43 = vcombine.high %v1188_v34, %v1192_v35  ;;  %v4693_v44 = vcombine.high %v1189_v38, %v1193_v39  ;;  %v4690_v57 = vcombine.low %v1188_v34, %v1192_v35  ;;  %v1197_v59 = vld [vmem:[%s6022_s0 + $0x288] sm:$0xff]  ;;  %v1204_v1 = vld [vmem:[%s6022_s0 + $0x2c0] sm:$0xff] }
 0x1b4   : > { %1896 = vmatprep.subr.bf16.mxu0 %v4659_v9  ;;  %1939 = vmatprep.subr.bf16.mxu1 %v4661_v12  ;;  %v4692_v58 = vcombine.low %v1189_v38, %v1193_v39  ;;  %v1201_v61 = vld [vmem:[%s6022_s0 + $0x2a8] sm:$0xff]  ;;  %v1208_v2 = vld [vmem:[%s6022_s0 + $0x2e0] sm:$0xff] }
 0x1b5   : > { %v4701_v62 = vcombine.high %v1197_v59, %v1201_v61  ;;  %v4700_v0 = vcombine.low %v1197_v59, %v1201_v61  ;;  %v1205_v3 = vld [vmem:[%s6022_s0 + $0x2c8] sm:$0xff]  ;;  %v4707_v4 = vcombine.high %v1204_v1, %v1208_v2  ;;  %v4706_v7 = vcombine.low %v1204_v1, %v1208_v2  ;;  %v1212_v9 = vld [vmem:[%s6022_s0 + $0x300] sm:$0xff] }
 0x1b6   : > { %v1209_v5 = vld [vmem:[%s6022_s0 + $0x2e8] sm:$0xff]  ;;  %v1216_v10 = vld [vmem:[%s6022_s0 + $0x320] sm:$0xff] }
 0x1b7   : > { %1897 = vmatpush1.bf16.msra.mxu0 %v4658_v13  ;;  %1940 = vmatpush1.bf16.msra.mxu1 %v4660_v16  ;;  %v4709_v6 = vcombine.high %v1205_v3, %v1209_v5  ;;  %v4708_v8 = vcombine.low %v1205_v3, %v1209_v5  ;;  %v1213_v11 = vld [vmem:[%s6022_s0 + $0x308] sm:$0xff]  ;;  %v4715_v12 = vcombine.high %v1212_v9, %v1216_v10  ;;  %v1224_v18 = vld [vmem:[%s6022_s0 + $0x360] sm:$0xff] }
 0x1b8   : > { %1898 = vmatprep.subr.bf16.mxu0 %v4667_v17  ;;  %1941 = vmatprep.subr.bf16.mxu1 %v4669_v20  ;;  %v1217_v13 = vld [vmem:[%s6022_s0 + $0x328] sm:$0xff]  ;;  %v4714_v15 = vcombine.low %v1212_v9, %v1216_v10  ;;  %v1220_v17 = vld [vmem:[%s6022_s0 + $0x340] sm:$0xff] }
 0x1b9   : > { %v4717_v14 = vcombine.high %v1213_v11, %v1217_v13  ;;  %v4716_v16 = vcombine.low %v1213_v11, %v1217_v13  ;;  %v1221_v19 = vld [vmem:[%s6022_s0 + $0x348] sm:$0xff]  ;;  %v4723_v20 = vcombine.high %v1220_v17, %v1224_v18  ;;  %v4722_v27 = vcombine.low %v1220_v17, %v1224_v18  ;;  %v1232_v30 = vld [vmem:[%s6022_s0 + $0x3a0] sm:$0xff]  ;;  %v1126_v17 = vld [vmem:[%s6022_s0 + $0x50] sm:$0xff] }
 0x1ba   : > { %v1229_v31 = vld [vmem:[%s6022_s0 + $0x388] sm:$0xff]  ;;  %v1240_v38 = vld [vmem:[%s6022_s0 + $0x3e0] sm:$0xff]  ;;  %v1130_v18 = vld [vmem:[%s6022_s0 + $0x70] sm:$0xff] }
 0x1bb   : > { %1899 = vmatpush1.bf16.msra.mxu0 %v4666_v24  ;;  %1942 = vmatpush1.bf16.msra.mxu1 %v4668_v28  ;;  %v1225_v24 = vld [vmem:[%s6022_s0 + $0x368] sm:$0xff]  ;;  %v1052_v3 = vld [vmem:[%s928_s23] sm:$0x3]  ;;  %s6981_s23 = sld [smem:[#allocation33_spill]] }
 0x1bc   : > { %1900 = vmatprep.subr.bf16.mxu0 %v4675_v29  ;;  %1943 = vmatprep.subr.bf16.mxu1 %v4677_v32  ;;  %v4725_v26 = vcombine.high %v1221_v19, %v1225_v24  ;;  %v4724_v28 = vcombine.low %v1221_v19, %v1225_v24  ;;  %v1228_v29 = vld [vmem:[%s6022_s0 + $0x380] sm:$0xff]  ;;  %v1237_v39 = vld [vmem:[%s6022_s0 + $0x3c8] sm:$0xff]  ;;  %v1127_v19 = vld [vmem:[%s6022_s0 + $0x58] sm:$0xff] }
 0x1bd   : > { %v4731_v32 = vcombine.high %v1228_v29, %v1232_v30  ;;  %v4730_v35 = vcombine.low %v1228_v29, %v1232_v30  ;;  %v1135_v29 = vld [vmem:[%s6022_s0 + $0x98] sm:$0xff] }
 0x1be   : > { %v1139_v30 = vld [vmem:[%s6022_s0 + $0xb8] sm:$0xff] }
 0x1bf   : > { %1901 = vmatpush1.bf16.msra.mxu0 %v4674_v33  ;;  %1944 = vmatpush1.bf16.msra.mxu1 %v4676_v36  ;;  %v1233_v33 = vld [vmem:[%s6022_s0 + $0x3a8] sm:$0xff] }
 0x1c0   : > { %1902 = vmatprep.subr.bf16.mxu0 %v4683_v37  ;;  %1945 = vmatprep.subr.bf16.mxu1 %v4685_v40  ;;  %v4733_v34 = vcombine.high %v1229_v31, %v1233_v33  ;;  %v4732_v36 = vcombine.low %v1229_v31, %v1233_v33  ;;  %v1236_v37 = vld [vmem:[%s6022_s0 + $0x3c0] sm:$0xff]  ;;  %v4630_v31 = vcombine.low %v1126_v17, %v1130_v18 }
 0x1c1   : > { %v4739_v40 = vcombine.high %v1236_v37, %v1240_v38 }
 0x1c3   : > { %1903 = vmatpush1.bf16.msra.mxu0 %v4682_v41  ;;  %1946 = vmatpush1.bf16.msra.mxu1 %v4684_v42  ;;  %v1241_v41 = vld [vmem:[%s6022_s0 + $0x3e8] sm:$0xff]  ;;  %v4738_v42 = vcombine.low %v1236_v37, %v1240_v38  ;;  %v1143_v37 = vld [vmem:[%s6022_s0 + $0xd8] sm:$0xff] }
 0x1c4   : > { %1904 = vmatprep.subr.bf16.mxu0 %v4691_v43  ;;  %1947 = vmatprep.subr.bf16.mxu1 %v4693_v44  ;;  %v4741_v43 = vcombine.high %v1237_v39, %v1241_v41  ;;  %v4740_v44 = vcombine.low %v1237_v39, %v1241_v41  ;;  %v1147_v38 = vld [vmem:[%s6022_s0 + $0xf8] sm:$0xff] }
 0x1c7   : > { %1905 = vmatpush1.bf16.msra.mxu0 %v4690_v57  ;;  %1948 = vmatpush1.bf16.msra.mxu1 %v4692_v58 }
 0x1c8   : > { %1949 = vmatprep.subr.bf16.mxu1 %v4701_v62 }
 0x1cb   : > { %1950 = vmatpush1.bf16.msra.mxu1 %v4700_v0 }
 0x1cc   : > { %1951 = vmatprep.subr.bf16.mxu1 %v4709_v6 }
 0x1cf   : > { %1952 = vmatpush1.bf16.msra.mxu1 %v4708_v8 }
 0x1d0   : > { %1953 = vmatprep.subr.bf16.mxu1 %v4717_v14 }
 0x1d3   : > { %1954 = vmatpush1.bf16.msra.mxu1 %v4716_v16 }
 0x1d4   : > { %1955 = vmatprep.subr.bf16.mxu1 %v4725_v26  ;;  %v1134_v26 = vld [vmem:[%s6022_s0 + $0x90] sm:$0xff] }
 0x1d7   : > { %1956 = vmatpush1.bf16.msra.mxu1 %v4724_v28  ;;  %v1138_v28 = vld [vmem:[%s6022_s0 + $0xb0] sm:$0xff] }
 0x1d8   : > { %1957 = vmatprep.subr.bf16.mxu1 %v4733_v34  ;;  %v4639_v33 = vcombine.high %v1134_v26, %v1138_v28  ;;  %v4641_v34 = vcombine.high %v1135_v29, %v1139_v30  ;;  %v4638_v39 = vcombine.low %v1134_v26, %v1138_v28  ;;  %v1194_v26 = vld [vmem:[%s6022_s0 + $0x270] sm:$0xff] }
 0x1db   : > { %1958 = vmatpush1.bf16.msra.mxu1 %v4732_v36  ;;  %v1146_v36 = vld [vmem:[%s6022_s0 + $0xf0] sm:$0xff] }
 0x1dc   : > { %1959 = vmatprep.subr.bf16.mxu1 %v4741_v43  ;;  %v1150_v43 = vld [vmem:[%s6022_s0 + $0x110] sm:$0xff] }
 0x1df   : > { %1960 = vmatpush1.bf16.msra.mxu1 %v4740_v44  ;;  %v1154_v44 = vld [vmem:[%s6022_s0 + $0x130] sm:$0xff] }
 0x232   : > { %v1055_v45 = vpop.xlane.xlu0 %1054 }
 0x233   : > { %v1060_v46 = vmul.f32 0.00390625, %v1055_v45  ;;  %v1118_v45 = vld [vmem:[%s6022_s0 + $0x10] sm:$0xff] }
 0x235   : > { %v6149_v47 = vsub.f32 %v6096_v21, %v1060_v46  ;;  %v6152_v48 = vsub.f32 %v6098_v22, %v1060_v46  ;;  %v1122_v46 = vld [vmem:[%s6022_s0 + $0x30] sm:$0xff] }
 0x236   : > { %v1058_v49 = vpop.xlane.xlu0 %1057 }
 0x237   : > { %v1061_v50 = vmul.f32 0.00390625, %v1058_v49  ;;  %v1066_v51 = vmul.f32 %v6149_v47, %v6149_v47  ;;  %v1067_v52 = vmul.f32 %v6152_v48, %v6152_v48  ;;  %v1119_v49 = vld [vmem:[%s6022_s0 + $0x18] sm:$0xff] }
 0x239   : > { %v6159_v53 = vsub.f32 %v6100_v23, %v1061_v50  ;;  %v6162_v21 = vsub.f32 %v6104_v25, %v1061_v50  ;;  %v1070_v22 = vadd.f32 %v1067_v52, %v1066_v51  ;;  %v1196_v23 = vld [vmem:[%s6022_s0 + $0x280] sm:$0xff]  ;;  %v4623_v50 = vcombine.high %v1118_v45, %v1122_v46  ;;  %v1123_v51 = vld [vmem:[%s6022_s0 + $0x38] sm:$0xff] }
 0x23a   : > { %v1200_v25 = vld [vmem:[%s6022_s0 + $0x2a0] sm:$0xff]  ;;  %v4622_v52 = vcombine.low %v1118_v45, %v1122_v46  ;;  %v1151_v45 = vld [vmem:[%s6022_s0 + $0x118] sm:$0xff] }
 0x23b   : > { %1071 = vadd.xlane.f32.xlu1 %v1070_v22  ;;  %v1068_v54 = vmul.f32 %v6159_v53, %v6159_v53  ;;  %v1069_v55 = vmul.f32 %v6162_v21, %v6162_v21  ;;  %v4699_v60 = vcombine.high %v1196_v23, %v1200_v25  ;;  %v4698_v63 = vcombine.low %v1196_v23, %v1200_v25  ;;  %v1155_v46 = vld [vmem:[%s6022_s0 + $0x138] sm:$0xff] }
 0x23c   : > { %v4624_v22 = vcombine.low %v1119_v49, %v1123_v51  ;;  %v1040_v23 = vlaneseq }
 0x23d   : > { %v1073_v56 = vadd.f32 %v1069_v55, %v1068_v54  ;;  %1906 = vmatprep.subr.bf16.mxu0 %v4699_v60  ;;  %v4625_v54 = vcombine.high %v1119_v49, %v1123_v51  ;;  %v4655_v51 = vcombine.high %v1150_v43, %v1154_v44 }
 0x23e   : > { %1907 = vmatpush1.bf16.msra.mxu0 %v4698_v63  ;;  %v6197_v60 = vshrl.u32 %v1040_v23, 7  ;;  %v1051_v63 = vld [vmem:[%s924_s7] sm:$0x3] }
 0x23f   : > { %1074 = vadd.xlane.f32.xlu1 %v1073_v56  ;;  %1908 = vmatprep.subr.bf16.mxu0 %v4707_v4 }
 0x240   : > { %2015 = vmatprep.subr.bf16.mxu1 %v4625_v54  ;;  %v6200_v61 = vsub.s32 1, %v6197_v60  ;;  %v6203_v62 = vsub.s32 0, %v6197_v60  ;;  %v1162_v54 = vld [vmem:[%s6022_s0 + $0x170] sm:$0xff] }
 0x242   : > { %1909 = vmatpush1.bf16.msra.mxu0 %v4706_v7  ;;  %v1094_v4 = vrot.slane %v1051_v63, %v6200_v61  ;;  %v1090_v5 = vrot.slane %v1051_v63, %v6203_v62  ;;  %v1109_v7 = vrot.slane %v1052_v3, %v6200_v61  ;;  %v1166_v63 = vld [vmem:[%s6022_s0 + $0x190] sm:$0xff] }
 0x243   : > { %1910 = vmatprep.subr.bf16.mxu0 %v4715_v12 }
 0x246   : > { %1911 = vmatpush1.bf16.msra.mxu0 %v4714_v15 }
 0x247   : > { %1912 = vmatprep.subr.bf16.mxu0 %v4723_v20  ;;  %v1131_v20 = vld [vmem:[%s6022_s0 + $0x78] sm:$0xff] }
 0x24a   : > { %1913 = vmatpush1.bf16.msra.mxu0 %v4722_v27  ;;  %v4633_v27 = vcombine.high %v1127_v19, %v1131_v20 }
 0x24b   : > { %1914 = vmatprep.subr.bf16.mxu0 %v4731_v32  ;;  %v4632_v32 = vcombine.low %v1127_v19, %v1131_v20 }
 0x24e   : > { %1915 = vmatpush1.bf16.msra.mxu0 %v4730_v35  ;;  %v1142_v35 = vld [vmem:[%s6022_s0 + $0xd0] sm:$0xff] }
 0x24f   : > { %1916 = vmatprep.subr.bf16.mxu0 %v4739_v40  ;;  %v4640_v40 = vcombine.low %v1135_v29, %v1139_v30  ;;  %v4647_v41 = vcombine.high %v1142_v35, %v1146_v36  ;;  %v4646_v49 = vcombine.low %v1142_v35, %v1146_v36  ;;  %v1203_v35 = vld [vmem:[%s6022_s0 + $0x2b8] sm:$0xff] }
 0x252   : > { %1917 = vmatpush1.bf16.msra.mxu0 %v4738_v42  ;;  %v4649_v42 = vcombine.high %v1143_v37, %v1147_v38 }
 0x253   : > { %1972 = vmatprep.subr.bf16.mxu0 %v4623_v50  ;;  %v4648_v50 = vcombine.low %v1143_v37, %v1147_v38 }
 0x2c8   : > { %v1072_v55 = vpop.xlane.xlu1 %1071 }
 0x2c9   : > { %v1076_v56 = vmul.f32 0.00390625, %v1072_v55  ;;  %v1159_v55 = vld [vmem:[%s6022_s0 + $0x158] sm:$0xff] }
 0x2cb   : > { %v1078_v57 = vadd.f32 1e-05, %v1076_v56  ;;  %v1163_v56 = vld [vmem:[%s6022_s0 + $0x178] sm:$0xff] }
 0x2cc   : > { %v1075_v58 = vpop.xlane.xlu1 %1074 }
 0x2cd   : > { %5367 = vrsqrt.f32 %v1078_v57  ;;  %v1077_v25 = vmul.f32 0.00390625, %v1075_v58  ;;  %v4654_v57 = vcombine.low %v1150_v43, %v1154_v44  ;;  %v4656_v58 = vcombine.low %v1151_v45, %v1155_v46  ;;  %v1211_v43 = vld [vmem:[%s6022_s0 + $0x2f8] sm:$0xff] }
 0x2cf   : > { %v1079_v59 = vadd.f32 1e-05, %v1077_v25 }
 0x2d1   : > { %5369 = vrsqrt.f32 %v1079_v59  ;;  %v4665_v59 = vcombine.high %v1159_v55, %v1163_v56 }
 0x2d7   : > { %v5368_v0 = vpop.eup %5367 }
 0x2d8   : > { %v1082_v1 = vmul.f32 %v5368_v0, %v6149_v47  ;;  %v1083_v2 = vmul.f32 %v5368_v0, %v6152_v48  ;;  %v1105_v47 = vrot.slane %v1052_v3, %v6203_v62  ;;  %v1170_v0 = vld [vmem:[%s6022_s0 + $0x1b0] sm:$0xff] }
 0x2da   : > { %v1098_v9 = vmul.f32 %v1094_v4, %v1083_v2  ;;  %v1097_v10 = vmul.f32 %v1090_v5, %v1082_v1  ;;  %v1167_v1 = vld [vmem:[%s6022_s0 + $0x198] sm:$0xff] }
 0x2db   : > { %v5370_v6 = vpop.eup %5369  ;;  %v1171_v2 = vld [vmem:[%s6022_s0 + $0x1b8] sm:$0xff] }
 0x2dc   : > { %v1084_v48 = vmul.f32 %v5370_v6, %v6159_v53  ;;  %v1085_v8 = vmul.f32 %v5370_v6, %v6162_v21  ;;  %v1113_v13 = vadd.f32 %v1109_v7, %v1098_v9  ;;  %v1112_v15 = vadd.f32 %v1105_v47, %v1097_v10 }
 0x2dd   : > { %v4631_v21 = vcombine.high %v1126_v17, %v1130_v18  ;;  %v4673_v6 = vcombine.high %v1167_v1, %v1171_v2  ;;  %v4670_v9 = vcombine.low %v1166_v63, %v1170_v0  ;;  %v4672_v10 = vcombine.low %v1167_v1, %v1171_v2 }
 0x2de   : > { %v1100_v11 = vmul.f32 %v1094_v4, %v1085_v8  ;;  %v1099_v12 = vmul.f32 %v1090_v5, %v1084_v48  ;;  %v4664_v4 = vcombine.low %v1159_v55, %v1163_v56  ;;  %v4671_v5 = vcombine.high %v1166_v63, %v1170_v0  ;;  %v1175_v48 = vld [vmem:[%s6022_s0 + $0x1d8] sm:$0xff] }
 0x2df   : > { %v1179_v8 = vld [vmem:[%s6022_s0 + $0x1f8] sm:$0xff] }
 0x2e0   : > { %v1115_v14 = vadd.f32 %v1109_v7, %v1100_v11  ;;  %v1114_v16 = vadd.f32 %v1105_v47, %v1099_v12  ;;  %v1174_v7 = vld [vmem:[%s6022_s0 + $0x1d0] sm:$0xff]  ;;  %v4681_v12 = vcombine.high %v1175_v48, %v1179_v8  ;;  %v4680_v18 = vcombine.low %v1175_v48, %v1179_v8  ;;  %v1227_v63 = vld [vmem:[%s6022_s0 + $0x378] sm:$0xff] }
 0x2e1   : > { %v1178_v47 = vld [vmem:[%s6022_s0 + $0x1f0] sm:$0xff] }
 0x2e2   : > { %v1245_v24 = vpack.c.bf16 %v1115_v14, %v1113_v13  ;;  %v6227_v53 = vpack.c.bf16 %v1114_v16, %v1112_v15  ;;  %v4679_v11 = vcombine.high %v1174_v7, %v1178_v47  ;;  %v1182_v13 = vld [vmem:[%s6022_s0 + $0x210] sm:$0xff]  ;;  %v1183_v15 = vld [vmem:[%s6022_s0 + $0x218] sm:$0xff]  ;;  %v4678_v17 = vcombine.low %v1174_v7, %v1178_v47 }
 0x2e3   : > { %v1186_v14 = vld [vmem:[%s6022_s0 + $0x230] sm:$0xff]  ;;  %v1187_v16 = vld [vmem:[%s6022_s0 + $0x238] sm:$0xff] }
 0x2e4   : > { %1918 = vmatprep.mubr.bf16.mxu0 %v1245_v24  ;;  %1961 = vmatprep.mubr.bf16.mxu1 %v1245_v24  ;;  %v4687_v19 = vcombine.high %v1182_v13, %v1186_v14  ;;  %v4689_v20 = vcombine.high %v1183_v15, %v1187_v16  ;;  %v4686_v28 = vcombine.low %v1182_v13, %v1186_v14  ;;  %v1235_v7 = vld [vmem:[%s6022_s0 + $0x3b8] sm:$0xff] }
 0x2e5   : > { %1919 = vmatmul.mubr.bf16.vlgmr.msra.gmra.mrb[0].mxu0 %v6227_v53  ;;  %1962 = vmatmul.mubr.bf16.vlgmr.msra.gmra.mrb[0].mxu1 %v6227_v53  ;;  %v4688_v29 = vcombine.low %v1183_v15, %v1187_v16  ;;  %v1243_v13 = vld [vmem:[%s6022_s0 + $0x3f8] sm:$0xff] }
 0x2e6   : > { %1973 = vmatpush1.bf16.msra.mxu0 %v4622_v52  ;;  %2016 = vmatpush1.bf16.msra.mxu1 %v4624_v22  ;;  %v4657_v52 = vcombine.high %v1151_v45, %v1155_v46  ;;  %v1158_v22 = vld [vmem:[%s6022_s0 + $0x150] sm:$0xff] }
 0x2e7   : > { %2004 = vmatprep.mubr.bf16.mxu0 %v1245_v24  ;;  %2047 = vmatprep.mubr.bf16.mxu1 %v1245_v24  ;;  %v4663_v25 = vcombine.high %v1158_v22, %v1162_v54  ;;  %v4662_v3 = vcombine.low %v1158_v22, %v1162_v54  ;;  %v1190_v24 = vld [vmem:[%s6022_s0 + $0x250] sm:$0xff]  ;;  %v1219_v22 = vld [vmem:[%s6022_s0 + $0x338] sm:$0xff] }
 0x2e8   : > { %1974 = vmatprep.subr.bf16.mxu0 %v4631_v21  ;;  %2017 = vmatprep.subr.bf16.mxu1 %v4633_v27  ;;  %v1191_v21 = vld [vmem:[%s6022_s0 + $0x258] sm:$0xff]  ;;  %v4695_v30 = vcombine.high %v1190_v24, %v1194_v26  ;;  %v4694_v36 = vcombine.low %v1190_v24, %v1194_v26 }
 0x2e9   : > { %v1195_v27 = vld [vmem:[%s6022_s0 + $0x278] sm:$0xff] }
 0x2ea   : > { %1975 = vmatpush1.bf16.msra.mxu0 %v4630_v31  ;;  %2018 = vmatpush1.bf16.msra.mxu1 %v4632_v32  ;;  %v4697_v31 = vcombine.high %v1191_v21, %v1195_v27  ;;  %v1198_v32 = vld [vmem:[%s6022_s0 + $0x290] sm:$0xff]  ;;  %v4696_v37 = vcombine.low %v1191_v21, %v1195_v27 }
 0x2eb   : > { %1976 = vmatprep.subr.bf16.mxu0 %v4639_v33  ;;  %2019 = vmatprep.subr.bf16.mxu1 %v4641_v34  ;;  %v1202_v33 = vld [vmem:[%s6022_s0 + $0x2b0] sm:$0xff]  ;;  %v1199_v34 = vld [vmem:[%s6022_s0 + $0x298] sm:$0xff] }
 0x2ec   : > { %v4703_v38 = vcombine.high %v1198_v32, %v1202_v33  ;;  %v4702_v44 = vcombine.low %v1198_v32, %v1202_v33  ;;  %v4704_v45 = vcombine.low %v1199_v34, %v1203_v35 }
 0x2ee   : > { %1977 = vmatpush1.bf16.msra.mxu0 %v4638_v39  ;;  %2020 = vmatpush1.bf16.msra.mxu1 %v4640_v40  ;;  %v4705_v39 = vcombine.high %v1199_v34, %v1203_v35  ;;  %v1206_v40 = vld [vmem:[%s6022_s0 + $0x2d0] sm:$0xff] }
 0x2ef   : > { %1978 = vmatprep.subr.bf16.mxu0 %v4647_v41  ;;  %2021 = vmatprep.subr.bf16.mxu1 %v4649_v42  ;;  %v1210_v41 = vld [vmem:[%s6022_s0 + $0x2f0] sm:$0xff]  ;;  %v1207_v42 = vld [vmem:[%s6022_s0 + $0x2d8] sm:$0xff] }
 0x2f0   : > { %v4711_v46 = vcombine.high %v1206_v40, %v1210_v41  ;;  %v4710_v54 = vcombine.low %v1206_v40, %v1210_v41  ;;  %v4712_v55 = vcombine.low %v1207_v42, %v1211_v43  ;;  %v5688_v40 = vmov 0.0  }
 0x2f2   : > { %1979 = vmatpush1.bf16.msra.mxu0 %v4646_v49  ;;  %2022 = vmatpush1.bf16.msra.mxu1 %v4648_v50  ;;  %v4713_v49 = vcombine.high %v1207_v42, %v1211_v43  ;;  %v1214_v50 = vld [vmem:[%s6022_s0 + $0x310] sm:$0xff]  ;;  %v1048_v43 = vld [vmem:[%s6984_s3] sm:$0xff] }
 0x2f3   : > { %1980 = vmatprep.subr.bf16.mxu0 %v4655_v51  ;;  %2023 = vmatprep.subr.bf16.mxu1 %v4657_v52  ;;  %v1218_v51 = vld [vmem:[%s6022_s0 + $0x330] sm:$0xff]  ;;  %v1215_v52 = vld [vmem:[%s6022_s0 + $0x318] sm:$0xff] }
 0x2f4   : > { %v4719_v56 = vcombine.high %v1214_v50, %v1218_v51  ;;  %v4718_v0 = vcombine.low %v1214_v50, %v1218_v51  ;;  %v4720_v1 = vcombine.low %v1215_v52, %v1219_v22 }
 0x2f6   : > { %1981 = vmatpush1.bf16.msra.mxu0 %v4654_v57  ;;  %2024 = vmatpush1.bf16.msra.mxu1 %v4656_v58  ;;  %v4721_v57 = vcombine.high %v1215_v52, %v1219_v22  ;;  %v1222_v58 = vld [vmem:[%s6022_s0 + $0x350] sm:$0xff] }
 0x2f7   : > { %1982 = vmatprep.subr.bf16.mxu0 %v4663_v25  ;;  %2025 = vmatprep.subr.bf16.mxu1 %v4665_v59  ;;  %v1226_v25 = vld [vmem:[%s6022_s0 + $0x370] sm:$0xff]  ;;  %v1223_v59 = vld [vmem:[%s6022_s0 + $0x358] sm:$0xff] }
 0x2f8   : > { %v4727_v2 = vcombine.high %v1222_v58, %v1226_v25  ;;  %v4726_v47 = vcombine.low %v1222_v58, %v1226_v25  ;;  %v4728_v48 = vcombine.low %v1223_v59, %v1227_v63 }
 0x2fa   : > { %1983 = vmatpush1.bf16.msra.mxu0 %v4662_v3  ;;  %2026 = vmatpush1.bf16.msra.mxu1 %v4664_v4  ;;  %v4729_v3 = vcombine.high %v1223_v59, %v1227_v63  ;;  %v1230_v4 = vld [vmem:[%s6022_s0 + $0x390] sm:$0xff] }
 0x2fb   : > { %1984 = vmatprep.subr.bf16.mxu0 %v4671_v5  ;;  %2027 = vmatprep.subr.bf16.mxu1 %v4673_v6  ;;  %v1234_v5 = vld [vmem:[%s6022_s0 + $0x3b0] sm:$0xff]  ;;  %v1231_v6 = vld [vmem:[%s6022_s0 + $0x398] sm:$0xff] }
 0x2fc   : > { %v4735_v8 = vcombine.high %v1230_v4, %v1234_v5  ;;  %v4734_v14 = vcombine.low %v1230_v4, %v1234_v5  ;;  %v4736_v15 = vcombine.low %v1231_v6, %v1235_v7 }
 0x2fe   : > { %1985 = vmatpush1.bf16.msra.mxu0 %v4670_v9  ;;  %2028 = vmatpush1.bf16.msra.mxu1 %v4672_v10  ;;  %v4737_v9 = vcombine.high %v1231_v6, %v1235_v7  ;;  %v1238_v10 = vld [vmem:[%s6022_s0 + $0x3d0] sm:$0xff] }
 0x2ff   : > { %1986 = vmatprep.subr.bf16.mxu0 %v4679_v11  ;;  %2029 = vmatprep.subr.bf16.mxu1 %v4681_v12  ;;  %v1242_v11 = vld [vmem:[%s6022_s0 + $0x3f0] sm:$0xff]  ;;  %v1239_v12 = vld [vmem:[%s6022_s0 + $0x3d8] sm:$0xff]  ;;  %s6988_s0 = sld [smem:[#allocation39_spill]] (!%p4914_p6) }
 0x300   : > { %v4743_v16 = vcombine.high %v1238_v10, %v1242_v11 }
 0x302   : > { %1987 = vmatpush1.bf16.msra.mxu0 %v4678_v17  ;;  %2030 = vmatpush1.bf16.msra.mxu1 %v4680_v18  ;;  %v4745_v17 = vcombine.high %v1239_v12, %v1243_v13  ;;  %v4742_v18 = vcombine.low %v1238_v10, %v1242_v11 }
 0x303   : > { %1988 = vmatprep.subr.bf16.mxu0 %v4687_v19  ;;  %2031 = vmatprep.subr.bf16.mxu1 %v4689_v20  ;;  %v4744_v19 = vcombine.low %v1239_v12, %v1243_v13  ;;  %v1045_v20 = vcvt.s32.f32 %v6197_v60 }
 0x305   : > { %v4617_v24 = vadd.f32 -3.5, %v1045_v20 }
 0x306   : > { %1989 = vmatpush1.bf16.msra.mxu0 %v4686_v28  ;;  %2032 = vmatpush1.bf16.msra.mxu1 %v4688_v29  ;;  %v1049_v29 = vld [vmem:[%s6981_s23] sm:$0xff] }
 0x307   : > { %1990 = vmatprep.subr.bf16.mxu0 %v4695_v30  ;;  %2033 = vmatprep.subr.bf16.mxu1 %v4697_v31  ;;  %v2328_v26 = vmul.f32 0.001955035, %v4617_v24  ;;  %v2325_v21 = vmul.f32 -0.001955035, %v4617_v24  ;;  %v1047_v30 = vld [vmem:[%s6982_s20] sm:$0xff]  ;;  %s6987_s20 = sld [smem:[#allocation38_spill]] (!%p4914_p6) }
 0x308   : > { %v2089_v35 = vmul.f32 0.031748697, %v4617_v24 }
 0x309   : > { %v2329_v27 = vmul.f32 1.442695, %v2328_v26  ;;  %v2326_v28 = vmul.f32 1.442695, %v2325_v21 }
 0x30a   : > { %1991 = vmatpush1.bf16.msra.mxu0 %v4694_v36  ;;  %2034 = vmatpush1.bf16.msra.mxu1 %v4696_v37  ;;  %v2090_v37 = vmul.f32 1.442695, %v2089_v35 }
 0x30b   : > { %1992 = vmatprep.subr.bf16.mxu0 %v4703_v38  ;;  %2035 = vmatprep.subr.bf16.mxu1 %v4705_v39  ;;  %5371 = vpow2.f32 %v2329_v27  ;;  %v1050_v38 = vld [vmem:[%s6983_s15] sm:$0xff] }
 0x30c   : > { %5373 = vpow2.f32 %v2326_v28 }
 0x30e   : > { %1993 = vmatpush1.bf16.msra.mxu0 %v4702_v44  ;;  %2036 = vmatpush1.bf16.msra.mxu1 %v4704_v45 }
 0x30f   : > { %1994 = vmatprep.subr.bf16.mxu0 %v4711_v46  ;;  %2037 = vmatprep.subr.bf16.mxu1 %v4713_v49 }
 0x312   : > { %1995 = vmatpush1.bf16.msra.mxu0 %v4710_v54  ;;  %2038 = vmatpush1.bf16.msra.mxu1 %v4712_v55 }
 0x313   : > { %1996 = vmatprep.subr.bf16.mxu0 %v4719_v56  ;;  %2039 = vmatprep.subr.bf16.mxu1 %v4721_v57 }
 0x315   : > { %v5372_v31 = vpop.eup %5371 }
 0x316   : > { %1997 = vmatpush1.bf16.msra.mxu0 %v4718_v0  ;;  %2040 = vmatpush1.bf16.msra.mxu1 %v4720_v1  ;;  %v5374_v32 = vpop.eup %5373  ;;  %v2333_v33 = vmul.f32 %v5372_v31, %v1049_v29  ;;  %v6299_v39 = vmul.f32 %v5372_v31, %v1050_v38 }
 0x317   : > { %1998 = vmatprep.subr.bf16.mxu0 %v4727_v2  ;;  %2041 = vmatprep.subr.bf16.mxu1 %v4729_v3  ;;  %v2331_v34 = vmul.f32 %v5374_v32, %v1047_v30  ;;  %v6305_v44 = vmul.f32 %v5374_v32, %v1048_v43 }
 0x31a   : > { %1999 = vmatpush1.bf16.msra.mxu0 %v4726_v47  ;;  %2042 = vmatpush1.bf16.msra.mxu1 %v4728_v48 }
 0x31b   : > { %2000 = vmatprep.subr.bf16.mxu0 %v4735_v8  ;;  %2043 = vmatprep.subr.bf16.mxu1 %v4737_v9 }
 0x31e   : > { %2001 = vmatpush1.bf16.msra.mxu0 %v4734_v14  ;;  %2044 = vmatpush1.bf16.msra.mxu1 %v4736_v15 }
 0x31f   : > { %2002 = vmatprep.subr.bf16.mxu0 %v4743_v16  ;;  %2045 = vmatprep.subr.bf16.mxu1 %v4745_v17 }
 0x322   : > { %2003 = vmatpush1.bf16.msra.mxu0 %v4742_v18  ;;  %2046 = vmatpush1.bf16.msra.mxu1 %v4744_v19 }
 0x323   : > { %4978 = vmatprep.subr.bf16.mxu0 %v5688_v40 }
 0x325   : > { %2005 = vmatmul.mubr.bf16.vlgmr.msra.gmra.mrb[4].mxu0 %v6227_v53  ;;  %2048 = vmatmul.mubr.bf16.vlgmr.msra.gmra.mrb[4].mxu1 %v6227_v53  ;;  %v2086_v53 = vmul.f32 -0.031748697, %v4617_v24 }
 0x326   : > { %4980 = vmatprep.mubr.msk.bf16.mxu0 %vm5690_vm1, %v5688_v40 }
 0x327   : > { %v2087_v36 = vmul.f32 1.442695, %v2086_v53 }
 0x329   : > { %5375 = vpow2.f32 %v2087_v36 }
 0x32a   : > { %5377 = vpow2.f32 %v2090_v37 }
 0x333   : > { %v5376_v41 = vpop.eup %5375 }
 0x334   : > { %v5378_v42 = vpop.eup %5377  ;;  %v2092_v49 = vmul.f32 %v5376_v41, %v1047_v30  ;;  %v2093_v15 = vmul.f32 %v5376_v41, %v1048_v43 }
 0x335   : > { %v2094_v50 = vmul.f32 %v5378_v42, %v1049_v29  ;;  %v2095_v13 = vmul.f32 %v5378_v42, %v1050_v38 }
 0x3b8   : > { %v1920_v45 = vpop.f32.mrb[0].mxu0  ;;  %v1963_v46 = vpop.f32.mrb[0].mxu1 }
 0x3b9   : > { %2102 = vrot.lane.b32.xlu0 %v1963_v46, %s5689_s29  ;;  %v1965_v51 = vpop.f32.mrb[1].mxu1  ;;  %2097 = vrot.lane.b32.xlu1 %v1920_v45, %s5689_s29  ;;  %v1922_v52 = vpop.f32.mrb[1].mxu0  ;;  %v2101_v17 = vmul.f32 %v2094_v50, %v1963_v46  ;;  %v2096_v29 = vmul.f32 %v2092_v49, %v1920_v45 }
 0x3ba   : > { %v2340_v22 = vmul.f32 %v2333_v33, %v1965_v51  ;;  %v6307_v54 = vmul.f32 %v2331_v34, %v1922_v52  ;;  %v1924_v55 = vpop.f32.mrb[2].mxu0  ;;  %v1967_v56 = vpop.f32.mrb[2].mxu1 }
 0x3bb   : > { %v2212_v57 = vmul.f32 %v2092_v49, %v1924_v55  ;;  %v2217_v58 = vmul.f32 %v2094_v50, %v1967_v56  ;;  %v1926_v25 = vpop.f32.mrb[3].mxu0  ;;  %v1969_v59 = vpop.f32.mrb[3].mxu1 }
 0x3bc   : > { %v2448_v63 = vmul.f32 %v2331_v34, %v1926_v25  ;;  %v2453_v0 = vmul.f32 %v2333_v33, %v1969_v59 }
 0x3bd   : > { %2341 = vrot.lane.b32.xlu0 %v1965_v51, %s5689_s29  ;;  %2218 = vrot.lane.b32.xlu1 %v1967_v56, %s5689_s29  ;;  %v6339_v51 = vand.u32 127, %v1040_v23 }
 0x3bf   : > { %vm1044_vm3 = vcmp.ge.s32.totalorder %v6197_v60, %v6339_v51  ;;  %v5132_v51 = vld [vmem:[%s6029_s6 + $0x14] ss:$8 sps:$4 sm:$0xff]  }
 0x3c1   : > { %2454 = vrot.lane.b32.xlu0 %v1969_v59, %s5689_s29  ;;  %2213 = vrot.lane.b32.xlu1 %v1924_v55, %s5689_s29 }
 0x3c5   : > { %2336 = vrot.lane.b32.xlu1 %v1922_v52, %s5689_s29 }
 0x3c9   : > { %2449 = vrot.lane.b32.xlu1 %v1926_v25, %s5689_s29 }
 0x3f8   : > { %v2006_v1 = vpop.f32.mrb[4].mxu0  ;;  %v6311_v2 = vpop.f32.mrb[4].mxu1 }
 0x3f9   : > { %v2008_v3 = vpop.f32.mrb[5].mxu0  ;;  %v6313_v4 = vpop.f32.mrb[5].mxu1  ;;  %v2150_v36 = vpack.c.bf16 %v2006_v1, %v2006_v1 }
 0x3fa   : > { %v2389_v5 = vpack.c.bf16 %v2008_v3, %v2008_v3  ;;  %v2010_v6 = vpop.f32.mrb[6].mxu0  ;;  %v6315_v7 = vpop.f32.mrb[6].mxu1 }
 0x3fb   : > { %v2266_v47 = vpack.c.bf16 %v2010_v6, %v2010_v6  ;;  %v2012_v48 = vpop.f32.mrb[7].mxu0  ;;  %v6317_v8 = vpop.f32.mrb[7].mxu1  ;;  %v2157_v45 = vsel %vm2155_vm2, %v2150_v36, 0 }
 0x3fc   : > { %v6320_v9 = vsel %vm2155_vm2, %v2389_v5, 0  ;;  %v2502_v10 = vpack.c.bf16 %v2012_v48, %v2012_v48 }
 0x3fd   : > { %v2271_v11 = vsel %vm2155_vm2, %v2266_v47, 0 }
 0x3fe   : > { %v6324_v12 = vsel %vm2155_vm2, %v2502_v10, 0 }
 0x42b   : > { %v2103_v14 = vpop.permute.xlu0 %2102  ;;  %v2098_v16 = vpop.permute.xlu1 %2097 }
 0x42c   : > { %v2104_v18 = vmul.f32 %v2103_v14, %v2095_v13  ;;  %v2099_v20 = vmul.f32 %v2098_v16, %v2093_v15 }
 0x42e   : > { %v2105_v19 = vadd.f32 %v2104_v18, %v2101_v17  ;;  %v2100_v32 = vadd.f32 %v2099_v20, %v2096_v29 }
 0x42f   : > { %v2342_v24 = vpop.permute.xlu0 %2341  ;;  %v2219_v26 = vpop.permute.xlu1 %2218 }
 0x430   : > { %v2107_v21 = vpack.c.bf16 %v2105_v19, %v2105_v19  ;;  %v2343_v27 = vmul.f32 %v2342_v24, %v6299_v39  ;;  %v2220_v28 = vmul.f32 %v2219_v26, %v2095_v13  ;;  %v2106_v41 = vpack.c.bf16 %v2100_v32, %v2100_v32 }
 0x432   : > { %v2344_v30 = vadd.f32 %v2343_v27, %v2340_v22  ;;  %v2221_v31 = vadd.f32 %v2220_v28, %v2217_v58  ;;  %4979 = vmatpush3.bf16.xpose.msra.mxu0 %v2107_v21 }
 0x433   : > { %v2455_v33 = vpop.permute.xlu0 %2454  ;;  %v2214_v34 = vpop.permute.xlu1 %2213  ;;  %4984 = vmatprep.subr.bf16.mxu0 %v5688_v40 }
 0x434   : > { %v2456_v53 = vmul.f32 %v2455_v33, %v6299_v39  ;;  %v2215_v35 = vmul.f32 %v2214_v34, %v2093_v15  ;;  %v2346_v47 = vpack.c.bf16 %v2344_v30, %v2344_v30 }
 0x436   : > { %v6329_v37 = vadd.f32 %v2456_v53, %v2453_v0  ;;  %v2216_v38 = vadd.f32 %v2215_v35, %v2212_v57  ;;  %v2223_v57 = vpack.c.bf16 %v2221_v31, %v2221_v31 }
 0x437   : > { %v2337_v42 = vpop.permute.xlu1 %2336 }
 0x438   : > { %v2338_v43 = vmul.f32 %v2337_v42, %v6305_v44  ;;  %v2222_v23 = vpack.c.bf16 %v2216_v38, %v2216_v38 }
 0x439   : > { %4981 = vmatmul.mubr.bf16.vlgmr.msra.gmra.mrb[8].mxu0 %v2106_v41 }
 0x43a   : > { %v2339_v46 = vadd.f32 %v2338_v43, %v6307_v54  ;;  %4985 = vmatpush3.bf16.msra.mxu0 %v2157_v45  ;;  %4986 = vmatprep.mubr.msk.bf16.mxu0 %vm5690_vm1, %v5688_v40 }
 0x43b   : > { %v2450_v49 = vpop.permute.xlu1 %2449  ;;  %4990 = vmatprep.subr.bf16.mxu0 %v5688_v40 }
 0x43c   : > { %v2451_v39 = vmul.f32 %v2450_v49, %v6305_v44  ;;  %v2345_v10 = vpack.c.bf16 %v2339_v46, %v2339_v46 }
 0x43e   : > { %v2452_v50 = vadd.f32 %v2451_v39, %v2448_v63  ;;  %v5127_v39 = vld [vmem:[%s6029_s6] ss:$8 sps:$4 sm:$0xff]  }
 0x440   : > { %v2458_v26 = vpack.c.bf16 %v2452_v50, %v2452_v50  ;;  %v5129_v50 = vld [vmem:[%s6029_s6 + $0x4] ss:$8 sps:$4 sm:$0xff]  }
 0x50c   : > { %v2142_v52 = vpop.f32.mrb[8].mxu0 }
 0x50d   : > { %v2148_v22 = vsel %vm1044_vm3, %v2142_v52, 0.0  ;;  %v4982_v54 = vpop.f32.mrb[9].mxu0  ;;  %v5130_v52 = vld [vmem:[%s6029_s6 + $0x10] ss:$8 sps:$4 sm:$0xff]  }
 0x50e   : > { %v2149_v55 = vpack.c.bf16 %v2148_v22, %v2148_v22  ;;  %v2145_v56 = vpop.f32.mrb[10].mxu0  ;;  %v5135_v22 = vld [vmem:[%s6029_s6 + $0x24] ss:$8 sps:$4 sm:$0xff]   ;;  %v5133_v54 = vld [vmem:[%s6029_s6 + $0x20] ss:$8 sps:$4 sm:$0xff]  }
 0x50f   : > { %v4983_v58 = vpop.f32.mrb[11].mxu0  ;;  %v5136_v56 = vld [vmem:[%s6029_s6 + $0x30] ss:$8 sps:$4 sm:$0xff]  }
 0x510   : > { %4987 = vmatmul.mubr.msk.bf16.vlgmr.msra.gmra.mrb[12].mxu0 %vm2151_vm4, %v2149_v55  ;;  %v5138_v55 = vld [vmem:[%s6029_s6 + $0x34] ss:$8 sps:$4 sm:$0xff]   ;;  %v5139_v58 = vld [vmem:[%s6029_s6 + $0x40] ss:$8 sps:$4 sm:$0xff]  }
 0x511   : > { %4991 = vmatpush3.bf16.xpose.msra.mxu0 %v2223_v57  ;;  %4992 = vmatprep.mubr.msk.bf16.mxu0 %vm5690_vm1, %v5688_v40  ;;  %v5141_v57 = vld [vmem:[%s6029_s6 + $0x44] ss:$8 sps:$4 sm:$0xff]  }
 0x512   : > { %4996 = vmatprep.subr.bf16.mxu0 %v5688_v40 }
 0x518   : > { %4993 = vmatmul.mubr.bf16.vlgmr.msra.gmra.mrb[16].mxu0 %v2222_v23  ;;  %v5144_v23 = vld [vmem:[%s6029_s6 + $0x54] ss:$8 sps:$4 sm:$0xff]  }
 0x519   : > { %4997 = vmatpush3.bf16.msra.mxu0 %v2271_v11  ;;  %4998 = vmatprep.mubr.msk.bf16.mxu0 %vm5690_vm1, %v5688_v40 }
 0x51a   : > { %5002 = vmatprep.subr.bf16.mxu0 %v5688_v40 }
 0x5e3   : > { %v2193_v44 = vpop.f32.mrb[12].mxu0 }
 0x5e4   : > { %v4988_v25 = vpop.f32.mrb[13].mxu0 }
 0x5e5   : > { %v2196_v59 = vpop.f32.mrb[14].mxu0  ;;  %v5147_v25 = vld [vmem:[%s6029_s6 + $0x64] ss:$8 sps:$4 sm:$0xff]  }
 0x5e6   : > { %v4989_v63 = vpop.f32.mrb[15].mxu0  ;;  %v5145_v59 = vld [vmem:[%s6029_s6 + $0x60] ss:$8 sps:$4 sm:$0xff]  }
 0x5e7   : > { %v5150_v63 = vld [vmem:[%s6029_s6 + $0x74] ss:$8 sps:$4 sm:$0xff]  }
 0x5eb   : > { %v2258_v0 = vpop.f32.mrb[16].mxu0 }
 0x5ec   : > { %v2264_v1 = vsel %vm1044_vm3, %v2258_v0, 0.0  ;;  %v4994_v3 = vpop.f32.mrb[17].mxu0  ;;  %v5148_v0 = vld [vmem:[%s6029_s6 + $0x70] ss:$8 sps:$4 sm:$0xff]  }
 0x5ed   : > { %v2265_v5 = vpack.c.bf16 %v2264_v1, %v2264_v1  ;;  %v2261_v6 = vpop.f32.mrb[18].mxu0  ;;  %v5153_v1 = vld [vmem:[%s6029_s6 + $0x84] ss:$8 sps:$4 sm:$0xff]   ;;  %v5151_v3 = vld [vmem:[%s6029_s6 + $0x80] ss:$8 sps:$4 sm:$0xff]  }
 0x5ee   : > { %v4995_v48 = vpop.f32.mrb[19].mxu0 }
 0x5ef   : > { %4999 = vmatmul.mubr.msk.bf16.vlgmr.msra.gmra.mrb[20].mxu0 %vm2151_vm4, %v2265_v5 }
 0x5f0   : > { %5003 = vmatpush3.bf16.xpose.msra.mxu0 %v2346_v47  ;;  %5004 = vmatprep.mubr.msk.bf16.mxu0 %vm5690_vm1, %v5688_v40 }
 0x5f1   : > { %5008 = vmatprep.subr.bf16.mxu0 %v5688_v40 }
 0x5f7   : > { %5005 = vmatmul.mubr.bf16.vlgmr.msra.gmra.mrb[24].mxu0 %v2345_v10 }
 0x5f8   : > { %5009 = vmatpush3.bf16.msra.mxu0 %v6320_v9  ;;  %5010 = vmatprep.mubr.msk.bf16.mxu0 %vm5690_vm1, %v5688_v40  ;;  %v2459_v9 = vpack.c.bf16 %v6329_v37, %v6329_v37 }
 0x5f9   : > { %5014 = vmatprep.subr.bf16.mxu0 %v5688_v40 }
 0x6c2   : > { %v6364_v11 = vpop.f32.mrb[20].mxu0 }
 0x6c3   : > { %v5000_v13 = vpop.f32.mrb[21].mxu0 }
 0x6c4   : > { %v2310_v14 = vpop.f32.mrb[22].mxu0 }
 0x6c5   : > { %v5001_v15 = vpop.f32.mrb[23].mxu0 }
 0x6ca   : > { %v2381_v16 = vpop.f32.mrb[24].mxu0 }
 0x6cb   : > { %v2387_v17 = vsel %vm1044_vm3, %v2381_v16, 0.0  ;;  %v5006_v18 = vpop.f32.mrb[25].mxu0  ;;  %v5156_v16 = vld [vmem:[%s6029_s6 + $0x94] ss:$8 sps:$4 sm:$0xff]  }
 0x6cc   : > { %v2388_v19 = vpack.c.bf16 %v2387_v17, %v2387_v17  ;;  %v2384_v20 = vpop.f32.mrb[26].mxu0  ;;  %v5154_v17 = vld [vmem:[%s6029_s6 + $0x90] ss:$8 sps:$4 sm:$0xff]   ;;  %v5159_v18 = vld [vmem:[%s6029_s6 + $0xa4] ss:$8 sps:$4 sm:$0xff]  }
 0x6cd   : > { %v5007_v24 = vpop.f32.mrb[27].mxu0  ;;  %v5160_v20 = vld [vmem:[%s6029_s6 + $0xb0] ss:$8 sps:$4 sm:$0xff]  }
 0x6ce   : > { %5011 = vmatmul.mubr.msk.bf16.vlgmr.msra.gmra.mrb[28].mxu0 %vm2151_vm4, %v2388_v19  ;;  %v5162_v19 = vld [vmem:[%s6029_s6 + $0xb4] ss:$8 sps:$4 sm:$0xff]   ;;  %v5163_v24 = vld [vmem:[%s6029_s6 + $0xc0] ss:$8 sps:$4 sm:$0xff]  }
 0x6cf   : > { %5015 = vmatpush3.bf16.xpose.msra.mxu0 %v2459_v9  ;;  %5016 = vmatprep.mubr.msk.bf16.mxu0 %vm5690_vm1, %v5688_v40  ;;  %v5165_v9 = vld [vmem:[%s6029_s6 + $0xc4] ss:$8 sps:$4 sm:$0xff]  }
 0x6d0   : > { %5020 = vmatprep.subr.bf16.mxu0 %v5688_v40 }
 0x6d6   : > { %5017 = vmatmul.mubr.bf16.vlgmr.msra.gmra.mrb[32].mxu0 %v2458_v26  ;;  %v5168_v26 = vld [vmem:[%s6029_s6 + $0xd4] ss:$8 sps:$4 sm:$0xff]  }
 0x6d7   : > { %5021 = vmatpush3.bf16.msra.mxu0 %v6324_v12  ;;  %5022 = vmatprep.mubr.msk.bf16.mxu0 %vm5690_vm1, %v5688_v40  ;;  %vm4331_vm1 = vcmask (!%p4914_p6), 261248  }
 0x6d8   : > { %2795 = vmatprep.subr.bf16.mxu0 %v5129_v50 }
 0x7a1   : > { %v2430_v21 = vpop.f32.mrb[28].mxu0 }
 0x7a2   : > { %2436 = vadd.xlane.f32.xlu0 %v2430_v21  ;;  %v5012_v27 = vpop.f32.mrb[29].mxu0 }
 0x7a3   : > { %v2433_v28 = vpop.f32.mrb[30].mxu0  ;;  %v5169_v27 = vld [vmem:[%s6029_s6 + $0xe0] ss:$8 sps:$4 sm:$0xff]  }
 0x7a4   : > { %v5013_v29 = vpop.f32.mrb[31].mxu0  ;;  %v5171_v28 = vld [vmem:[%s6029_s6 + $0xe4] ss:$8 sps:$4 sm:$0xff]  }
 0x7a5   : > { %v5174_v29 = vld [vmem:[%s6029_s6 + $0xf4] ss:$8 sps:$4 sm:$0xff]  }
 0x7a6   : > { %2199 = vadd.xlane.f32.xlu0 %v2193_v44 }
 0x7a9   : > { %v2494_v30 = vpop.f32.mrb[32].mxu0 }
 0x7aa   : > { %v2500_v31 = vsel %vm1044_vm3, %v2494_v30, 0.0  ;;  %2313 = vadd.xlane.f32.xlu0 %v6364_v11  ;;  %v5018_v32 = vpop.f32.mrb[33].mxu0  ;;  %v5172_v30 = vld [vmem:[%s6029_s6 + $0xf0] ss:$8 sps:$4 sm:$0xff]  }
 0x7ab   : > { %v2501_v33 = vpack.c.bf16 %v2500_v31, %v2500_v31  ;;  %v2497_v34 = vpop.f32.mrb[34].mxu0  ;;  %v4747_v32 = vmul.f32 -1.442695, %v6313_v4 }
 0x7ac   : > { %v5019_v12 = vpop.f32.mrb[35].mxu0  ;;  %v4746_v34 = vmul.f32 -1.442695, %v6311_v2 }
 0x7ad   : > { %5023 = vmatmul.mubr.msk.bf16.vlgmr.msra.gmra.mrb[36].mxu0 %vm2151_vm4, %v2501_v33  ;;  %v4749_v33 = vmul.f32 -1.442695, %v6317_v8  ;;  %5379 = vpow2.f32 %v4747_v32 }
 0x7ae   : > { %2796 = vmatpush1.bf16.msra.mxu0 %v5127_v39 }
 0x7af   : > { %2797 = vmatprep.subr.bf16.mxu0 %v5132_v51  ;;  %5381 = vpow2.f32 %v4749_v33 }
 0x7b0   : > { %5383 = vpow2.f32 %v4746_v34 }
 0x7b2   : > { %2798 = vmatpush1.bf16.msra.mxu0 %v5130_v52 }
 0x7b3   : > { %2799 = vmatprep.subr.bf16.mxu0 %v5135_v22 }
 0x7b6   : > { %2800 = vmatpush1.bf16.msra.mxu0 %v5133_v54 }
 0x7b7   : > { %2801 = vmatprep.subr.bf16.mxu0 %v5138_v55 }
 0x7ba   : > { %2802 = vmatpush1.bf16.msra.mxu0 %v5136_v56 }
 0x7bb   : > { %2803 = vmatprep.subr.bf16.mxu0 %v5141_v57 }
 0x7be   : > { %2804 = vmatpush1.bf16.msra.mxu0 %v5139_v58 }
 0x7bf   : > { %2805 = vmatprep.subr.bf16.mxu0 %v5144_v23  ;;  %v2565_v23 = vld [vmem:[%s932_s4] sm:$0x3] }
 0x82f   : > { %v2437_v40 = vpop.xlane.xlu0 %2436 }
 0x830   : > { %v2438_v53 = vmul.f32 0.0078125, %v2437_v40  ;;  %v4748_v40 = vmul.f32 -1.442695, %v6315_v7 }
 0x832   : > { %v6383_v35 = vsub.f32 %v2430_v21, %v2438_v53  ;;  %v5166_v21 = vld [vmem:[%s6029_s6 + $0xd0] ss:$8 sps:$4 sm:$0xff]   ;;  %5385 = vpow2.f32 %v4748_v40  ;;  %v5440_v40 = vld [vmem:[#allocation2 + $0x8] sm:$0xff] }
 0x833   : > { %v2200_v36 = vpop.xlane.xlu0 %2199 }
 0x834   : > { %v2202_v37 = vmul.f32 0.0078125, %v2200_v36  ;;  %v2440_v38 = vmul.f32 %v6383_v35, %v6383_v35 }
 0x836   : > { %v6387_v41 = vsub.f32 %v2193_v44, %v2202_v37  ;;  %2441 = vadd.xlane.f32.xlu0 %v2440_v38  ;;  %v5142_v44 = vld [vmem:[%s6029_s6 + $0x50] ss:$8 sps:$4 sm:$0xff]  }
 0x837   : > { %2806 = vmatpush1.bf16.msra.mxu0 %v5142_v44  ;;  %v2314_v5 = vpop.xlane.xlu0 %2313 }
 0x838   : > { %v2204_v42 = vmul.f32 %v6387_v41, %v6387_v41  ;;  %2807 = vmatprep.subr.bf16.mxu0 %v5147_v25  ;;  %v2315_v47 = vmul.f32 0.0078125, %v2314_v5  ;;  %v2574_v25 = vrot.slane %v2565_v23, %v6200_v61 }
 0x83a   : > { %2205 = vadd.xlane.f32.xlu0 %v2204_v42  ;;  %v6412_v13 = vsub.f32 %v6364_v11, %v2315_v47  ;;  %v5157_v11 = vld [vmem:[%s6029_s6 + $0xa0] ss:$8 sps:$4 sm:$0xff]   ;;  %v5380_v42 = vpop.eup %5379 }
 0x83b   : > { %2808 = vmatpush1.bf16.msra.mxu0 %v5145_v59 }
 0x83c   : > { %2809 = vmatprep.subr.bf16.mxu0 %v5150_v63  ;;  %v2317_v15 = vmul.f32 %v6412_v13, %v6412_v13  ;;  %v2581_v63 = vld [vmem:[%s936_s17] sm:$0x3]  ;;  %s6985_s17 = sld [smem:[#allocation24_spill]] }
 0x83d   : > { %v2590_v5 = vrot.slane %v2581_v63, %v6200_v61 }
 0x83f   : > { %2810 = vmatpush1.bf16.msra.mxu0 %v5148_v0 }
 0x840   : > { %2811 = vmatprep.subr.bf16.mxu0 %v5153_v1  ;;  %v2570_v1 = vrot.slane %v2565_v23, %v6203_v62  ;;  %v5195_v23 = vld [vmem:[%s6035_s2 + $0x64] ss:$16 sps:$4 sm:$0xff]  }
 0x843   : > { %2812 = vmatpush1.bf16.msra.mxu0 %v5151_v3 }
 0x844   : > { %2813 = vmatprep.subr.bf16.mxu0 %v5156_v16 }
 0x847   : > { %2814 = vmatpush1.bf16.msra.mxu0 %v5154_v17 }
 0x848   : > { %2815 = vmatprep.subr.bf16.mxu0 %v5159_v18 }
 0x84b   : > { %2816 = vmatpush1.bf16.msra.mxu0 %v5157_v11 }
 0x84c   : > { %2817 = vmatprep.subr.bf16.mxu0 %v5162_v19 }
 0x84f   : > { %2818 = vmatpush1.bf16.msra.mxu0 %v5160_v20 }
 0x850   : > { %2819 = vmatprep.subr.bf16.mxu0 %v5165_v9 }
 0x853   : > { %2820 = vmatpush1.bf16.msra.mxu0 %v5163_v24 }
 0x854   : > { %2821 = vmatprep.subr.bf16.mxu0 %v5168_v26 }
 0x857   : > { %2822 = vmatpush1.bf16.msra.mxu0 %v5166_v21 }
 0x858   : > { %2823 = vmatprep.subr.bf16.mxu0 %v5171_v28 }
 0x85b   : > { %2824 = vmatpush1.bf16.msra.mxu0 %v5169_v27 }
 0x85c   : > { %2825 = vmatprep.subr.bf16.mxu0 %v5174_v29 }
 0x85f   : > { %2826 = vmatpush1.bf16.msra.mxu0 %v5172_v30 }
 0x880   : > { %v2543_v43 = vpop.f32.mrb[36].mxu0 }
 0x881   : > { %2549 = vadd.xlane.f32.xlu1 %v2543_v43  ;;  %v5024_v45 = vpop.f32.mrb[37].mxu0 }
 0x882   : > { %v2546_v46 = vpop.f32.mrb[38].mxu0 }
 0x883   : > { %v5025_v49 = vpop.f32.mrb[39].mxu0 }
 0x884   : > { %v2071_v49 = vadd.f32 1.0, %v5380_v42 }
 0x8c3   : > { %v2442_v31 = vpop.xlane.xlu0 %2441 }
 0x8c4   : > { %v2443_v12 = vmul.f32 0.0078125, %v2442_v31 }
 0x8c6   : > { %v2444_v36 = vadd.f32 1e-05, %v2443_v12 }
 0x8c7   : > { %v2206_v53 = vpop.xlane.xlu0 %2205 }
 0x8c8   : > { %v2207_v37 = vmul.f32 0.0078125, %v2206_v53  ;;  %5387 = vrsqrt.f32 %v2444_v36  ;;  %v5441_v53 = vld [vmem:[#allocation2 + $0x10] sm:$0xff] }
 0x8ca   : > { %v2208_v38 = vadd.f32 1e-05, %v2207_v37 }
 0x8cc   : > { %5389 = vrsqrt.f32 %v2208_v38  ;;  %v5442_v38 = vld [vmem:[#allocation2 + $0x18] sm:$0xff] }
 0x90e   : > { %v2550_v6 = vpop.xlane.xlu1 %2549 }
 0x90f   : > { %v2551_v48 = vmul.f32 0.0078125, %v2550_v6 }
 0x911   : > { %v6409_v10 = vsub.f32 %v2543_v43, %v2551_v48  ;;  %v5382_v43 = vpop.eup %5381 }
 0x912   : > { %v5384_v39 = vpop.eup %5383  ;;  %v2073_v50 = vadd.f32 1.0, %v5382_v43 }
 0x913   : > { %v2553_v14 = vmul.f32 %v6409_v10, %v6409_v10  ;;  %v5386_v52 = vpop.eup %5385  ;;  %v2070_v55 = vadd.f32 1.0, %v5384_v39  ;;  %v5178_v39 = vld [vmem:[%s6035_s2 + $0x8] ss:$16 sps:$4 sm:$0xff]  }
 0x914   : > { %v5388_v56 = vpop.eup %5387  ;;  %v2072_v57 = vadd.f32 1.0, %v5386_v52  ;;  %v5186_v52 = vld [vmem:[%s6035_s2 + $0x2c] ss:$16 sps:$4 sm:$0xff]  }
 0x915   : > { %2554 = vadd.xlane.f32.xlu1 %v2553_v14  ;;  %v2446_v44 = vmul.f32 %v5388_v56, %v6383_v35  ;;  %v5390_v59 = vpop.eup %5389  ;;  %v5192_v56 = vld [vmem:[%s6035_s2 + $0x4c] ss:$16 sps:$4 sm:$0xff]  }
 0x916   : > { %v2210_v0 = vmul.f32 %v5390_v59, %v6387_v41  ;;  %v5196_v59 = vld [vmem:[%s6035_s2 + $0x68] ss:$16 sps:$4 sm:$0xff]  }
 0x917   : > { %v2578_v3 = vmul.f32 %v2574_v25, %v2446_v44  ;;  %v5198_v44 = vld [vmem:[%s6035_s2 + $0x6c] ss:$16 sps:$4 sm:$0xff]  }
 0x918   : > { %v2577_v17 = vmul.f32 %v2570_v1, %v2210_v0  ;;  %v5204_v0 = vld [vmem:[%s6035_s2 + $0x8c] ss:$16 sps:$4 sm:$0xff]  }
 0x919   : > { %2318 = vadd.xlane.f32.xlu1 %v2317_v15  ;;  %v2586_v15 = vrot.slane %v2581_v63, %v6203_v62  ;;  %v2594_v16 = vadd.f32 %v2590_v5, %v2578_v3  ;;  %v5201_v63 = vld [vmem:[%s6035_s2 + $0x84] ss:$16 sps:$4 sm:$0xff]   ;;  %v5202_v3 = vld [vmem:[%s6035_s2 + $0x88] ss:$16 sps:$4 sm:$0xff]  }
 0x9a2   : > { %v2555_v45 = vpop.xlane.xlu1 %2554 }
 0x9a3   : > { %v2556_v46 = vmul.f32 0.0078125, %v2555_v45 }
 0x9a5   : > { %v2557_v51 = vadd.f32 1e-05, %v2556_v46  ;;  %v5175_v46 = vld [vmem:[%s6035_s2] ss:$16 sps:$4 sm:$0xff]  }
 0x9a6   : > { %v2319_v22 = vpop.xlane.xlu1 %2318 }
 0x9a7   : > { %5391 = vrsqrt.f32 %v2557_v51  ;;  %v2320_v54 = vmul.f32 0.0078125, %v2319_v22  ;;  %v5183_v51 = vld [vmem:[%s6035_s2 + $0x24] ss:$16 sps:$4 sm:$0xff]   ;;  %v5181_v22 = vld [vmem:[%s6035_s2 + $0x20] ss:$16 sps:$4 sm:$0xff]  }
 0x9a8   : > { %5393 = vrcp.f32 %v2071_v49  ;;  %v5177_v49 = vld [vmem:[%s6035_s2 + $0x4] ss:$16 sps:$4 sm:$0xff]  }
 0x9a9   : > { %5395 = vrcp.f32 %v2073_v50  ;;  %v2321_v58 = vadd.f32 1e-05, %v2320_v54  ;;  %v5180_v50 = vld [vmem:[%s6035_s2 + $0xc] ss:$16 sps:$4 sm:$0xff]   ;;  %3310 = vmatprep.subr.bf16.mxu1 %v5177_v49  ;;  %v5184_v54 = vld [vmem:[%s6035_s2 + $0x28] ss:$16 sps:$4 sm:$0xff]  }
 0x9aa   : > { %3353 = vmatprep.subr.bf16.mxu0 %v5180_v50  ;;  %3311 = vmatpush1.bf16.msra.mxu1 %v5175_v46  ;;  %v5238_v46 = vld [vmem:[%s6035_s2 + $0x148] ss:$16 sps:$4 sm:$0xff]   ;;  %v5243_v49 = vld [vmem:[%s6035_s2 + $0x164] ss:$16 sps:$4 sm:$0xff]   ;;  %v5241_v50 = vld [vmem:[%s6035_s2 + $0x160] ss:$16 sps:$4 sm:$0xff]  }
 0x9ab   : > { %5397 = vrsqrt.f32 %v2321_v58  ;;  %3312 = vmatprep.subr.bf16.mxu1 %v5183_v51  ;;  %v5190_v58 = vld [vmem:[%s6035_s2 + $0x48] ss:$16 sps:$4 sm:$0xff]  }
 0x9ac   : > { %5399 = vrcp.f32 %v2070_v55  ;;  %v5189_v55 = vld [vmem:[%s6035_s2 + $0x44] ss:$16 sps:$4 sm:$0xff]   ;;  %v5244_v51 = vld [vmem:[%s6035_s2 + $0x168] ss:$16 sps:$4 sm:$0xff]  }
 0x9ad   : > { %5401 = vrcp.f32 %v2072_v57  ;;  %v5187_v57 = vld [vmem:[%s6035_s2 + $0x40] ss:$16 sps:$4 sm:$0xff]  }
 0x9ae   : > { %3313 = vmatpush1.bf16.msra.mxu1 %v5181_v22  ;;  %v5252_v22 = vld [vmem:[%s6035_s2 + $0x18c] ss:$16 sps:$4 sm:$0xff]  }
 0x9af   : > { %3314 = vmatprep.subr.bf16.mxu1 %v5189_v55  ;;  %v5250_v55 = vld [vmem:[%s6035_s2 + $0x188] ss:$16 sps:$4 sm:$0xff]  }
 0x9b1   : > { %v5392_v6 = vpop.eup %5391 }
 0x9b2   : > { %v5394_v47 = vpop.eup %5393  ;;  %v2559_v35 = vmul.f32 %v5392_v6, %v6409_v10  ;;  %v2593_v10 = vadd.f32 %v2586_v15, %v2577_v17  ;;  %3315 = vmatpush1.bf16.msra.mxu1 %v5187_v57  ;;  %v5210_v6 = vld [vmem:[%s6035_s2 + $0xac] ss:$16 sps:$4 sm:$0xff]   ;;  %v5219_v17 = vld [vmem:[%s6035_s2 + $0xe4] ss:$16 sps:$4 sm:$0xff]  }
 0x9b3   : > { %v5396_v48 = vpop.eup %5395  ;;  %v2083_v19 = vmul.f32 %v5394_v47, %v6313_v4  ;;  %3316 = vmatprep.subr.bf16.mxu1 %v5195_v23  ;;  %v5205_v47 = vld [vmem:[%s6035_s2 + $0xa0] ss:$16 sps:$4 sm:$0xff]   ;;  %v5258_v57 = vld [vmem:[%s6035_s2 + $0x1ac] ss:$16 sps:$4 sm:$0xff]   ;;  %v5256_v23 = vld [vmem:[%s6035_s2 + $0x1a8] ss:$16 sps:$4 sm:$0xff]  }
 0x9b4   : > { %v2580_v14 = vmul.f32 %v2574_v25, %v2559_v35  ;;  %v2085_v41 = vmul.f32 %v5396_v48, %v6317_v8  ;;  %v5193_v25 = vld [vmem:[%s6035_s2 + $0x60] ss:$16 sps:$4 sm:$0xff]   ;;  %v5208_v35 = vld [vmem:[%s6035_s2 + $0xa8] ss:$16 sps:$4 sm:$0xff]   ;;  %v5213_v48 = vld [vmem:[%s6035_s2 + $0xc4] ss:$16 sps:$4 sm:$0xff]  }
 0x9b5   : > { %v5398_v18 = vpop.eup %5397  ;;  %v2598_v26 = vmul.f32 %v2594_v16, %v2083_v19  ;;  %v5214_v16 = vld [vmem:[%s6035_s2 + $0xc8] ss:$16 sps:$4 sm:$0xff]  }
 0x9b6   : > { %v5400_v11 = vpop.eup %5399  ;;  %v2323_v20 = vmul.f32 %v5398_v18, %v6412_v13  ;;  %v2596_v9 = vadd.f32 %v2590_v5, %v2580_v14  ;;  %v5439_v13 = vld [vmem:[#allocation2] sm:$0xff]  ;;  %3317 = vmatpush1.bf16.msra.mxu1 %v5193_v25  ;;  %v5216_v14 = vld [vmem:[%s6035_s2 + $0xcc] ss:$16 sps:$4 sm:$0xff]   ;;  %v5220_v19 = vld [vmem:[%s6035_s2 + $0xe8] ss:$16 sps:$4 sm:$0xff]  }
 0x9b7   : > { %v5402_v24 = vpop.eup %5401  ;;  %v2082_v28 = vmul.f32 %v5400_v11, %v6311_v2  ;;  %3318 = vmatprep.subr.bf16.mxu1 %v5201_v63  ;;  %v5207_v5 = vld [vmem:[%s6035_s2 + $0xa4] ss:$16 sps:$4 sm:$0xff]   ;;  %v5222_v18 = vld [vmem:[%s6035_s2 + $0xec] ss:$16 sps:$4 sm:$0xff]   ;;  %v5217_v11 = vld [vmem:[%s6035_s2 + $0xe0] ss:$16 sps:$4 sm:$0xff]  }
 0x9b8   : > { %v2600_v21 = vmul.f32 %v2596_v9, %v2085_v41  ;;  %v2579_v27 = vmul.f32 %v2570_v1, %v2323_v20  ;;  %v2084_v29 = vmul.f32 %v5402_v24, %v6315_v7  ;;  %v5199_v1 = vld [vmem:[%s6035_s2 + $0x80] ss:$16 sps:$4 sm:$0xff]   ;;  %v5225_v41 = vld [vmem:[%s6035_s2 + $0x104] ss:$16 sps:$4 sm:$0xff]   ;;  %v5228_v20 = vld [vmem:[%s6035_s2 + $0x10c] ss:$16 sps:$4 sm:$0xff]  }
 0x9b9   : > { %v2597_v32 = vmul.f32 %v2593_v10, %v2082_v28  ;;  %v5223_v9 = vld [vmem:[%s6035_s2 + $0x100] ss:$16 sps:$4 sm:$0xff]   ;;  %v5226_v24 = vld [vmem:[%s6035_s2 + $0x108] ss:$16 sps:$4 sm:$0xff]   ;;  %v5261_v25 = vld [vmem:[%s6035_s2 + $0x1c4] ss:$16 sps:$4 sm:$0xff]  }
 0x9ba   : > { %v2634_v30 = vpack.c.bf16 %v2600_v21, %v2598_v26  ;;  %v2595_v31 = vadd.f32 %v2586_v15, %v2579_v27  ;;  %3319 = vmatpush1.bf16.msra.mxu1 %v5199_v1  ;;  %v5211_v15 = vld [vmem:[%s6035_s2 + $0xc0] ss:$16 sps:$4 sm:$0xff]   ;;  %v5231_v26 = vld [vmem:[%s6035_s2 + $0x124] ss:$16 sps:$4 sm:$0xff]   ;;  %v5234_v21 = vld [vmem:[%s6035_s2 + $0x12c] ss:$16 sps:$4 sm:$0xff]  }
 0x9bb   : > { %3320 = vmatprep.subr.bf16.mxu1 %v5207_v5  ;;  %v5229_v27 = vld [vmem:[%s6035_s2 + $0x120] ss:$16 sps:$4 sm:$0xff]   ;;  %v5232_v10 = vld [vmem:[%s6035_s2 + $0x128] ss:$16 sps:$4 sm:$0xff]   ;;  %v5264_v63 = vld [vmem:[%s6035_s2 + $0x1cc] ss:$16 sps:$4 sm:$0xff]  }
 0x9bc   : > { %2827 = vmatprep.mubr.bf16.mxu0 %v2634_v30  ;;  %v2599_v33 = vmul.f32 %v2595_v31, %v2084_v29  ;;  %v5270_v1 = vld [vmem:[%s6035_s2 + $0x1ec] ss:$16 sps:$4 sm:$0xff]   ;;  %v5268_v5 = vld [vmem:[%s6035_s2 + $0x1e8] ss:$16 sps:$4 sm:$0xff]  }
 0x9be   : > { %v2633_v4 = vpack.c.bf16 %v2599_v33, %v2597_v32  ;;  %3321 = vmatpush1.bf16.msra.mxu1 %v5205_v47 }
 0x9bf   : > { %3322 = vmatprep.subr.bf16.mxu1 %v5213_v48 }
 0x9c0   : > { %2828 = vmatmul.mubr.bf16.vlgmr.msra.gmra.mrb[40].mxu0 %v2633_v4 }
 0x9c1   : > { %3354 = vmatpush1.bf16.msra.mxu0 %v5178_v39  ;;  %v5246_v39 = vld [vmem:[%s6035_s2 + $0x16c] ss:$16 sps:$4 sm:$0xff]  }
 0x9c2   : > { %3355 = vmatprep.subr.bf16.mxu0 %v5186_v52  ;;  %3323 = vmatpush1.bf16.msra.mxu1 %v5211_v15  ;;  %v5249_v52 = vld [vmem:[%s6035_s2 + $0x184] ss:$16 sps:$4 sm:$0xff]  }
 0x9c3   : > { %3324 = vmatprep.subr.bf16.mxu1 %v5219_v17  ;;  %v2838_v17 = vld [vmem:[%s6986_s30] sm:$0x3] }
 0x9c5   : > { %3356 = vmatpush1.bf16.msra.mxu0 %v5184_v54  ;;  %v5247_v54 = vld [vmem:[%s6035_s2 + $0x180] ss:$16 sps:$4 sm:$0xff]  }
 0x9c6   : > { %3357 = vmatprep.subr.bf16.mxu0 %v5192_v56  ;;  %3325 = vmatpush1.bf16.msra.mxu1 %v5217_v11  ;;  %v5255_v56 = vld [vmem:[%s6035_s2 + $0x1a4] ss:$16 sps:$4 sm:$0xff]   ;;  %v2876_v11 = vrot.slane %v2838_v17, %v6203_v62 }
 0x9c7   : > { %3326 = vmatprep.subr.bf16.mxu1 %v5225_v41 }
 0x9c9   : > { %3358 = vmatpush1.bf16.msra.mxu0 %v5190_v58  ;;  %v5253_v58 = vld [vmem:[%s6035_s2 + $0x1a0] ss:$16 sps:$4 sm:$0xff]  }
 0x9ca   : > { %3359 = vmatprep.subr.bf16.mxu0 %v5198_v44  ;;  %3327 = vmatpush1.bf16.msra.mxu1 %v5223_v9  ;;  %v5259_v44 = vld [vmem:[%s6035_s2 + $0x1c0] ss:$16 sps:$4 sm:$0xff]  }
 0x9cb   : > { %3328 = vmatprep.subr.bf16.mxu1 %v5231_v26 }
 0x9cd   : > { %3360 = vmatpush1.bf16.msra.mxu0 %v5196_v59  ;;  %v5262_v59 = vld [vmem:[%s6035_s2 + $0x1c8] ss:$16 sps:$4 sm:$0xff]  }
 0x9ce   : > { %3361 = vmatprep.subr.bf16.mxu0 %v5204_v0  ;;  %3329 = vmatpush1.bf16.msra.mxu1 %v5229_v27  ;;  %v5267_v0 = vld [vmem:[%s6035_s2 + $0x1e4] ss:$16 sps:$4 sm:$0xff]  }
 0x9d1   : > { %3362 = vmatpush1.bf16.msra.mxu0 %v5202_v3  ;;  %v5265_v3 = vld [vmem:[%s6035_s2 + $0x1e0] ss:$16 sps:$4 sm:$0xff]  }
 0x9d2   : > { %3363 = vmatprep.subr.bf16.mxu0 %v5210_v6  ;;  %v5273_v6 = vld [vmem:[%s6985_s17 + $0x4] ss:$8 sps:$4 sm:$0xff]  }
 0x9d5   : > { %3364 = vmatpush1.bf16.msra.mxu0 %v5208_v35 }
 0x9d6   : > { %3365 = vmatprep.subr.bf16.mxu0 %v5216_v14 }
 0x9d9   : > { %3366 = vmatpush1.bf16.msra.mxu0 %v5214_v16 }
 0x9da   : > { %3367 = vmatprep.subr.bf16.mxu0 %v5222_v18  ;;  %v2839_v18 = vld [vmem:[%s944_s19] sm:$0x3] }
 0x9db   : > { %v2891_v26 = vrot.slane %v2839_v18, %v6203_v62 }
 0x9dd   : > { %3368 = vmatpush1.bf16.msra.mxu0 %v5220_v19  ;;  %v2880_v19 = vrot.slane %v2838_v17, %v6200_v61 }
 0x9de   : > { %3369 = vmatprep.subr.bf16.mxu0 %v5228_v20 }
 0x9e1   : > { %3370 = vmatpush1.bf16.msra.mxu0 %v5226_v24 }
 0x9e2   : > { %3371 = vmatprep.subr.bf16.mxu0 %v5234_v21  ;;  %v2895_v21 = vrot.slane %v2839_v18, %v6200_v61 }
 0x9e5   : > { %3372 = vmatpush1.bf16.msra.mxu0 %v5232_v10 }
 0xa93   : > { %v2829_v8 = vpop.f32.mrb[40].mxu0 }
 0xa94   : > { %v6458_v34 = vadd.f32 %v5439_v13, %v2829_v8  ;;  %v2831_v12 = vpop.f32.mrb[41].mxu0 }
 0xa95   : > { %v6460_v2 = vadd.f32 %v5440_v40, %v2831_v12  ;;  %v2833_v7 = vpop.f32.mrb[42].mxu0 }
 0xa96   : > { %v6462_v36 = vadd.f32 %v5441_v53, %v2833_v7  ;;  %v2835_v37 = vpop.f32.mrb[43].mxu0 }
 0xa97   : > { %v6464_v42 = vadd.f32 %v5442_v38, %v2835_v37  ;;  %v2840_v43 = vadd.f32 %v6460_v2, %v6458_v34  ;;  %v5237_v38 = vld [vmem:[%s6035_s2 + $0x144] ss:$16 sps:$4 sm:$0xff]  }
 0xa98   : > { %3330 = vmatprep.subr.bf16.mxu1 %v5237_v38  ;;  %v5277_v38 = vld [vmem:[%s6985_s17 + $0x20] ss:$8 sps:$4 sm:$0xff]  }
 0xa99   : > { %2841 = vadd.xlane.f32.xlu0 %v2840_v43  ;;  %v2843_v45 = vadd.f32 %v6464_v42, %v6462_v36  ;;  %v5240_v43 = vld [vmem:[%s6035_s2 + $0x14c] ss:$16 sps:$4 sm:$0xff]  }
 0xa9a   : > { %3373 = vmatprep.subr.bf16.mxu0 %v5240_v43  ;;  %v5282_v43 = vld [vmem:[%s6985_s17 + $0x34] ss:$8 sps:$4 sm:$0xff]  }
 0xa9b   : > { %2844 = vadd.xlane.f32.xlu1 %v2843_v45  ;;  %v5235_v45 = vld [vmem:[%s6035_s2 + $0x140] ss:$16 sps:$4 sm:$0xff]   ;;  %3374 = vmatpush1.bf16.msra.mxu0 %v5238_v46  ;;  %v5285_v46 = vld [vmem:[%s6985_s17 + $0x44] ss:$8 sps:$4 sm:$0xff]  }
 0xa9c   : > { %3331 = vmatpush1.bf16.msra.mxu1 %v5235_v45  ;;  %3375 = vmatprep.subr.bf16.mxu0 %v5246_v39  ;;  %v5280_v45 = vld [vmem:[%s6985_s17 + $0x30] ss:$8 sps:$4 sm:$0xff]   ;;  %v5288_v39 = vld [vmem:[%s6985_s17 + $0x54] ss:$8 sps:$4 sm:$0xff]  }
 0xa9d   : > { %3332 = vmatprep.subr.bf16.mxu1 %v5243_v49  ;;  %v5283_v49 = vld [vmem:[%s6985_s17 + $0x40] ss:$8 sps:$4 sm:$0xff]  }
 0xa9f   : > { %3376 = vmatpush1.bf16.msra.mxu0 %v5244_v51  ;;  %v5291_v51 = vld [vmem:[%s6985_s17 + $0x64] ss:$8 sps:$4 sm:$0xff]  }
 0xaa0   : > { %3333 = vmatpush1.bf16.msra.mxu1 %v5241_v50  ;;  %3377 = vmatprep.subr.bf16.mxu0 %v5252_v22  ;;  %v5286_v50 = vld [vmem:[%s6985_s17 + $0x50] ss:$8 sps:$4 sm:$0xff]   ;;  %v5294_v22 = vld [vmem:[%s6985_s17 + $0x74] ss:$8 sps:$4 sm:$0xff]  }
 0xaa1   : > { %3334 = vmatprep.subr.bf16.mxu1 %v5249_v52  ;;  %v5289_v52 = vld [vmem:[%s6985_s17 + $0x60] ss:$8 sps:$4 sm:$0xff]  }
 0xaa3   : > { %3378 = vmatpush1.bf16.msra.mxu0 %v5250_v55  ;;  %v5297_v55 = vld [vmem:[%s6985_s17 + $0x84] ss:$8 sps:$4 sm:$0xff]  }
 0xaa4   : > { %3335 = vmatpush1.bf16.msra.mxu1 %v5247_v54  ;;  %3379 = vmatprep.subr.bf16.mxu0 %v5258_v57  ;;  %v5292_v54 = vld [vmem:[%s6985_s17 + $0x70] ss:$8 sps:$4 sm:$0xff]   ;;  %v5300_v57 = vld [vmem:[%s6985_s17 + $0x94] ss:$8 sps:$4 sm:$0xff]  }
 0xaa5   : > { %3336 = vmatprep.subr.bf16.mxu1 %v5255_v56  ;;  %v5295_v56 = vld [vmem:[%s6985_s17 + $0x80] ss:$8 sps:$4 sm:$0xff]  }
 0xaa7   : > { %3380 = vmatpush1.bf16.msra.mxu0 %v5256_v23  ;;  %v5303_v23 = vld [vmem:[%s6985_s17 + $0xa4] ss:$8 sps:$4 sm:$0xff]  }
 0xaa8   : > { %3337 = vmatpush1.bf16.msra.mxu1 %v5253_v58  ;;  %3381 = vmatprep.subr.bf16.mxu0 %v5264_v63  ;;  %v5298_v58 = vld [vmem:[%s6985_s17 + $0x90] ss:$8 sps:$4 sm:$0xff]   ;;  %v5309_v63 = vld [vmem:[%s6985_s17 + $0xc4] ss:$8 sps:$4 sm:$0xff]  }
 0xaa9   : > { %3338 = vmatprep.subr.bf16.mxu1 %v5261_v25  ;;  %v5306_v25 = vld [vmem:[%s6985_s17 + $0xb4] ss:$8 sps:$4 sm:$0xff]  }
 0xaab   : > { %3382 = vmatpush1.bf16.msra.mxu0 %v5262_v59  ;;  %v5304_v59 = vld [vmem:[%s6985_s17 + $0xb0] ss:$8 sps:$4 sm:$0xff]  }
 0xaac   : > { %3339 = vmatpush1.bf16.msra.mxu1 %v5259_v44  ;;  %3383 = vmatprep.subr.bf16.mxu0 %v5270_v1  ;;  %v5301_v44 = vld [vmem:[%s6985_s17 + $0xa0] ss:$8 sps:$4 sm:$0xff]   ;;  %v5312_v1 = vld [vmem:[%s6985_s17 + $0xd4] ss:$8 sps:$4 sm:$0xff]  }
 0xaad   : > { %3340 = vmatprep.subr.bf16.mxu1 %v5267_v0  ;;  %v5307_v0 = vld [vmem:[%s6985_s17 + $0xc0] ss:$8 sps:$4 sm:$0xff]  }
 0xaaf   : > { %3384 = vmatpush1.bf16.msra.mxu0 %v5268_v5  ;;  %v5315_v5 = vld [vmem:[%s6985_s17 + $0xe4] ss:$8 sps:$4 sm:$0xff]  }
 0xab0   : > { %3341 = vmatpush1.bf16.msra.mxu1 %v5265_v3  ;;  %v5310_v3 = vld [vmem:[%s6985_s17 + $0xd0] ss:$8 sps:$4 sm:$0xff]  }
 0xab1   : > { %4012 = vmatprep.subr.bf16.mxu1 %v5273_v6  ;;  %v5313_v6 = vld [vmem:[%s6985_s17 + $0xe0] ss:$8 sps:$4 sm:$0xff]  }
 0xb26   : > { %v2842_v28 = vpop.xlane.xlu0 %2841 }
 0xb27   : > { %v2846_v29 = vmul.f32 0.00390625, %v2842_v28 }
 0xb28   : > { %v2845_v30 = vpop.xlane.xlu1 %2844 }
 0xb29   : > { %v6511_v31 = vsub.f32 %v6458_v34, %v2846_v29  ;;  %v6514_v32 = vsub.f32 %v6460_v2, %v2846_v29  ;;  %v2847_v33 = vmul.f32 0.00390625, %v2845_v30 }
 0xb2b   : > { %v6517_v4 = vsub.f32 %v6462_v36, %v2847_v33  ;;  %v6520_v8 = vsub.f32 %v6464_v42, %v2847_v33  ;;  %v2852_v13 = vmul.f32 %v6511_v31, %v6511_v31  ;;  %v2853_v12 = vmul.f32 %v6514_v32, %v6514_v32 }
 0xb2d   : > { %v2856_v40 = vadd.f32 %v2853_v12, %v2852_v13  ;;  %v2854_v7 = vmul.f32 %v6517_v4, %v6517_v4  ;;  %v2855_v53 = vmul.f32 %v6520_v8, %v6520_v8 }
 0xb2f   : > { %2857 = vadd.xlane.f32.xlu0 %v2856_v40  ;;  %v2859_v37 = vadd.f32 %v2855_v53, %v2854_v7  ;;  %v5271_v53 = vld [vmem:[%s6985_s17] ss:$8 sps:$4 sm:$0xff]  }
 0xb31   : > { %2860 = vadd.xlane.f32.xlu1 %v2859_v37  ;;  %v5276_v37 = vld [vmem:[%s6985_s17 + $0x14] ss:$8 sps:$4 sm:$0xff]  }
 0xbbc   : > { %v2858_v47 = vpop.xlane.xlu0 %2857 }
 0xbbd   : > { %v2862_v35 = vmul.f32 0.00390625, %v2858_v47  ;;  %v5318_v47 = vld [vmem:[%s6985_s17 + $0xf4] ss:$8 sps:$4 sm:$0xff]  }
 0xbbe   : > { %v2861_v48 = vpop.xlane.xlu1 %2860 }
 0xbbf   : > { %v2864_v14 = vadd.f32 1e-05, %v2862_v35  ;;  %v2863_v15 = vmul.f32 0.00390625, %v2861_v48  ;;  %v5316_v35 = vld [vmem:[%s6985_s17 + $0xf0] ss:$8 sps:$4 sm:$0xff]  }
 0xbc0   : > { %v5321_v48 = vld [vmem:[%s6985_s17 + $0x104] ss:$8 sps:$4 sm:$0xff]  }
 0xbc1   : > { %5403 = vrsqrt.f32 %v2864_v14  ;;  %v2865_v16 = vadd.f32 1e-05, %v2863_v15  ;;  %v2980_v14 = vsub.s32 2, %v6197_v60  ;;  %v2968_v15 = vld [vmem:[%s6074_s5] sm:$0xf] }
 0xbc2   : > { %v2973_v17 = vrot.slane %v2968_v15, %v6203_v62 }
 0xbc3   : > { %5405 = vrsqrt.f32 %v2865_v16  ;;  %v2984_v16 = vsub.s32 3, %v6197_v60  ;;  %v2981_v18 = vrot.slane %v2968_v15, %v2980_v14 }
 0xbcb   : > { %v5404_v41 = vpop.eup %5403 }
 0xbcc   : > { %v2868_v20 = vmul.f32 %v5404_v41, %v6511_v31  ;;  %v2869_v9 = vmul.f32 %v5404_v41, %v6514_v32 }
 0xbcd   : > { %v5406_v24 = vpop.eup %5405 }
 0xbce   : > { %v2870_v27 = vmul.f32 %v5406_v24, %v6517_v4  ;;  %v2871_v10 = vmul.f32 %v5406_v24, %v6520_v8  ;;  %v2884_v28 = vmul.f32 %v2880_v19, %v2869_v9  ;;  %v2883_v29 = vmul.f32 %v2876_v11, %v2868_v20  ;;  %v5274_v4 = vld [vmem:[%s6985_s17 + $0x10] ss:$8 sps:$4 sm:$0xff]   ;;  %v5279_v8 = vld [vmem:[%s6985_s17 + $0x24] ss:$8 sps:$4 sm:$0xff]  }
 0xbd0   : > { %v2886_v30 = vmul.f32 %v2880_v19, %v2871_v10  ;;  %v2885_v33 = vmul.f32 %v2876_v11, %v2870_v27  ;;  %v2899_v31 = vadd.f32 %v2895_v21, %v2884_v28  ;;  %v2898_v32 = vadd.f32 %v2891_v26, %v2883_v29 }
 0xbd1   : > { %v2977_v11 = vrot.slane %v2968_v15, %v6200_v61  ;;  %v2985_v19 = vrot.slane %v2968_v15, %v2984_v16 }
 0xbd2   : > { %v2901_v13 = vadd.f32 %v2895_v21, %v2886_v30  ;;  %v2900_v12 = vadd.f32 %v2891_v26, %v2885_v33 }
 0xbd4   : > { %v2967_v40 = vpack.c.bf16 %v2901_v13, %v2899_v31  ;;  %v2966_v7 = vpack.c.bf16 %v2900_v12, %v2898_v32  ;;  %v5691_v32 = vmov -1.0  }
 0xbd6   : > { %3342 = vmatprep.mubr.bf16.mxu1 %v2967_v40  ;;  %3385 = vmatprep.mubr.bf16.mxu0 %v2967_v40 }
 0xbd7   : > { %3343 = vmatmul.mubr.bf16.vlgmr.msra.gmra.mrb[8].mxu1 %v2966_v7  ;;  %3386 = vmatmul.mubr.bf16.vlgmr.msra.gmra.mrb[44].mxu0 %v2966_v7 }
 0xbd8   : > { %4013 = vmatpush1.bf16.msra.mxu1 %v5271_v53 }
 0xbd9   : > { %4014 = vmatprep.subr.bf16.mxu1 %v5276_v37 }
 0xbdc   : > { %4015 = vmatpush1.bf16.msra.mxu1 %v5274_v4 }
 0xbdd   : > { %4016 = vmatprep.subr.bf16.mxu1 %v5279_v8 }
 0xbe0   : > { %4017 = vmatpush1.bf16.msra.mxu1 %v5277_v38 }
 0xbe1   : > { %4018 = vmatprep.subr.bf16.mxu1 %v5282_v43 }
 0xbe4   : > { %4019 = vmatpush1.bf16.msra.mxu1 %v5280_v45 }
 0xbe5   : > { %4020 = vmatprep.subr.bf16.mxu1 %v5285_v46 }
 0xbe8   : > { %4021 = vmatpush1.bf16.msra.mxu1 %v5283_v49 }
 0xbe9   : > { %4022 = vmatprep.subr.bf16.mxu1 %v5288_v39 }
 0xbec   : > { %4023 = vmatpush1.bf16.msra.mxu1 %v5286_v50 }
 0xbed   : > { %4024 = vmatprep.subr.bf16.mxu1 %v5291_v51 }
 0xbf0   : > { %4025 = vmatpush1.bf16.msra.mxu1 %v5289_v52 }
 0xbf1   : > { %4026 = vmatprep.subr.bf16.mxu1 %v5294_v22 }
 0xbf4   : > { %4027 = vmatpush1.bf16.msra.mxu1 %v5292_v54 }
 0xbf5   : > { %4028 = vmatprep.subr.bf16.mxu1 %v5297_v55 }
 0xbf8   : > { %4029 = vmatpush1.bf16.msra.mxu1 %v5295_v56 }
 0xbf9   : > { %4030 = vmatprep.subr.bf16.mxu1 %v5300_v57 }
 0xbfc   : > { %4031 = vmatpush1.bf16.msra.mxu1 %v5298_v58 }
 0xbfd   : > { %4032 = vmatprep.subr.bf16.mxu1 %v5303_v23 }
 0xc00   : > { %4033 = vmatpush1.bf16.msra.mxu1 %v5301_v44 }
 0xc01   : > { %4034 = vmatprep.subr.bf16.mxu1 %v5306_v25 }
 0xc04   : > { %4035 = vmatpush1.bf16.msra.mxu1 %v5304_v59 }
 0xc05   : > { %4036 = vmatprep.subr.bf16.mxu1 %v5309_v63 }
 0xc08   : > { %4037 = vmatpush1.bf16.msra.mxu1 %v5307_v0 }
 0xc09   : > { %4038 = vmatprep.subr.bf16.mxu1 %v5312_v1 }
 0xc0c   : > { %4039 = vmatpush1.bf16.msra.mxu1 %v5310_v3 }
 0xc0d   : > { %4040 = vmatprep.subr.bf16.mxu1 %v5315_v5 }
 0xc10   : > { %4041 = vmatpush1.bf16.msra.mxu1 %v5313_v6 }
 0xc11   : > { %4042 = vmatprep.subr.bf16.mxu1 %v5318_v47 }
 0xc14   : > { %4043 = vmatpush1.bf16.msra.mxu1 %v5316_v35 }
 0xc15   : > { %4055 = vmatprep.subr.bf16.mxu1 %v5321_v48 }
 0xcaa   : > { %v3344_v41 = vpop.f32.mrb[8].mxu1  ;;  %v3387_v20 = vpop.f32.mrb[44].mxu0 }
 0xcab   : > { %v6610_v9 = vadd.f32 %v3344_v41, %v2973_v17  ;;  %v6612_v24 = vadd.f32 %v3387_v20, %v2981_v18  ;;  %v3346_v26 = vpop.f32.mrb[9].mxu1  ;;  %v3389_v21 = vpop.f32.mrb[45].mxu0 }
 0xcac   : > { %v6614_v27 = vadd.f32 %v3346_v26, %v2977_v11  ;;  %v6616_v10 = vadd.f32 %v3389_v21, %v2985_v19  ;;  %v3348_v28 = vpop.f32.mrb[10].mxu1  ;;  %v3391_v60 = vpop.f32.mrb[46].mxu0 }
 0xcad   : > { %v6619_v29 = vmul.f32 0.70710677, %v6610_v9  ;;  %v3406_v30 = vmul.f32 0.70710677, %v6612_v24  ;;  %v3350_v53 = vpop.f32.mrb[11].mxu1  ;;  %v3393_v38 = vpop.f32.mrb[47].mxu0  ;;  %v6634_v39 = vadd.f32 %v3348_v28, %v2973_v17  ;;  %v6639_v52 = vadd.f32 %v3391_v60, %v2981_v18 }
 0xcae   : > { %v6623_v33 = vmul.f32 0.70710677, %v6614_v27  ;;  %v6631_v7 = vmul.f32 0.70710677, %v6616_v10  ;;  %v6641_v54 = vadd.f32 %v3350_v53, %v2977_v11  ;;  %v6651_v3 = vadd.f32 %v3393_v38, %v2985_v19 }
 0xcaf   : > { %v3428_v31 = vand.u32 2147483647, %v6619_v29  ;;  %vm3414_vm5 = vcmp.ge.f32.partialorder %v3406_v30, 0.0  ;;  %v3430_v13 = vand.u32 2147483647, %v3406_v30  ;;  %v6669_v28 = vmul.f32 0.5, %v6612_v24 }
 0xcb0   : > { %v6627_v12 = vsel %vm3414_vm5, 1.0, %v5691_v32  ;;  %v3429_v40 = vand.u32 2147483647, %v6623_v33  ;;  %v3431_v46 = vand.u32 2147483647, %v6631_v7  ;;  %vm3412_vm7 = vcmp.ge.f32.partialorder %v6619_v29, 0.0 }
 0xcb1   : > { %v3436_v37 = vmul.f32 0.3275911, %v3428_v31  ;;  %v3438_v4 = vmul.f32 0.3275911, %v3430_v13  ;;  %v6637_v51 = vmul.f32 0.70710677, %v6634_v39 }
 0xcb2   : > { %v3437_v8 = vmul.f32 0.3275911, %v3429_v40  ;;  %v3439_v50 = vmul.f32 0.3275911, %v3431_v46  ;;  %v3540_v55 = vsub.f32 0.0, %v3428_v31  ;;  %v3542_v57 = vsub.f32 0.0, %v3430_v13 }
 0xcb3   : > { %v3444_v43 = vadd.f32 1.0, %v3436_v37  ;;  %v3446_v45 = vadd.f32 1.0, %v3438_v4  ;;  %v3432_v56 = vand.u32 2147483647, %v6637_v51  ;;  %v3410_v58 = vmul.f32 0.70710677, %v6639_v52 }
 0xcb4   : > { %v3445_v49 = vadd.f32 1.0, %v3437_v8  ;;  %v3447_v22 = vadd.f32 1.0, %v3439_v50  ;;  %v3541_v44 = vsub.f32 0.0, %v3429_v40  ;;  %v6646_v59 = vmul.f32 0.70710677, %v6641_v54 }
 0xcb5   : > { %5407 = vrcp.f32 %v3444_v43  ;;  %v3440_v23 = vmul.f32 0.3275911, %v3432_v56  ;;  %vm3418_vm6 = vcmp.ge.f32.partialorder %v3410_v58, 0.0  ;;  %v3434_v25 = vand.u32 2147483647, %v3410_v58 }
 0xcb6   : > { %5409 = vrcp.f32 %v3446_v45  ;;  %v3548_v63 = vmul.f32 %v3540_v55, %v3428_v31  ;;  %v6649_v1 = vsel %vm3418_vm6, 1.0, %v5691_v32  ;;  %v3550_v5 = vmul.f32 %v3542_v57, %v3430_v13 }
 0xcb7   : > { %5411 = vrcp.f32 %v3445_v49  ;;  %v3448_v0 = vadd.f32 1.0, %v3440_v23  ;;  %v3442_v6 = vmul.f32 0.3275911, %v3434_v25  ;;  %v6654_v47 = vand.u32 2147483647, %v6646_v59 }
 0xcb8   : > { %5413 = vrcp.f32 %v3447_v22  ;;  %v3549_v15 = vmul.f32 %v3541_v44, %v3429_v40  ;;  %v3556_v18 = vmul.f32 1.442695, %v3548_v63  ;;  %v6664_v19 = vmul.f32 0.70710677, %v6651_v3 }
 0xcb9   : > { %5415 = vrcp.f32 %v3448_v0  ;;  %v3450_v16 = vadd.f32 1.0, %v3442_v6  ;;  %v3441_v17 = vmul.f32 0.3275911, %v6654_v47  ;;  %v3560_v20 = vmul.f32 1.442695, %v3550_v5 }
 0xcba   : > { %v3543_v30 = vsub.f32 0.0, %v3431_v46  ;;  %v6672_v31 = vand.u32 2147483647, %v6664_v19  ;;  %v3558_v53 = vmul.f32 1.442695, %v3549_v15  ;;  %v3544_v37 = vsub.f32 0.0, %v3432_v56 }
 0xcbb   : > { %5417 = vrcp.f32 %v3450_v16  ;;  %v3449_v26 = vadd.f32 1.0, %v3441_v17  ;;  %v3546_v38 = vsub.f32 0.0, %v3434_v25  ;;  %vm3416_vm8 = vcmp.ge.f32.partialorder %v6637_v51, 0.0 }
 0xcbc   : > { %v3443_v24 = vmul.f32 0.3275911, %v6672_v31  ;;  %v3551_v22 = vmul.f32 %v3543_v30, %v3431_v46  ;;  %v3552_v0 = vmul.f32 %v3544_v37, %v3432_v56  ;;  %vm3413_vm9 = vcmp.ge.f32.partialorder %v6623_v33, 0.0 }
 0xcbd   : > { %5419 = vrcp.f32 %v3449_v26  ;;  %v3554_v5 = vmul.f32 %v3546_v38, %v3434_v25  ;;  %v3421_v33 = vsel %vm3413_vm9, 1.0, %v5691_v32  ;;  %vm3415_vm10 = vcmp.ge.f32.partialorder %v6631_v7, 0.0 }
 0xcbe   : > { %5421 = vpow2.f32 %v3556_v18  ;;  %v3451_v55 = vadd.f32 1.0, %v3443_v24  ;;  %v3562_v17 = vmul.f32 1.442695, %v3551_v22  ;;  %v3545_v18 = vsub.f32 0.0, %v6654_v47 }
 0xcbf   : > { %v6656_v35 = vpop.eup %5407  ;;  %5423 = vpow2.f32 %v3560_v20  ;;  %vm3417_vm11 = vcmp.ge.f32.partialorder %v6646_v59, 0.0  ;;  %v3423_v7 = vsel %vm3415_vm10, 1.0, %v5691_v32  ;;  %vm3419_vm12 = vcmp.ge.f32.partialorder %v6664_v19, 0.0 }
 0xcc0   : > { %v6658_v48 = vpop.eup %5409  ;;  %v3468_v14 = vmul.f32 1.0614054, %v6656_v35  ;;  %5425 = vrcp.f32 %v3451_v55  ;;  %v3425_v59 = vsel %vm3417_vm11, 1.0, %v5691_v32 }
 0xcc1   : > { %v3470_v11 = vmul.f32 1.0614054, %v6658_v48  ;;  %v6666_v21 = vpop.eup %5411  ;;  %5427 = vpow2.f32 %v3558_v53 }
 0xcc2   : > { %v3476_v41 = vadd.f32 -1.4531521, %v3468_v14  ;;  %v3469_v40 = vmul.f32 1.0614054, %v6666_v21  ;;  %v6676_v4 = vpop.eup %5413 }
 0xcc3   : > { %v3478_v60 = vadd.f32 -1.4531521, %v3470_v11  ;;  %v3471_v49 = vmul.f32 1.0614054, %v6676_v4  ;;  %v6683_v44 = vpop.eup %5415 }
 0xcc4   : > { %v3484_v13 = vmul.f32 %v6656_v35, %v3476_v41  ;;  %v3477_v45 = vadd.f32 -1.4531521, %v3469_v40  ;;  %v3472_v46 = vmul.f32 1.0614054, %v6683_v44 }
 0xcc5   : > { %v3486_v8 = vmul.f32 %v6658_v48, %v3478_v60  ;;  %v3479_v23 = vadd.f32 -1.4531521, %v3471_v49  ;;  %v6690_v11 = vpop.eup %5417  ;;  %v3564_v60 = vmul.f32 1.442695, %v3552_v0  ;;  %v3547_v49 = vsub.f32 0.0, %v6672_v31 }
 0xcc6   : > { %v3492_v43 = vadd.f32 1.4214138, %v3484_v13  ;;  %v3485_v58 = vmul.f32 %v6666_v21, %v3477_v45  ;;  %v3480_v20 = vadd.f32 -1.4531521, %v3472_v46  ;;  %v3474_v30 = vmul.f32 1.0614054, %v6690_v11 }
 0xcc7   : > { %v3494_v50 = vadd.f32 1.4214138, %v3486_v8  ;;  %v3487_v15 = vmul.f32 %v6676_v4, %v3479_v23  ;;  %v3568_v13 = vmul.f32 1.442695, %v3554_v5  ;;  %v6698_v38 = vpop.eup %5419  ;;  %v3553_v45 = vmul.f32 %v3545_v18, %v6654_v47 }
 0xcc8   : > { %v3500_v57 = vmul.f32 %v6656_v35, %v3492_v43  ;;  %v3493_v14 = vadd.f32 1.4214138, %v3485_v58  ;;  %v3488_v8 = vmul.f32 %v6683_v44, %v3480_v20  ;;  %v3482_v43 = vadd.f32 -1.4531521, %v3474_v30  ;;  %v5422_v58 = vpop.eup %5421 }
 0xcc9   : > { %v3502_v63 = vmul.f32 %v6658_v48, %v3494_v50  ;;  %v3495_v25 = vadd.f32 1.4214138, %v3487_v15  ;;  %5429 = vpow2.f32 %v3564_v60  ;;  %v3473_v0 = vmul.f32 1.0614054, %v6698_v38  ;;  %v5424_v5 = vpop.eup %5423 }
 0xcca   : > { %v3508_v6 = vadd.f32 -0.28449672, %v3500_v57  ;;  %v3501_v56 = vmul.f32 %v6666_v21, %v3493_v14  ;;  %v3496_v57 = vadd.f32 1.4214138, %v3488_v8  ;;  %5431 = vpow2.f32 %v3562_v17 }
 0xccb   : > { %v3510_v16 = vadd.f32 -0.28449672, %v3502_v63  ;;  %v3503_v53 = vmul.f32 %v6676_v4, %v3495_v25  ;;  %v3490_v63 = vmul.f32 %v6690_v11, %v3482_v43  ;;  %5433 = vpow2.f32 %v3568_v13 }
 0xccc   : > { %v3516_v41 = vmul.f32 %v6656_v35, %v3508_v6  ;;  %v3509_v37 = vadd.f32 -0.28449672, %v3501_v56  ;;  %v3504_v14 = vmul.f32 %v6683_v44, %v3496_v57  ;;  %v3555_v56 = vmul.f32 %v3547_v49, %v6672_v31 }
 0xccd   : > { %v3518_v26 = vmul.f32 %v6658_v48, %v3510_v16  ;;  %v3511_v55 = vadd.f32 -0.28449672, %v3503_v53  ;;  %v3498_v46 = vadd.f32 1.4214138, %v3490_v63  ;;  %v3481_v16 = vadd.f32 -1.4531521, %v3473_v0 }
 0xcce   : > { %v3524_v40 = vadd.f32 0.2548296, %v3516_v41  ;;  %v3517_v22 = vmul.f32 %v6666_v21, %v3509_v37  ;;  %v3566_v41 = vmul.f32 1.442695, %v3553_v45  ;;  %v3420_v30 = vsel %vm3412_vm7, 1.0, %v5691_v32 }
 0xccf   : > { %v3526_v24 = vadd.f32 0.2548296, %v3518_v26  ;;  %v3519_v47 = vmul.f32 %v6676_v4, %v3511_v55  ;;  %v3506_v26 = vmul.f32 %v6690_v11, %v3498_v46  ;;  %v3489_v60 = vmul.f32 %v6698_v38, %v3481_v16 }
 0xcd0   : > { %v3532_v50 = vmul.f32 %v6656_v35, %v3524_v40  ;;  %v3525_v6 = vadd.f32 0.2548296, %v3517_v22  ;;  %v6709_v35 = vpop.eup %5425  ;;  %5435 = vpow2.f32 %v3566_v41  ;;  %v3570_v49 = vmul.f32 1.442695, %v3555_v56 }
 0xcd1   : > { %v3534_v23 = vmul.f32 %v6658_v48, %v3526_v24  ;;  %v3512_v48 = vadd.f32 -0.28449672, %v3504_v14  ;;  %v5428_v25 = vpop.eup %5427  ;;  %v3475_v17 = vmul.f32 1.0614054, %v6709_v35  ;;  %v3527_v40 = vadd.f32 0.2548296, %v3519_v47 }
 0xcd2   : > { %v3572_v18 = vmul.f32 %v5422_v58, %v3532_v50  ;;  %v3533_v13 = vmul.f32 %v6666_v21, %v3525_v6  ;;  %v3514_v31 = vadd.f32 -0.28449672, %v3506_v26  ;;  %v3497_v8 = vadd.f32 1.4214138, %v3489_v60 }
 0xcd3   : > { %v3574_v15 = vmul.f32 %v5424_v5, %v3534_v23  ;;  %v3520_v37 = vmul.f32 %v6683_v44, %v3512_v48  ;;  %v3483_v24 = vadd.f32 -1.4531521, %v3475_v17  ;;  %v3535_v57 = vmul.f32 %v6676_v4, %v3527_v40  ;;  %v5430_v58 = vpop.eup %5429 }
 0xcd4   : > { %v3580_v43 = vsub.f32 1.0, %v3572_v18  ;;  %v3522_v22 = vmul.f32 %v6690_v11, %v3514_v31  ;;  %v3505_v29 = vmul.f32 %v6698_v38, %v3497_v8  ;;  %v3573_v21 = vmul.f32 %v5428_v25, %v3533_v13  ;;  %v5432_v6 = vpop.eup %5431 }
 0xcd5   : > { %v3582_v20 = vsub.f32 1.0, %v3574_v15  ;;  %v3528_v45 = vadd.f32 0.2548296, %v3520_v37  ;;  %v3491_v55 = vmul.f32 %v6709_v35, %v3483_v24  ;;  %5437 = vpow2.f32 %v3570_v49  ;;  %v5434_v15 = vpop.eup %5433 }
 0xcd6   : > { %v3530_v63 = vadd.f32 0.2548296, %v3522_v22  ;;  %v3513_v0 = vadd.f32 -0.28449672, %v3505_v29  ;;  %v3588_v47 = vmul.f32 %v3580_v43, %v3420_v30  ;;  %v3581_v16 = vsub.f32 1.0, %v3573_v21 }
 0xcd7   : > { %v3590_v53 = vmul.f32 %v3582_v20, %v6627_v12  ;;  %v3536_v12 = vmul.f32 %v6683_v44, %v3528_v45  ;;  %v3499_v5 = vadd.f32 1.4214138, %v3491_v55  ;;  %v3575_v48 = vmul.f32 %v5432_v6, %v3535_v57 }
 0xcd8   : > { %v3538_v4 = vmul.f32 %v6690_v11, %v3530_v63  ;;  %v3521_v46 = vmul.f32 %v6698_v38, %v3513_v0  ;;  %v3396_v20 = vmul.f32 0.5, %v6610_v9  ;;  %v3596_v26 = vadd.f32 1.0, %v3588_v47 }
 0xcd9   : > { %v3598_v50 = vadd.f32 1.0, %v3590_v53  ;;  %v3576_v14 = vmul.f32 %v5430_v58, %v3536_v12  ;;  %v3507_v44 = vmul.f32 %v6709_v35, %v3499_v5  ;;  %v3589_v13 = vmul.f32 %v3581_v16, %v3421_v33  ;;  %v5337_v33 = vld [vmem:[%s6985_s17 + $0x160] ss:$8 sps:$4 sm:$0xff]  }
 0xcda   : > { %v3578_v41 = vmul.f32 %v5434_v15, %v3538_v4  ;;  %v3529_v56 = vadd.f32 0.2548296, %v3521_v46  ;;  %v5436_v51 = vpop.eup %5435  ;;  %v3400_v40 = vmul.f32 0.5, %v6634_v39  ;;  %v3583_v53 = vsub.f32 1.0, %v3575_v48  ;;  %v5319_v46 = vld [vmem:[%s6985_s17 + $0x100] ss:$8 sps:$4 sm:$0xff]  }
 0xcdb   : > { %v6728_v23 = vmul.f32 %v3598_v50, %v6669_v28  ;;  %v3424_v28 = vsel %vm3416_vm8, 1.0, %v5691_v32  ;;  %v3584_v18 = vsub.f32 1.0, %v3576_v14  ;;  %v3515_v25 = vadd.f32 -0.28449672, %v3507_v44  ;;  %v5328_v48 = vld [vmem:[%s6985_s17 + $0x130] ss:$8 sps:$4 sm:$0xff]  }
 0xcdc   : > { %v3586_v60 = vsub.f32 1.0, %v3578_v41  ;;  %v3537_v17 = vmul.f32 %v6698_v38, %v3529_v56  ;;  %v3604_v24 = vmul.f32 %v3596_v26, %v3396_v20  ;;  %v3402_v38 = vmul.f32 0.5, %v6639_v52  ;;  %v5333_v41 = vld [vmem:[%s6985_s17 + $0x144] ss:$8 sps:$4 sm:$0xff]   ;;  %v5331_v56 = vld [vmem:[%s6985_s17 + $0x140] ss:$8 sps:$4 sm:$0xff]  }
 0xcdd   : > { %v3592_v11 = vmul.f32 %v3584_v18, %v3424_v28  ;;  %v3523_v30 = vmul.f32 %v6709_v35, %v3515_v25  ;;  %v3597_v39 = vadd.f32 1.0, %v3589_v13  ;;  %v3397_v52 = vmul.f32 0.5, %v6614_v27  ;;  %v5322_v28 = vld [vmem:[%s6985_s17 + $0x110] ss:$8 sps:$4 sm:$0xff]   ;;  %v5330_v18 = vld [vmem:[%s6985_s17 + $0x134] ss:$8 sps:$4 sm:$0xff]  }
 0xcde   : > { %v3594_v9 = vmul.f32 %v3586_v60, %v6649_v1  ;;  %v3577_v31 = vmul.f32 %v5436_v51, %v3537_v17  ;;  %v3591_v1 = vmul.f32 %v3583_v53, %v3423_v7  ;;  %v3427_v0 = vsel %vm3419_vm12, 1.0, %v5691_v32  ;;  %v5336_v25 = vld [vmem:[%s6985_s17 + $0x154] ss:$8 sps:$4 sm:$0xff]   ;;  %v5334_v20 = vld [vmem:[%s6985_s17 + $0x150] ss:$8 sps:$4 sm:$0xff]  }
 0xcdf   : > { %v3600_v37 = vadd.f32 1.0, %v3592_v11  ;;  %v3531_v8 = vadd.f32 0.2548296, %v3523_v30  ;;  %v5438_v22 = vpop.eup %5437  ;;  %v3605_v5 = vmul.f32 %v3597_v39, %v3397_v52  ;;  %v3399_v14 = vmul.f32 0.5, %v6616_v10  ;;  %v5327_v10 = vld [vmem:[%s6985_s17 + $0x124] ss:$8 sps:$4 sm:$0xff]  }
 0xce0   : > { %v3602_v45 = vadd.f32 1.0, %v3594_v9  ;;  %v3585_v49 = vsub.f32 1.0, %v3577_v31  ;;  %v3599_v19 = vadd.f32 1.0, %v3591_v1  ;;  %v3403_v15 = vmul.f32 0.5, %v6651_v3  ;;  %v5325_v3 = vld [vmem:[%s6985_s17 + $0x120] ss:$8 sps:$4 sm:$0xff]  }
 0xce1   : > { %v3608_v43 = vmul.f32 %v3600_v37, %v3400_v40  ;;  %v3539_v50 = vmul.f32 %v6709_v35, %v3531_v8  ;;  %v3401_v35 = vmul.f32 0.5, %v6641_v54  ;;  %v5324_v54 = vld [vmem:[%s6985_s17 + $0x114] ss:$8 sps:$4 sm:$0xff]   ;;  %v5339_v26 = vld [vmem:[%s6985_s17 + $0x164] ss:$8 sps:$4 sm:$0xff]  }
 0xce2   : > { %v6750_v55 = vmul.f32 %v3602_v45, %v3402_v38  ;;  %v3593_v21 = vmul.f32 %v3585_v49, %v3425_v59  ;;  %v3607_v44 = vmul.f32 %v3599_v19, %v3399_v14  ;;  %v5342_v11 = vld [vmem:[%s6985_s17 + $0x174] ss:$8 sps:$4 sm:$0xff]   ;;  %v5340_v60 = vld [vmem:[%s6985_s17 + $0x170] ss:$8 sps:$4 sm:$0xff]   ;;  %v5345_v17 = vld [vmem:[%s6985_s17 + $0x184] ss:$8 sps:$4 sm:$0xff]  }
 0xce3   : > { %v3676_v29 = vpack.c.bf16 %v3608_v43, %v3604_v24  ;;  %v3579_v57 = vmul.f32 %v5438_v22, %v3539_v50  ;;  %v5343_v30 = vld [vmem:[%s6985_s17 + $0x180] ss:$8 sps:$4 sm:$0xff]   ;;  %v5348_v51 = vld [vmem:[%s6985_s17 + $0x194] ss:$8 sps:$4 sm:$0xff]   ;;  %v5346_v13 = vld [vmem:[%s6985_s17 + $0x190] ss:$8 sps:$4 sm:$0xff]  }
 0xce4   : > { %v3678_v12 = vpack.c.bf16 %v6750_v55, %v6728_v23  ;;  %v3601_v58 = vadd.f32 1.0, %v3593_v21  ;;  %v5351_v40 = vld [vmem:[%s6985_s17 + $0x1a4] ss:$8 sps:$4 sm:$0xff]   ;;  %v5349_v37 = vld [vmem:[%s6985_s17 + $0x1a0] ss:$8 sps:$4 sm:$0xff]   ;;  %v5450_v19 = vld [vmem:[%s6987_s20 + $0x18] sm:$0xff] (!%p4914_p6)  }
 0xce5   : > { %v3587_v63 = vsub.f32 1.0, %v3579_v57  ;;  %v5354_v53 = vld [vmem:[%s6985_s17 + $0x1b4] ss:$8 sps:$4 sm:$0xff]   ;;  %v5352_v9 = vld [vmem:[%s6985_s17 + $0x1b0] ss:$8 sps:$4 sm:$0xff]   ;;  %v5453_v14 = vld [vmem:[%s6987_s20 + $0x68] sm:$0xff] (!%p4914_p6)  }
 0xce6   : > { %v3609_v6 = vmul.f32 %v3601_v58, %v3401_v35  ;;  %v5357_v31 = vld [vmem:[%s6985_s17 + $0x1c4] ss:$8 sps:$4 sm:$0xff]   ;;  %v5355_v8 = vld [vmem:[%s6985_s17 + $0x1c0] ss:$8 sps:$4 sm:$0xff]   ;;  %v5360_v24 = vld [vmem:[%s6985_s17 + $0x1d4] ss:$8 sps:$4 sm:$0xff]  }
 0xce7   : > { %v3595_v47 = vmul.f32 %v3587_v63, %v3427_v0  ;;  %v5358_v7 = vld [vmem:[%s6985_s17 + $0x1d0] ss:$8 sps:$4 sm:$0xff]   ;;  %v5363_v43 = vld [vmem:[%s6985_s17 + $0x1e4] ss:$8 sps:$4 sm:$0xff]   ;;  %v5361_v38 = vld [vmem:[%s6985_s17 + $0x1e0] ss:$8 sps:$4 sm:$0xff]  }
 0xce8   : > { %v3677_v4 = vpack.c.bf16 %v3609_v6, %v3605_v5  ;;  %v5366_v45 = vld [vmem:[%s6985_s17 + $0x1f4] ss:$8 sps:$4 sm:$0xff]   ;;  %v5364_v49 = vld [vmem:[%s6985_s17 + $0x1f0] ss:$8 sps:$4 sm:$0xff]   ;;  %v3680_v50 = vld [vmem:[%s952_s1] sm:$0x3] }
 0xce9   : > { %v3603_v27 = vadd.f32 1.0, %v3595_v47  ;;  %v3685_v22 = vrot.slane %v3680_v50, %v6203_v62  ;;  %v3689_v39 = vrot.slane %v3680_v50, %v6200_v61  ;;  %v5443_v61 = vld [vmem:[%s6987_s20 + $0x40] sm:$0xff] (!%p4914_p6)   ;;  %v5447_v63 = vld [vmem:[%s6987_s20 + $0x50] sm:$0xff] (!%p4914_p6)   ;;  %v5449_v5 = vld [vmem:[%s6987_s20 + $0x58] sm:$0xff] (!%p4914_p6)  }
 0xcea   : > { %4044 = vmatprep.mubr.bf16.mxu1 %v3677_v4  ;;  %4956 = vmatprep.subr.bf16.mxu0 (!%p4914_p6), %v5443_v61  ;;  %v5448_v0 = vld [vmem:[%s6987_s20 + $0x10] sm:$0xff] (!%p4914_p6)   ;;  %v5451_v6 = vld [vmem:[%s6987_s20 + $0x60] sm:$0xff] (!%p4914_p6)  }
 0xceb   : > { %v3611_v16 = vmul.f32 %v3603_v27, %v3403_v15  ;;  %4045 = vmatmul.mubr.bf16.vlgmr.msra.gmra.mrb[12].mxu1 %v3676_v29  ;;  %v5452_v47 = vld [vmem:[%s6987_s20 + $0x20] sm:$0xff] (!%p4914_p6)   ;;  %v5454_v15 = vld [vmem:[%s6987_s20 + $0x28] sm:$0xff] (!%p4914_p6)   ;;  %v5455_v27 = vld [vmem:[%s6987_s20 + $0x70] sm:$0xff] (!%p4914_p6)  }
 0xcec   : > { %4056 = vmatpush1.bf16.msra.mxu1 %v5319_v46  ;;  %v5456_v4 = vld [vmem:[%s6987_s20 + $0x30] sm:$0xff] (!%p4914_p6)   ;;  %v5457_v46 = vld [vmem:[%s6987_s20 + $0x78] sm:$0xff] (!%p4914_p6)  }
 0xced   : > { %v3679_v32 = vpack.c.bf16 %v3611_v16, %v3607_v44  ;;  %4057 = vmatprep.subr.bf16.mxu1 %v5324_v54  ;;  %v5458_v54 = vld [vmem:[%s6987_s20 + $0x38] sm:$0xff] (!%p4914_p6)  }
 0xcef   : > { %4087 = vmatprep.mubr.bf16.mxu1 %v3679_v32  ;;  %v4915_v32 = vld [vmem:[%s6988_s0] ss:$0 sm:$0xff] (!%p4914_p6) }
 0xcf0   : > { %4058 = vmatpush1.bf16.msra.mxu1 %v5322_v28 }
 0xcf1   : > { %4059 = vmatprep.subr.bf16.mxu1 %v5327_v10 }
 0xcf4   : > { %4060 = vmatpush1.bf16.msra.mxu1 %v5325_v3 }
 0xcf5   : > { %4061 = vmatprep.subr.bf16.mxu1 %v5330_v18 }
 0xcf8   : > { %4062 = vmatpush1.bf16.msra.mxu1 %v5328_v48 }
 0xcf9   : > { %4063 = vmatprep.subr.bf16.mxu1 %v5333_v41 }
 0xcfc   : > { %4064 = vmatpush1.bf16.msra.mxu1 %v5331_v56 }
 0xcfd   : > { %4065 = vmatprep.subr.bf16.mxu1 %v5336_v25 }
 0xd00   : > { %4066 = vmatpush1.bf16.msra.mxu1 %v5334_v20 }
 0xd01   : > { %4067 = vmatprep.subr.bf16.mxu1 %v5339_v26 }
 0xd04   : > { %4068 = vmatpush1.bf16.msra.mxu1 %v5337_v33 }
 0xd05   : > { %4069 = vmatprep.subr.bf16.mxu1 %v5342_v11 }
 0xd08   : > { %4070 = vmatpush1.bf16.msra.mxu1 %v5340_v60 }
 0xd09   : > { %4071 = vmatprep.subr.bf16.mxu1 %v5345_v17 }
 0xd0c   : > { %4072 = vmatpush1.bf16.msra.mxu1 %v5343_v30 }
 0xd0d   : > { %4073 = vmatprep.subr.bf16.mxu1 %v5348_v51 }
 0xd10   : > { %4074 = vmatpush1.bf16.msra.mxu1 %v5346_v13 }
 0xd11   : > { %4075 = vmatprep.subr.bf16.mxu1 %v5351_v40 }
 0xd14   : > { %4076 = vmatpush1.bf16.msra.mxu1 %v5349_v37 }
 0xd15   : > { %4077 = vmatprep.subr.bf16.mxu1 %v5354_v53 }
 0xd18   : > { %4078 = vmatpush1.bf16.msra.mxu1 %v5352_v9 }
 0xd19   : > { %4079 = vmatprep.subr.bf16.mxu1 %v5357_v31 }
 0xd1c   : > { %4080 = vmatpush1.bf16.msra.mxu1 %v5355_v8 }
 0xd1d   : > { %4081 = vmatprep.subr.bf16.mxu1 %v5360_v24 }
 0xd20   : > { %4082 = vmatpush1.bf16.msra.mxu1 %v5358_v7 }
 0xd21   : > { %4083 = vmatprep.subr.bf16.mxu1 %v5363_v43 }
 0xd24   : > { %4084 = vmatpush1.bf16.msra.mxu1 %v5361_v38 }
 0xd25   : > { %4085 = vmatprep.subr.bf16.mxu1 %v5366_v45 }
 0xd28   : > { %4086 = vmatpush1.bf16.msra.mxu1 %v5364_v49 }
 0xd2b   : > { %4088 = vmatmul.mubr.bf16.vlgmr.msra.gmra.mrb[12].mxu1 %v3678_v12 }
 0xdfe   : > { %v4089_v29 = vpop.f32.mrb[12].mxu1 }
 0xdff   : > { %v5026_v59 = vadd.f32 %v4089_v29, %v3685_v22  ;;  %v4091_v1 = vpop.f32.mrb[13].mxu1 }
 0xe00   : > { %v5027_v21 = vadd.f32 %v4091_v1, %v3689_v39  ;;  %v4093_v57 = vpop.f32.mrb[14].mxu1  ;;  %4109 = sbr.rel (%p4914_p6) target bundleno = 3878 (0xf26), region = 128 }
 0xe01   : > { %v4098_v52 = vadd.f32 %v5026_v59, %v6458_v34  ;;  %v5028_v35 = vadd.f32 %v4093_v57, %v3685_v22  ;;  %v4095_v58 = vpop.f32.mrb[15].mxu1 }
 0xe02   : > { %v4099_v23 = vadd.f32 %v5027_v21, %v6460_v2  ;;  %v5029_v55 = vadd.f32 %v4095_v58, %v3689_v39  ;;  %v5444_v2 = vld [vmem:[%s6987_s20] sm:$0xff] (!%p4914_p6)  }
 0xe03   : > { %4102 = vst [vmem:[#allocation2] sm:$0xff] %v4098_v52  ;;  %v4100_v12 = vadd.f32 %v5028_v35, %v6462_v36  ;;  %v5445_v36 = vld [vmem:[%s6987_s20 + $0x48] sm:$0xff] (!%p4914_p6)   ;;  %4957 = vmatpush3.bf16.msra.mxu0 (!%p4914_p6), %v5444_v2 }
 0xe04   : > { %4103 = vst [vmem:[#allocation2 + $0x8] sm:$0xff] %v4099_v23  ;;  %v4101_v62 = vadd.f32 %v5029_v55, %v6464_v42  ;;  %v5446_v42 = vld [vmem:[%s6987_s20 + $0x8] sm:$0xff] (!%p4914_p6)   ;;  %4958 = vmatprep.subr.bf16.mxu0 (!%p4914_p6), %v5445_v36 }
 0xe05   : > { %4104 = vst [vmem:[#allocation2 + $0x10] sm:$0xff] %v4100_v12  ;;  %v4142_v44 = vpack.c.bf16 (!%p4914_p6), %v4100_v12, %v4098_v52 }
 0xe06   : > { %4105 = vst [vmem:[#allocation2 + $0x18] sm:$0xff] %v4101_v62  ;;  %v4143_v34 = vpack.c.bf16 (!%p4914_p6), %v4101_v62, %v4099_v23 }
 0xe07   : > { %4959 = vmatpush3.bf16.msra.mxu0 %v5446_v42 }
 0xe08   : > { %4279 = vmatprep.mubr.bf16.mxu0 %v4143_v34  ;;  %4960 = vmatprep.subr.bf16.mxu0 %v5447_v63 }
 0xe0b   : > { %4961 = vmatpush3.bf16.msra.mxu0 %v5448_v0 }
 0xe0c   : > { %4962 = vmatprep.subr.bf16.mxu0 %v5449_v5 }
 0xe0f   : > { %4963 = vmatpush3.bf16.msra.mxu0 %v5450_v19 }
 0xe10   : > { %4964 = vmatprep.subr.bf16.mxu0 %v5451_v6 }
 0xe13   : > { %4965 = vmatpush3.bf16.msra.mxu0 %v5452_v47 }
 0xe14   : > { %4966 = vmatprep.subr.bf16.mxu0 %v5453_v14 }
 0xe17   : > { %4967 = vmatpush3.bf16.msra.mxu0 %v5454_v15 }
 0xe18   : > { %4968 = vmatprep.subr.bf16.mxu0 %v5455_v27 }
 0xe1b   : > { %4969 = vmatpush3.bf16.msra.mxu0 %v5456_v4 }
 0xe1c   : > { %4970 = vmatprep.subr.bf16.mxu0 %v5457_v46 }
 0xe1f   : > { %4971 = vmatpush3.bf16.msra.mxu0 %v5458_v54 }
 0xe22   : > { %4280 = vmatmul.mubr.bf16.vlgmr.msra.gmra.mrb[0].mxu0 %v4142_v44 }
 0xef5   : > { %v4972_v16 = vpop.f32.mrb[0].mxu0 }
 0xef6   : > { %v4973_v28 = vpop.f32.mrb[1].mxu0 }
 0xef7   : > { %v4974_v10 = vadd.f32 %v4973_v28, %v4972_v16  ;;  %v4975_v3 = vpop.f32.mrb[2].mxu0 }
 0xef8   : > { %v4976_v18 = vpop.f32.mrb[3].mxu0 }
 0xef9   : > { %v4282_v48 = vadd.f32 %v4974_v10, %v4915_v32  ;;  %v4977_v41 = vadd.f32 %v4976_v18, %v4975_v3 }
 0xefb   : > { %4289 = vst.msk [vmem:[#allocation12] sm:$0xff] %vm4288_vm13, %v4282_v48  ;;  %v4291_v56 = vmul.f32 0.5, %v4282_v48  ;;  %v4285_v25 = vadd.f32 %v4977_v41, %v4915_v32 }
 0xefd   : > { %v4299_v20 = vand.u32 2147483647, %v4291_v56  ;;  %4290 = vst.msk [vmem:[#allocation12 + $0x8] sm:$0xff] %vm4288_vm13, %v4285_v25  ;;  %v4292_v26 = vmul.f32 0.5, %v4285_v25  ;;  %v4293_v50 = vmax.f32 %v4291_v56, 0.0  ;;  %vm4295_vm0 = vcmp.ne.f32.partialorder %v4291_v56, %v4291_v56 }
 0xeff   : > { %v4301_v33 = vsub.f32 0.0, %v4299_v20  ;;  %v4300_v11 = vand.u32 2147483647, %v4292_v26  ;;  %v4294_v1 = vmax.f32 %v4292_v26, 0.0  ;;  %vm4296_vm2 = vcmp.ne.f32.partialorder %v4292_v26, %v4292_v26 }
 0xf01   : > { %v4303_v60 = vmul.f32 1.442695, %v4301_v33  ;;  %v4302_v17 = vsub.f32 0.0, %v4300_v11 }
 0xf03   : > { %5459 = vpow2.f32 %v4303_v60  ;;  %v4305_v30 = vmul.f32 1.442695, %v4302_v17 }
 0xf05   : > { %5461 = vpow2.f32 %v4305_v30 }
 0xf0d   : > { %v5460_v51 = vpop.eup %5459 }
 0xf0e   : > { %v4307_v13 = vadd.f32 1.0, %v5460_v51  ;;  %v4310_v53 = vmul.f32 -0.5, %v5460_v51  ;;  %v4313_v8 = vand.u32 2147483647, %v5460_v51 }
 0xf0f   : > { %v5462_v40 = vpop.eup %5461 }
 0xf10   : > { %5463 = vlog2.f32 %v4307_v13  ;;  %v4316_v37 = vadd.f32 1.0, %v5462_v40  ;;  %v4319_v9 = vmul.f32 -0.5, %v5462_v40  ;;  %v4311_v31 = vadd.f32 1.0, %v4310_v53 }
 0xf11   : > { %v4322_v43 = vand.u32 2147483647, %v5462_v40  ;;  %vm4314_vm14 = vcmp.lt.f32.partialorder %v4313_v8, 0.0004427343 }
 0xf12   : > { %5465 = vlog2.f32 %v4316_v37  ;;  %v4320_v24 = vadd.f32 1.0, %v4319_v9  ;;  %v4312_v45 = vmul.f32 %v5460_v51, %v4311_v31 }
 0xf13   : > { %vm4323_vm15 = vcmp.lt.f32.partialorder %v4322_v43, 0.0004427343 }
 0xf14   : > { %v4321_v29 = vmul.f32 %v5462_v40, %v4320_v24 }
 0xf1a   : > { %v5464_v7 = vpop.eup %5463 }
 0xf1b   : > { %v4309_v38 = vmul.f32 0.6931472, %v5464_v7 }
 0xf1c   : > { %v5466_v49 = vpop.eup %5465 }
 0xf1d   : > { %v4315_v22 = vsel %vm4314_vm14, %v4312_v45, %v4309_v38  ;;  %v4318_v39 = vmul.f32 0.6931472, %v5466_v49 }
 0xf1e   : > { %v4325_v59 = vadd.f32 %v4315_v22, %v4293_v50 }
 0xf1f   : > { %v4324_v21 = vsel %vm4323_vm15, %v4321_v29, %v4318_v39 }
 0xf20   : > { %v4327_v57 = vsel %vm4295_vm0, %v4291_v56, %v4325_v59  ;;  %v4326_v52 = vadd.f32 %v4324_v21, %v4294_v1 }
 0xf21   : > { %v4329_v35 = vadd.f32 0.001, %v4327_v57 }
 0xf22   : > { %v4328_v58 = vsel %vm4296_vm2, %v4292_v26, %v4326_v52 }
 0xf23   : > { %4332 = vst.msk [vmem:[#allocation12] sm:$0xff] %vm4331_vm1, %v4329_v35  ;;  %v4330_v23 = vadd.f32 0.001, %v4328_v58 }
 0xf25   : > { %4333 = vst.msk [vmem:[#allocation12 + $0x8] sm:$0xff] %vm4331_vm1, %v4330_v23 }
 0xf26 PF: > { %s6989_s7 = sld [smem:[#allocation21_spill]]  ;;  %s5692_s17 = smov [#allocation12]  }
 0xf27   : > { %s4343_s4 = sshll.u32 %s5692_s17, 4  ;;  %s4344_s4 = int_to_ptr.vmem [resolvable:$true] %s4343_s4 }
 0xf28   : > { %s5587_s23 = scalar_lea.vmem %s4344_s4, 256  ;;  %p5594_p1 = scmp.lt.s32.totalorder %s4344_s4, %s4344_s4 }
 0xf29   : > { %p5588_p0 = scmp.ne.s32.totalorder %s4344_s4, %s5587_s23  ;;  %p5595_p11 = scmp.lt.s32.totalorder %s5587_s23, %s5587_s23 }
 0xf2b   : > { %p5596_p2 = por %p5595_p11, %p5594_p1 }
 0xf2c   : > { %p5060_p8 = scmp.eq.s32.totalorder %s6989_s7, 1 }
 0xf2e   : > { %p5589_p5 = pnand %p5588_p0, %p5060_p8 }
 0xf30   : > { %p5590_p13 = pneg %p5589_p5 }
 0xf32   : > { %p5597_p10 = pnand %p5596_p2, %p5590_p13 }
 0xf34   : > { %5600 = shalt.err (!%p5597_p10)
}
 0xf35   : > { %s6990_s2 = sld [smem:[#allocation40_spill]] }
 0xf3b   : > { %s6991_s19 = smov %s6990_s2  ;;  %s5601_s5 = scalar_lea.hbm %s6990_s2, 256 }
 0xf3c   : > { %p5602_p3 = scmp.ne.s32.totalorder %s6991_s19, %s5601_s5  ;;  %p5607_p9 = scmp.lt.u32.totalorder %s5601_s5, %s6991_s19 }
 0xf3e   : > { %p5603_p12 = pnand %p5602_p3, %p5060_p8 }
 0xf40   : > { %p5604_p7 = pneg %p5603_p12 }
 0xf42   : > { %p5609_p4 = pnand %p5607_p9, %p5604_p7 }
 0xf44   : > { %5612 = shalt.err (!%p5609_p4)
}
 0xf45   : > { %s5693_s15 = smov 128   ;;  %s5694_s21 = smov 8  }
 0xf46   : > { %5043 = dma.vmem_to_hbm [thread:$0]  (%p5060_p8), %s4344_s4, 256, %s6991_s19, [#allocation6], %s5693_s15, %s5693_s15, %s5694_s21  }
 0xf47   : > { %5650 = dma.done.wait (%p5060_p8), [#allocation6], 256  }
 0xf48   : > { %5652 = vsyncadd (%p5060_p8), [#allocation6], 4294967040 }
 0xf49 PF: > { %s6992_s27 = sld [smem:[#allocation20_spill]]  ;;  %s6993_s2 = sld [smem:[#allocation17_spill]] }
 0xf4a   : > { %s6994_s25 = sld [smem:[#allocation18_spill]]  ;;  %s6995_s26 = sld [smem:[#allocation23_spill]] }
 0xf4b   : > { %s6997_s3 = sld [smem:[#allocation22_spill]] }
 0xf4f   : > { %s41_s28 = sadd.s32 1, %s6992_s27   ;;  %s6996_s27 = sld [smem:[#allocation19_spill]] }
 0xf50   : > { %p38_p6 = scmp.ge.s32.totalorder %s41_s28, 4  }
 0xf52   :  { %40 = sbr.rel (!%p38_p6) target bundleno = 26 (0x1a), region = 214 }
 0xf59   :  { %4359 = vsyncpa [#allocation5], 1 }
 0xf5a   :  { %4361 = vsyncpa [#allocation5 + $0x1], 1 }
 0xf5b   :  { %4362 = vsyncpa [#allocation8], 1 }
 0xf5c   :  { %4364 = vsyncpa [#allocation8 + $0x1], 1 }
 0xf5d   :  { %4365 = vsyncpa [#allocation11], 1 }
 0xf5e   :  { %4367 = vsyncpa [#allocation11 + $0x1], 1 }
 0xf5f   :  { %4368 = vsyncpa [#allocation6], 1 }
 0xf60   :  { %4370 = vsyncpa [#allocation6 + $0x1], 1 }

</bundles_post_ra>
